<compile_context>
chip_gen: v7x
topology: tpu7x:2x2x1
jax: 0.10.0
libtpu: 0.0.40
codegen_flags: <defaults>
</compile_context>

<pallas_src>
import functools

import jax
import jax.numpy as jnp
from jax import lax
from jax.experimental import pallas as pl
from jax.experimental.pallas import tpu as pltpu

EPS = 1e-5
LANE = 128


def _round_up(x, m):
    return (x + m - 1) // m * m


def _vmem_limit_bytes():
    """Scoped-VMEM request per generation.

    v5e/v6e (128 MiB physical): request capacity minus 32 MiB headroom (the old
    min(cap//2, 64 MiB) left ~75% unused).  v7x (64 MiB): stay at the 32 MiB
    scoped default and keep the tile estimate honest instead.
    """
    try:
        cap = pltpu.get_tpu_info().vmem_capacity_bytes
    except Exception:
        cap = 64 * 1024 * 1024
    if cap >= 96 * 1024 * 1024:
        return int(cap - 32 * 1024 * 1024)
    return int(min(cap // 2, 32 * 1024 * 1024))


def _pick_row_block(N, H, W, c_max, cout_p, budget):
    """Largest even row block TH dividing H whose per-tile working set fits.

    The estimate includes the double-buffered bf16 weight, the 1-row halos, the
    in-kernel bf16 temporaries (masked copy, column-padded copy, im2col taps +
    concat copy), the f32 accumulator and the double-buffered bf16 output block.
    Prefers TH with TH*W a multiple of 256 (MXU M alignment) and keeps >= 2 grid
    programs so both v7x TensorCores get work.
    """
    K = 9 * c_max
    best = aligned = None
    for t in range(2, H + 1, 2):
        if H % t:
            continue
        rows = t * W
        est = (
            2 * (t + 2) * W * c_max * 2        # bf16 input block + halos, double-buffered
            + 2 * K * cout_p * 2               # bf16 weight, double-buffered
            + (t + 2) * W * c_max * 6          # f32 fused-BN temp + bf16 masked copy
            + (t + 2) * (W + 2) * c_max * 2    # column-padded bf16 block
            + 2 * rows * K * 2                 # bf16 im2col taps + patch copy
            + rows * cout_p * 4                # f32 accumulator
            + 2 * rows * cout_p * 2            # bf16 output block, double-buffered
        )
        if est <= budget:
            best = t
            if rows % 256 == 0:
                aligned = t
    t = best
    if aligned is not None and best is not None and aligned * 2 >= best:
        t = aligned
    if t is None:
        if H % 2 == 0:
            t = 2
        else:
            # TODO(synk): odd H needs an element-offset output/halo scheme.
            raise NotImplementedError("row blocking requires an even H")
    if N * (H // t) < 2:                        # keep >= 2 programs for v7x megacore
        for t2 in range(t - 2, 1, -2):
            if H % t2 == 0:
                t = t2
                break
    return t


def _make_conv_kernel(fuse_input_bn_relu):
    """3x3 conv (+ optional fused previous-stage BN+ReLU on the input) for one tile.

    Inputs come from the UNPADDED activation: a main TH-row block plus two
    clamped 1-row halos.  The conv's zero padding (image-boundary rows and the
    left/right columns) is reconstructed in VMEM, so no spatially padded copy of
    the activation ever exists in HBM.
    """

    def kernel(top_ref, mid_ref, bot_ref, w_ref, *rest):
        if fuse_input_bn_relu:
            sc_ref, sh_ref, y_ref, stat_ref = rest
        else:
            y_ref, stat_ref = rest

        TH = mid_ref.shape[1]
        W = mid_ref.shape[2]
        cin = mid_ref.shape[3]
        cout = w_ref.shape[1]
        rows = TH * W
        rb = pl.program_id(1)
        H = pl.num_programs(1) * TH

        # Stitch the row block with its clamped halos: rows [rb*TH-1, rb*TH+TH].
        x = jnp.concatenate([top_ref[0], mid_ref[0], bot_ref[0]], axis=0)  # (TH+2, W, cin) bf16

        # Row-validity mask from one 1-D iota: the clamped halo rows at the image
        # top/bottom stand in for the conv's zero padding and must be zeroed.
        gi = lax.broadcasted_iota(jnp.int32, (TH + 2, 1), 0) + (rb * TH - 1)
        valid = ((gi >= 0) & (gi < H))[:, :, None]                        # (TH+2,1,1)

        if fuse_input_bn_relu:
            # Previous stage's BatchNorm (batch stats) + ReLU fused into the load
            # (affine in f32 for accuracy), then cast to bf16 once.
            xf = jnp.maximum(x.astype(jnp.float32) * sc_ref[...] + sh_ref[...], 0.0)
            xb = jnp.where(valid, xf, 0.0).astype(jnp.bfloat16)
        else:
            xb = jnp.where(valid, x, 0.0).astype(jnp.bfloat16)

        # Reconstruct the conv's zero-padded W border in VMEM (bf16 throughout).
        zcol = jnp.zeros((TH + 2, 1, cin), jnp.bfloat16)
        xp = jnp.concatenate([zcol, xb, zcol], axis=1)                    # (TH+2, W+2, cin)

        # im2col entirely in bf16: one lane-aligned (rows, 9*cin) patch feeding a
        # single MXU matmul with fp32 accumulation.
        # TODO(synk): write taps straight into a VMEM scratch to drop the concat copy.
        taps = [xp[kh:kh + TH, kw:kw + W, :].reshape(rows, cin)
                for kh in range(3) for kw in range(3)]
        patch = jnp.concatenate(taps, axis=-1)

        acc = jnp.dot(patch, w_ref[...], preferred_element_type=jnp.float32)
        # Conv bias intentionally omitted: a per-channel constant is exactly
        # cancelled by the following training-mode BatchNorm mean subtraction.

        # Per-tile BatchNorm partial statistics (single pass: sum & sum of squares).
        s = jnp.sum(acc, axis=0, keepdims=True)
        ss = jnp.sum(acc * acc, axis=0, keepdims=True)
        stat_ref[...] = jnp.concatenate([s, ss], axis=0).reshape(1, 1, 2, cout)

        # Lane-dense bf16 pre-BN activation (halves inter-stage HBM traffic).
        y_ref[...] = acc.reshape(1, TH, W, cout).astype(y_ref.dtype)

    return kernel


def _conv_stage(x, w_r, row_block, in_affine=None):
    """One conv3x3 stage, tiled over (batch N, H row blocks).

    x        : (N, H, W, Cin_p) bf16 — spatially UNPADDED, channels lane-padded
    w_r      : (9*Cin_p, Cout_p) bf16
    in_affine: optional (scale, shift), each (1, Cin_p) f32 — previous stage's
               BN+ReLU fused into the input load.
    returns  : (pre-BN activation (N,H,W,Cout_p) bf16,
                per-tile stats (N, n_rb, 2, Cout_p) f32)
    """
    N, H, W, cin = x.shape
    cout = w_r.shape[1]
    K = w_r.shape[0]
    TH = row_block
    assert H % TH == 0, "row_block must divide H"
    n_rb = H // TH

    mid = pl.BlockSpec((1, TH, W, cin), lambda n, rb: (n, rb, 0, 0))
    # Clamped 1-row halos (block index == element row for size-1 blocks); the
    # kernel re-zeroes the clamped rows at the image boundary.
    top = pl.BlockSpec((1, 1, W, cin),
                       lambda n, rb: (n, jnp.maximum(rb * TH - 1, 0), 0, 0))
    bot = pl.BlockSpec((1, 1, W, cin),
                       lambda n, rb: (n, jnp.minimum((rb + 1) * TH, H - 1), 0, 0))
    # TODO(synk): pipeline_mode=pl.Buffered(1) on these grid-invariant operands
    # would reclaim extra VMEM on v7x.
    wsp = pl.BlockSpec((K, cout), lambda n, rb: (0, 0))
    vec = pl.BlockSpec((1, cin), lambda n, rb: (0, 0))

    in_specs = [top, mid, bot, wsp]
    args = [x, x, x, w_r]
    if in_affine is not None:
        in_specs += [vec, vec]
        args += list(in_affine)

    out_specs = (
        pl.BlockSpec((1, TH, W, cout), lambda n, rb: (n, rb, 0, 0)),
        pl.BlockSpec((1, 1, 2, cout), lambda n, rb: (n, rb, 0, 0)),
    )
    out_shape = (
        jax.ShapeDtypeStruct((N, H, W, cout), jnp.bfloat16),
        jax.ShapeDtypeStruct((N, n_rb, 2, cout), jnp.float32),
    )

    return pl.pallas_call(
        _make_conv_kernel(fuse_input_bn_relu=in_affine is not None),
        grid=(N, n_rb),
        in_specs=in_specs,
        out_specs=out_specs,
        out_shape=out_shape,
        compiler_params=pltpu.CompilerParams(
            dimension_semantics=("parallel", "parallel"),
            vmem_limit_bytes=_vmem_limit_bytes(),
        ),
    )(*args)


def _bn_relu_kernel(y_ref, sc_ref, sh_ref, o_ref):
    cout = o_ref.shape[3]
    v = jnp.maximum(y_ref[0].astype(jnp.float32) * sc_ref[...] + sh_ref[...], 0.0)
    o_ref[...] = v[None, :, :, :cout]


def _bn_relu_slice(y, scale, shift, cout, row_block):
    """Final BN(scale/shift) + ReLU with the channel un-padding fused into the store."""
    N, H, W, cp = y.shape
    TH = row_block
    n_rb = H // TH
    return pl.pallas_call(
        _bn_relu_kernel,
        grid=(N, n_rb),
        in_specs=[pl.BlockSpec((1, TH, W, cp), lambda n, rb: (n, rb, 0, 0)),
                  pl.BlockSpec((1, cp), lambda n, rb: (0, 0)),
                  pl.BlockSpec((1, cp), lambda n, rb: (0, 0))],
        out_specs=pl.BlockSpec((1, TH, W, cout), lambda n, rb: (n, rb, 0, 0)),
        out_shape=jax.ShapeDtypeStruct((N, H, W, cout), jnp.float32),
        compiler_params=pltpu.CompilerParams(
            dimension_semantics=("parallel", "parallel"),
            vmem_limit_bytes=_vmem_limit_bytes(),
        ),
    )(y, scale, shift)


def _bn_affine(stats, gamma_p, beta_p, count):
    """Reduce per-tile (sum, sum_sq) to the per-channel BN scale/shift (fp32)."""
    s = jnp.sum(stats[:, :, 0, :], axis=(0, 1))
    ss = jnp.sum(stats[:, :, 1, :], axis=(0, 1))
    mean = s / count
    var = jnp.maximum(ss / count - mean * mean, 0.0)   # biased var (PyTorch training fwd)
    scale = gamma_p * lax.rsqrt(var + EPS)
    shift = beta_p - mean * scale
    return scale.reshape(1, -1), shift.reshape(1, -1)


def _prep_weight(w_hwio, cin_p, cout_p):
    """(3,3,Cin,Cout) HWIO -> (9*Cin_p, Cout_p) bf16 for the fused im2col matmul."""
    KH, KW, cin, cout = w_hwio.shape
    w = jnp.pad(w_hwio, ((0, 0), (0, 0), (0, cin_p - cin), (0, cout_p - cout)))
    return w.reshape(KH * KW * cin_p, cout_p).astype(jnp.bfloat16)


def _pad_vec(v, cp):
    return jnp.pad(v.astype(jnp.float32), (0, cp - v.shape[0]))


def double_conv(x_nchw, params, row_block=None):
    """DoubleConv forward. x_nchw: (N, Cin, H, W) f32 -> (N, Cout, H, W) f32."""
    N, cin, H, W = x_nchw.shape
    cout = params["g1"].shape[0]
    cin_p = _round_up(cin, LANE)
    cout_p = _round_up(cout, LANE)
    if row_block is None:
        row_block = _pick_row_block(N, H, W, max(cin_p, cout_p), cout_p,
                                    int(_vmem_limit_bytes() * 0.8))

    # NCHW -> NHWC, lane-pad channels, cast once to the MXU operand dtype (bf16).
    # No spatial padding here: the kernels rebuild the conv's zero border in VMEM.
    # TODO(synk): for tiny Cin (3-4), read the unpadded channel dim and pack
    # 9*Cin into a single 128-lane K tile to avoid the ~32x lane-pad read blowup.
    x = jnp.transpose(x_nchw, (0, 2, 3, 1))
    x = jnp.pad(x, ((0, 0), (0, 0), (0, 0), (0, cin_p - cin))).astype(jnp.bfloat16)

    w1 = _prep_weight(params["w1"], cin_p, cout_p)
    w2 = _prep_weight(params["w2"], cout_p, cout_p)
    g1, be1 = _pad_vec(params["g1"], cout_p), _pad_vec(params["beta1"], cout_p)
    g2, be2 = _pad_vec(params["g2"], cout_p), _pad_vec(params["beta2"], cout_p)

    count = N * H * W

    # Conv biases (params["b1"], params["b2"]) are not applied: they are exactly
    # cancelled by the training-mode BatchNorm mean subtraction that follows.
    y1, st1 = _conv_stage(x, w1, row_block)                       # bf16 pre-BN act
    sc1, sh1 = _bn_affine(st1, g1, be1, count)

    # Stage 2: BN1 + ReLU fused into the conv input load.
    y2, st2 = _conv_stage(y1, w2, row_block, in_affine=(sc1, sh1))
    sc2, sh2 = _bn_affine(st2, g2, be2, count)

    # Final BN2 + ReLU + channel un-pad, then NHWC -> NCHW (single XLA transpose).
    out = _bn_relu_slice(y2, sc2, sh2, cout, row_block)           # (N,H,W,cout) f32
    return jnp.transpose(out, (0, 3, 1, 2))


def init_params(key, in_channels, out_channels):
    k1, k2, k3, k4 = jax.random.split(key, 4)
    fan1 = in_channels * 9
    fan2 = out_channels * 9
    return {
        # conv weights stored HWIO = (3, 3, Cin, Cout)
        "w1": jax.random.normal(k1, (3, 3, in_channels, out_channels), jnp.float32)
              * (1.0 / jnp.sqrt(fan1)),
        "b1": jax.random.normal(k2, (out_channels,), jnp.float32) * 0.05,
        "g1": jnp.ones((out_channels,), jnp.float32),        # BN default gamma
        "beta1": jnp.zeros((out_channels,), jnp.float32),    # BN default beta
        "w2": jax.random.normal(k3, (3, 3, out_channels, out_channels), jnp.float32)
              * (1.0 / jnp.sqrt(fan2)),
        "b2": jax.random.normal(k4, (out_channels,), jnp.float32) * 0.05,
        "g2": jnp.ones((out_channels,), jnp.float32),
        "beta2": jnp.zeros((out_channels,), jnp.float32),
    }


def _reference(x_nchw, params, conv_dtype):
    """Pure-JAX reference (with conv bias). conv_dtype=bf16 matches the MXU path."""
    def conv(x, w, b):
        y = lax.conv_general_dilated(
            x.astype(conv_dtype), w.astype(conv_dtype),
            window_strides=(1, 1), padding=((1, 1), (1, 1)),
            dimension_numbers=("NCHW", "HWIO", "NCHW"),
            preferred_element_type=jnp.float32)
        return y + b[None, :, None, None]

    def bn_relu(y, g, beta):
        mean = jnp.mean(y, axis=(0, 2, 3), keepdims=True)
        var = jnp.mean((y - mean) ** 2, axis=(0, 2, 3), keepdims=True)
        yn = (y - mean) * lax.rsqrt(var + EPS)
        return jnp.maximum(yn * g[None, :, None, None] + beta[None, :, None, None], 0.0)

    y = bn_relu(conv(x_nchw, params["w1"], params["b1"]), params["g1"], params["beta1"])
    y = bn_relu(conv(y, params["w2"], params["b2"]), params["g2"], params["beta2"])
    return y


if __name__ == "__main__":
    key = jax.random.PRNGKey(0)
    kx, kp = jax.random.split(key)

    in_channels, out_channels = 4, 8
    x = jax.random.normal(kx, (2, in_channels, 16, 16), jnp.float32)   # NCHW
    params = init_params(kp, in_channels, out_channels)

    # Exercise the auto tile picker (cheap, no extra compile).
    rb_auto = _pick_row_block(2, 16, 16, 128, 128, int(_vmem_limit_bytes() * 0.8))
    assert 16 % rb_auto == 0

    # row_block=8 -> a (2 x 2) grid per stage, exercising both clamped-halo edges
    # and the interior-halo path.
    fwd = jax.jit(functools.partial(double_conv, row_block=8))
    out = jax.block_until_ready(fwd(x, params))
    assert out.shape == (2, out_channels, 16, 16)

    # Check vs a reference using the same bf16 MXU operand precision (the kernel
    # additionally stores the inter-stage activation in bf16, hence the margin).
    ref_bf16 = _reference(x, params, jnp.bfloat16)
    assert jnp.allclose(out, ref_bf16, atol=2e-2, rtol=1e-2), "mismatch vs bf16-matched reference"
    # Loose sanity check vs the full-fp32 reference.
    ref_f32 = _reference(x, params, jnp.float32)
    assert jnp.allclose(out, ref_f32, atol=6e-2, rtol=6e-2), "mismatch vs fp32 reference"

    print("KERNEL_OK")
</pallas_src>

<mosaic_0001>
module attributes {stable_mosaic.version = 11 : i64} {
  func.func @kernel(%arg0: i32, %arg1: i32, %arg2: memref<1x1x16x128xbf16, #tpu.memory_space<vmem>>, %arg3: memref<1x8x16x128xbf16, #tpu.memory_space<vmem>>, %arg4: memref<1x1x16x128xbf16, #tpu.memory_space<vmem>>, %arg5: memref<1152x128xbf16, #tpu.memory_space<vmem>>, %arg6: memref<1x128xf32, #tpu.memory_space<vmem>>, %arg7: memref<1x128xf32, #tpu.memory_space<vmem>>, %arg8: memref<1x8x16x128xbf16, #tpu.memory_space<vmem>>, %arg9: memref<1x1x2x128xf32, #tpu.memory_space<vmem>>) attributes {dimension_semantics = [#tpu.dimension_semantics<parallel>, #tpu.dimension_semantics<parallel>], iteration_bounds = array<i64: 2, 2>, scalar_prefetch = 0 : i64, scratch_operands = 0 : i64, tpu.core_type = #tpu.core_type<tc>, window_params = [{transform_indices = @transform_0, window_bounds = array<i64: 1, 1, 16, 128>}, {transform_indices = @transform_1, window_bounds = array<i64: 1, 8, 16, 128>}, {transform_indices = @transform_2, window_bounds = array<i64: 1, 1, 16, 128>}, {pipeline_mode = #tpu.pipeline_mode<synchronous>, transform_indices = @transform_3, window_bounds = array<i64: 1152, 128>}, {pipeline_mode = #tpu.pipeline_mode<synchronous>, transform_indices = @transform_4, window_bounds = array<i64: 1, 128>}, {pipeline_mode = #tpu.pipeline_mode<synchronous>, transform_indices = @transform_5, window_bounds = array<i64: 1, 128>}, {transform_indices = @transform_6, window_bounds = array<i64: 1, 8, 16, 128>}, {transform_indices = @transform_7, window_bounds = array<i64: 1, 1, 2, 128>}]} {
    %c0 = arith.constant 0 : index
    %c0_0 = arith.constant 0 : index
    %c0_1 = arith.constant 0 : index
    %c0_2 = arith.constant 0 : index
    %0 = vector.load %arg2[%c0, %c0_0, %c0_1, %c0_2] : memref<1x1x16x128xbf16, #tpu.memory_space<vmem>>, vector<1x1x16x128xbf16>
    %1 = vector.shape_cast %0 : vector<1x1x16x128xbf16> to vector<1x16x128xbf16>
    %c0_3 = arith.constant 0 : index
    %c0_4 = arith.constant 0 : index
    %c0_5 = arith.constant 0 : index
    %c0_6 = arith.constant 0 : index
    %2 = vector.load %arg3[%c0_3, %c0_4, %c0_5, %c0_6] : memref<1x8x16x128xbf16, #tpu.memory_space<vmem>>, vector<1x8x16x128xbf16>
    %3 = vector.shape_cast %2 : vector<1x8x16x128xbf16> to vector<8x16x128xbf16>
    %c0_7 = arith.constant 0 : index
    %c0_8 = arith.constant 0 : index
    %c0_9 = arith.constant 0 : index
    %c0_10 = arith.constant 0 : index
    %4 = vector.load %arg4[%c0_7, %c0_8, %c0_9, %c0_10] : memref<1x1x16x128xbf16, #tpu.memory_space<vmem>>, vector<1x1x16x128xbf16>
    %5 = vector.shape_cast %4 : vector<1x1x16x128xbf16> to vector<1x16x128xbf16>
    %6 = tpu.concatenate %1, %3, %5 in 0 : vector<1x16x128xbf16>, vector<8x16x128xbf16>, vector<1x16x128xbf16> -> vector<10x16x128xbf16>
    %7 = tpu.iota {dimensions = array<i32: 0>} : vector<10x1xi32>
    %c8_i32 = arith.constant 8 : i32
    %8 = arith.muli %arg1, %c8_i32 : i32
    %c1_i32 = arith.constant 1 : i32
    %9 = arith.subi %8, %c1_i32 : i32
    %10 = vector.broadcast %9 : i32 to vector<10x1xi32>
    %11 = arith.addi %7, %10 : vector<10x1xi32>
    %c0_i32 = arith.constant 0 : i32
    %12 = vector.broadcast %c0_i32 : i32 to vector<10x1xi32>
    %13 = arith.cmpi sge, %11, %12 : vector<10x1xi32>
    %c16_i32 = arith.constant 16 : i32
    %14 = vector.broadcast %c16_i32 : i32 to vector<10x1xi32>
    %15 = arith.cmpi slt, %11, %14 : vector<10x1xi32>
    %16 = arith.andi %13, %15 : vector<10x1xi1>
    %17 = vector.shape_cast %16 : vector<10x1xi1> to vector<10x1x1xi1>
    %18 = arith.extf %6 : vector<10x16x128xbf16> to vector<10x16x128xf32>
    %c0_11 = arith.constant 0 : index
    %c0_12 = arith.constant 0 : index
    %19 = vector.load %arg6[%c0_11, %c0_12] : memref<1x128xf32, #tpu.memory_space<vmem>>, vector<1x128xf32>
    %20 = vector.shape_cast %19 : vector<1x128xf32> to vector<1x1x128xf32>
    %21 = vector.broadcast %20 : vector<1x1x128xf32> to vector<10x16x128xf32>
    %22 = arith.mulf %18, %21 : vector<10x16x128xf32>
    %c0_13 = arith.constant 0 : index
    %c0_14 = arith.constant 0 : index
    %23 = vector.load %arg7[%c0_13, %c0_14] : memref<1x128xf32, #tpu.memory_space<vmem>>, vector<1x128xf32>
    %24 = vector.shape_cast %23 : vector<1x128xf32> to vector<1x1x128xf32>
    %25 = vector.broadcast %24 : vector<1x1x128xf32> to vector<10x16x128xf32>
    %26 = arith.addf %22, %25 : vector<10x16x128xf32>
    %cst = arith.constant 0.000000e+00 : f32
    %27 = vector.broadcast %cst : f32 to vector<10x16x128xf32>
    %28 = arith.maximumf %26, %27 : vector<10x16x128xf32>
    %cst_15 = arith.constant 0.000000e+00 : f32
    %29 = vector.shape_cast %17 : vector<10x1x1xi1> to vector<10x1x1xi1>
    %30 = vector.broadcast %29 : vector<10x1x1xi1> to vector<10x16x128xi1>
    %31 = vector.broadcast %cst_15 : f32 to vector<10x16x128xf32>
    %32 = arith.select %30, %28, %31 : vector<10x16x128xi1>, vector<10x16x128xf32>
    %33 = arith.truncf %32 : vector<10x16x128xf32> to vector<10x16x128xbf16>
    %cst_16 = arith.constant 0.000000e+00 : bf16
    %34 = vector.broadcast %cst_16 : bf16 to vector<10x1x128xbf16>
    %35 = tpu.concatenate %34, %33, %34 in 1 : vector<10x1x128xbf16>, vector<10x16x128xbf16>, vector<10x1x128xbf16> -> vector<10x18x128xbf16>
    %36 = vector.extract_strided_slice %35 {offsets = [0, 0, 0], sizes = [8, 16, 128], strides = [1, 1, 1]} : vector<10x18x128xbf16> to vector<8x16x128xbf16>
    %37 = vector.shape_cast %36 : vector<8x16x128xbf16> to vector<128x128xbf16>
    %38 = vector.extract_strided_slice %35 {offsets = [0, 1, 0], sizes = [8, 16, 128], strides = [1, 1, 1]} : vector<10x18x128xbf16> to vector<8x16x128xbf16>
    %39 = vector.shape_cast %38 : vector<8x16x128xbf16> to vector<128x128xbf16>
    %40 = vector.extract_strided_slice %35 {offsets = [0, 2, 0], sizes = [8, 16, 128], strides = [1, 1, 1]} : vector<10x18x128xbf16> to vector<8x16x128xbf16>
    %41 = vector.shape_cast %40 : vector<8x16x128xbf16> to vector<128x128xbf16>
    %42 = vector.extract_strided_slice %35 {offsets = [1, 0, 0], sizes = [8, 16, 128], strides = [1, 1, 1]} : vector<10x18x128xbf16> to vector<8x16x128xbf16>
    %43 = vector.shape_cast %42 : vector<8x16x128xbf16> to vector<128x128xbf16>
    %44 = vector.extract_strided_slice %35 {offsets = [1, 1, 0], sizes = [8, 16, 128], strides = [1, 1, 1]} : vector<10x18x128xbf16> to vector<8x16x128xbf16>
    %45 = vector.shape_cast %44 : vector<8x16x128xbf16> to vector<128x128xbf16>
    %46 = vector.extract_strided_slice %35 {offsets = [1, 2, 0], sizes = [8, 16, 128], strides = [1, 1, 1]} : vector<10x18x128xbf16> to vector<8x16x128xbf16>
    %47 = vector.shape_cast %46 : vector<8x16x128xbf16> to vector<128x128xbf16>
    %48 = vector.extract_strided_slice %35 {offsets = [2, 0, 0], sizes = [8, 16, 128], strides = [1, 1, 1]} : vector<10x18x128xbf16> to vector<8x16x128xbf16>
    %49 = vector.shape_cast %48 : vector<8x16x128xbf16> to vector<128x128xbf16>
    %50 = vector.extract_strided_slice %35 {offsets = [2, 1, 0], sizes = [8, 16, 128], strides = [1, 1, 1]} : vector<10x18x128xbf16> to vector<8x16x128xbf16>
    %51 = vector.shape_cast %50 : vector<8x16x128xbf16> to vector<128x128xbf16>
    %52 = vector.extract_strided_slice %35 {offsets = [2, 2, 0], sizes = [8, 16, 128], strides = [1, 1, 1]} : vector<10x18x128xbf16> to vector<8x16x128xbf16>
    %53 = vector.shape_cast %52 : vector<8x16x128xbf16> to vector<128x128xbf16>
    %54 = tpu.concatenate %37, %39, %41, %43, %45, %47, %49, %51, %53 in 1 : vector<128x128xbf16>, vector<128x128xbf16>, vector<128x128xbf16>, vector<128x128xbf16>, vector<128x128xbf16>, vector<128x128xbf16>, vector<128x128xbf16>, vector<128x128xbf16>, vector<128x128xbf16> -> vector<128x1152xbf16>
    %c0_17 = arith.constant 0 : index
    %c0_18 = arith.constant 0 : index
    %55 = vector.load %arg5[%c0_17, %c0_18] : memref<1152x128xbf16, #tpu.memory_space<vmem>>, vector<1152x128xbf16>
    %cst_19 = arith.constant dense<0.000000e+00> : vector<128x128xf32>
    %56 = tpu.matmul %54, %55, %cst_19 {dimension_numbers = #tpu.dot_dimension_numbers<[1], [0], [0], [1], [0, 0, 1, 1], [], []>} : vector<128x1152xbf16>, vector<1152x128xbf16>, vector<128x128xf32> -> vector<128x128xf32>
    %cst_20 = arith.constant dense<0.000000e+00> : vector<128xf32>
    %57 = vector.multi_reduction <add>, %56, %cst_20 [0] : vector<128x128xf32> to vector<128xf32>
    %58 = vector.shape_cast %57 : vector<128xf32> to vector<1x128xf32>
    %59 = arith.mulf %56, %56 : vector<128x128xf32>
    %cst_21 = arith.constant dense<0.000000e+00> : vector<128xf32>
    %60 = vector.multi_reduction <add>, %59, %cst_21 [0] : vector<128x128xf32> to vector<128xf32>
    %61 = vector.shape_cast %60 : vector<128xf32> to vector<1x128xf32>
    %62 = tpu.concatenate %58, %61 in 0 : vector<1x128xf32>, vector<1x128xf32> -> vector<2x128xf32>
    %63 = vector.shape_cast %62 : vector<2x128xf32> to vector<1x1x2x128xf32>
    %c0_22 = arith.constant 0 : index
    %c0_23 = arith.constant 0 : index
    %c0_24 = arith.constant 0 : index
    %c0_25 = arith.constant 0 : index
    %64 = vector.load %arg9[%c0_22, %c0_23, %c0_24, %c0_25] : memref<1x1x2x128xf32, #tpu.memory_space<vmem>>, vector<1x1x2x128xf32>
    tpu.vector_store %arg9[%c0_22, %c0_23, %c0_24, %c0_25], %63 {strides = array<i32>} : memref<1x1x2x128xf32, #tpu.memory_space<vmem>>, vector<1x1x2x128xf32>,
    %65 = vector.shape_cast %56 : vector<128x128xf32> to vector<1x8x16x128xf32>
    %66 = arith.truncf %65 : vector<1x8x16x128xf32> to vector<1x8x16x128xbf16>
    %c0_26 = arith.constant 0 : index
    %c0_27 = arith.constant 0 : index
    %c0_28 = arith.constant 0 : index
    %c0_29 = arith.constant 0 : index
    %67 = vector.load %arg8[%c0_26, %c0_27, %c0_28, %c0_29] : memref<1x8x16x128xbf16, #tpu.memory_space<vmem>>, vector<1x8x16x128xbf16>
    tpu.vector_store %arg8[%c0_26, %c0_27, %c0_28, %c0_29], %66 {strides = array<i32>} : memref<1x8x16x128xbf16, #tpu.memory_space<vmem>>, vector<1x8x16x128xbf16>,
    return
  }
  func.func @transform_0(%arg0: i32, %arg1: i32) -> (i32, i32, i32, i32) {
    %c8_i32 = arith.constant 8 : i32
    %0 = arith.muli %arg1, %c8_i32 : i32
    %c1_i32 = arith.constant 1 : i32
    %1 = arith.subi %0, %c1_i32 : i32
    %c0_i32 = arith.constant 0 : i32
    %2 = arith.maxsi %1, %c0_i32 : i32
    %c0_i32_0 = arith.constant 0 : i32
    %c0_i32_1 = arith.constant 0 : i32
    %c0_i32_2 = arith.constant 0 : i32
    return %arg0, %2, %c0_i32_0, %c0_i32_1 : i32, i32, i32, i32
  }
  func.func @transform_1(%arg0: i32, %arg1: i32) -> (i32, i32, i32, i32) {
    %c0_i32 = arith.constant 0 : i32
    %c0_i32_0 = arith.constant 0 : i32
    %c0_i32_1 = arith.constant 0 : i32
    return %arg0, %arg1, %c0_i32, %c0_i32_0 : i32, i32, i32, i32
  }
  func.func @transform_2(%arg0: i32, %arg1: i32) -> (i32, i32, i32, i32) {
    %c1_i32 = arith.constant 1 : i32
    %0 = arith.addi %arg1, %c1_i32 : i32
    %c8_i32 = arith.constant 8 : i32
    %1 = arith.muli %0, %c8_i32 : i32
    %c15_i32 = arith.constant 15 : i32
    %2 = arith.minsi %1, %c15_i32 : i32
    %c0_i32 = arith.constant 0 : i32
    %c0_i32_0 = arith.constant 0 : i32
    %c0_i32_1 = arith.constant 0 : i32
    return %arg0, %2, %c0_i32, %c0_i32_0 : i32, i32, i32, i32
  }
  func.func @transform_3(%arg0: i32, %arg1: i32) -> (i32, i32) {
    %c0_i32 = arith.constant 0 : i32
    %c0_i32_0 = arith.constant 0 : i32
    %c0_i32_1 = arith.constant 0 : i32
    return %c0_i32, %c0_i32_0 : i32, i32
  }
  func.func @transform_4(%arg0: i32, %arg1: i32) -> (i32, i32) {
    %c0_i32 = arith.constant 0 : i32
    %c0_i32_0 = arith.constant 0 : i32
    %c0_i32_1 = arith.constant 0 : i32
    return %c0_i32, %c0_i32_0 : i32, i32
  }
  func.func @transform_5(%arg0: i32, %arg1: i32) -> (i32, i32) {
    %c0_i32 = arith.constant 0 : i32
    %c0_i32_0 = arith.constant 0 : i32
    %c0_i32_1 = arith.constant 0 : i32
    return %c0_i32, %c0_i32_0 : i32, i32
  }
  func.func @transform_6(%arg0: i32, %arg1: i32) -> (i32, i32, i32, i32) {
    %c0_i32 = arith.constant 0 : i32
    %c0_i32_0 = arith.constant 0 : i32
    %c0_i32_1 = arith.constant 0 : i32
    return %arg0, %arg1, %c0_i32, %c0_i32_0 : i32, i32, i32, i32
  }
  func.func @transform_7(%arg0: i32, %arg1: i32) -> (i32, i32, i32, i32) {
    %c0_i32 = arith.constant 0 : i32
    %c0_i32_0 = arith.constant 0 : i32
    %c0_i32_1 = arith.constant 0 : i32
    return %arg0, %arg1, %c0_i32, %c0_i32_0 : i32, i32, i32, i32
  }
}

module attributes {stable_mosaic.version = 11 : i64} {
  func.func @kernel(%arg0: i32, %arg1: i32, %arg2: memref<1x1x16x128xbf16, #tpu.memory_space<vmem>>, %arg3: memref<1x8x16x128xbf16, #tpu.memory_space<vmem>>, %arg4: memref<1x1x16x128xbf16, #tpu.memory_space<vmem>>, %arg5: memref<1152x128xbf16, #tpu.memory_space<vmem>>, %arg6: memref<1x8x16x128xbf16, #tpu.memory_space<vmem>>, %arg7: memref<1x1x2x128xf32, #tpu.memory_space<vmem>>) attributes {dimension_semantics = [#tpu.dimension_semantics<parallel>, #tpu.dimension_semantics<parallel>], iteration_bounds = array<i64: 2, 2>, scalar_prefetch = 0 : i64, scratch_operands = 0 : i64, tpu.core_type = #tpu.core_type<tc>, window_params = [{transform_indices = @transform_0, window_bounds = array<i64: 1, 1, 16, 128>}, {transform_indices = @transform_1, window_bounds = array<i64: 1, 8, 16, 128>}, {transform_indices = @transform_2, window_bounds = array<i64: 1, 1, 16, 128>}, {pipeline_mode = #tpu.pipeline_mode<synchronous>, transform_indices = @transform_3, window_bounds = array<i64: 1152, 128>}, {transform_indices = @transform_4, window_bounds = array<i64: 1, 8, 16, 128>}, {transform_indices = @transform_5, window_bounds = array<i64: 1, 1, 2, 128>}]} {
    %c0 = arith.constant 0 : index
    %c0_0 = arith.constant 0 : index
    %c0_1 = arith.constant 0 : index
    %c0_2 = arith.constant 0 : index
    %0 = vector.load %arg2[%c0, %c0_0, %c0_1, %c0_2] : memref<1x1x16x128xbf16, #tpu.memory_space<vmem>>, vector<1x1x16x128xbf16>
    %1 = vector.shape_cast %0 : vector<1x1x16x128xbf16> to vector<1x16x128xbf16>
    %c0_3 = arith.constant 0 : index
    %c0_4 = arith.constant 0 : index
    %c0_5 = arith.constant 0 : index
    %c0_6 = arith.constant 0 : index
    %2 = vector.load %arg3[%c0_3, %c0_4, %c0_5, %c0_6] : memref<1x8x16x128xbf16, #tpu.memory_space<vmem>>, vector<1x8x16x128xbf16>
    %3 = vector.shape_cast %2 : vector<1x8x16x128xbf16> to vector<8x16x128xbf16>
    %c0_7 = arith.constant 0 : index
    %c0_8 = arith.constant 0 : index
    %c0_9 = arith.constant 0 : index
    %c0_10 = arith.constant 0 : index
    %4 = vector.load %arg4[%c0_7, %c0_8, %c0_9, %c0_10] : memref<1x1x16x128xbf16, #tpu.memory_space<vmem>>, vector<1x1x16x128xbf16>
    %5 = vector.shape_cast %4 : vector<1x1x16x128xbf16> to vector<1x16x128xbf16>
    %6 = tpu.concatenate %1, %3, %5 in 0 : vector<1x16x128xbf16>, vector<8x16x128xbf16>, vector<1x16x128xbf16> -> vector<10x16x128xbf16>
    %7 = tpu.iota {dimensions = array<i32: 0>} : vector<10x1xi32>
    %c8_i32 = arith.constant 8 : i32
    %8 = arith.muli %arg1, %c8_i32 : i32
    %c1_i32 = arith.constant 1 : i32
    %9 = arith.subi %8, %c1_i32 : i32
    %10 = vector.broadcast %9 : i32 to vector<10x1xi32>
    %11 = arith.addi %7, %10 : vector<10x1xi32>
    %c0_i32 = arith.constant 0 : i32
    %12 = vector.broadcast %c0_i32 : i32 to vector<10x1xi32>
    %13 = arith.cmpi sge, %11, %12 : vector<10x1xi32>
    %c16_i32 = arith.constant 16 : i32
    %14 = vector.broadcast %c16_i32 : i32 to vector<10x1xi32>
    %15 = arith.cmpi slt, %11, %14 : vector<10x1xi32>
    %16 = arith.andi %13, %15 : vector<10x1xi1>
    %17 = vector.shape_cast %16 : vector<10x1xi1> to vector<10x1x1xi1>
    %cst = arith.constant 0.000000e+00 : f32
    %18 = arith.truncf %cst : f32 to bf16
    %19 = vector.shape_cast %17 : vector<10x1x1xi1> to vector<10x1x1xi1>
    %20 = vector.broadcast %19 : vector<10x1x1xi1> to vector<10x16x128xi1>
    %21 = vector.broadcast %18 : bf16 to vector<10x16x128xbf16>
    %22 = arith.select %20, %6, %21 : vector<10x16x128xi1>, vector<10x16x128xbf16>
    %cst_11 = arith.constant 0.000000e+00 : bf16
    %23 = vector.broadcast %cst_11 : bf16 to vector<10x1x128xbf16>
    %24 = tpu.concatenate %23, %22, %23 in 1 : vector<10x1x128xbf16>, vector<10x16x128xbf16>, vector<10x1x128xbf16> -> vector<10x18x128xbf16>
    %25 = vector.extract_strided_slice %24 {offsets = [0, 0, 0], sizes = [8, 16, 128], strides = [1, 1, 1]} : vector<10x18x128xbf16> to vector<8x16x128xbf16>
    %26 = vector.shape_cast %25 : vector<8x16x128xbf16> to vector<128x128xbf16>
    %27 = vector.extract_strided_slice %24 {offsets = [0, 1, 0], sizes = [8, 16, 128], strides = [1, 1, 1]} : vector<10x18x128xbf16> to vector<8x16x128xbf16>
    %28 = vector.shape_cast %27 : vector<8x16x128xbf16> to vector<128x128xbf16>
    %29 = vector.extract_strided_slice %24 {offsets = [0, 2, 0], sizes = [8, 16, 128], strides = [1, 1, 1]} : vector<10x18x128xbf16> to vector<8x16x128xbf16>
    %30 = vector.shape_cast %29 : vector<8x16x128xbf16> to vector<128x128xbf16>
    %31 = vector.extract_strided_slice %24 {offsets = [1, 0, 0], sizes = [8, 16, 128], strides = [1, 1, 1]} : vector<10x18x128xbf16> to vector<8x16x128xbf16>
    %32 = vector.shape_cast %31 : vector<8x16x128xbf16> to vector<128x128xbf16>
    %33 = vector.extract_strided_slice %24 {offsets = [1, 1, 0], sizes = [8, 16, 128], strides = [1, 1, 1]} : vector<10x18x128xbf16> to vector<8x16x128xbf16>
    %34 = vector.shape_cast %33 : vector<8x16x128xbf16> to vector<128x128xbf16>
    %35 = vector.extract_strided_slice %24 {offsets = [1, 2, 0], sizes = [8, 16, 128], strides = [1, 1, 1]} : vector<10x18x128xbf16> to vector<8x16x128xbf16>
    %36 = vector.shape_cast %35 : vector<8x16x128xbf16> to vector<128x128xbf16>
    %37 = vector.extract_strided_slice %24 {offsets = [2, 0, 0], sizes = [8, 16, 128], strides = [1, 1, 1]} : vector<10x18x128xbf16> to vector<8x16x128xbf16>
    %38 = vector.shape_cast %37 : vector<8x16x128xbf16> to vector<128x128xbf16>
    %39 = vector.extract_strided_slice %24 {offsets = [2, 1, 0], sizes = [8, 16, 128], strides = [1, 1, 1]} : vector<10x18x128xbf16> to vector<8x16x128xbf16>
    %40 = vector.shape_cast %39 : vector<8x16x128xbf16> to vector<128x128xbf16>
    %41 = vector.extract_strided_slice %24 {offsets = [2, 2, 0], sizes = [8, 16, 128], strides = [1, 1, 1]} : vector<10x18x128xbf16> to vector<8x16x128xbf16>
    %42 = vector.shape_cast %41 : vector<8x16x128xbf16> to vector<128x128xbf16>
    %43 = tpu.concatenate %26, %28, %30, %32, %34, %36, %38, %40, %42 in 1 : vector<128x128xbf16>, vector<128x128xbf16>, vector<128x128xbf16>, vector<128x128xbf16>, vector<128x128xbf16>, vector<128x128xbf16>, vector<128x128xbf16>, vector<128x128xbf16>, vector<128x128xbf16> -> vector<128x1152xbf16>
    %c0_12 = arith.constant 0 : index
    %c0_13 = arith.constant 0 : index
    %44 = vector.load %arg5[%c0_12, %c0_13] : memref<1152x128xbf16, #tpu.memory_space<vmem>>, vector<1152x128xbf16>
    %cst_14 = arith.constant dense<0.000000e+00> : vector<128x128xf32>
    %45 = tpu.matmul %43, %44, %cst_14 {dimension_numbers = #tpu.dot_dimension_numbers<[1], [0], [0], [1], [0, 0, 1, 1], [], []>} : vector<128x1152xbf16>, vector<1152x128xbf16>, vector<128x128xf32> -> vector<128x128xf32>
    %cst_15 = arith.constant dense<0.000000e+00> : vector<128xf32>
    %46 = vector.multi_reduction <add>, %45, %cst_15 [0] : vector<128x128xf32> to vector<128xf32>
    %47 = vector.shape_cast %46 : vector<128xf32> to vector<1x128xf32>
    %48 = arith.mulf %45, %45 : vector<128x128xf32>
    %cst_16 = arith.constant dense<0.000000e+00> : vector<128xf32>
    %49 = vector.multi_reduction <add>, %48, %cst_16 [0] : vector<128x128xf32> to vector<128xf32>
    %50 = vector.shape_cast %49 : vector<128xf32> to vector<1x128xf32>
    %51 = tpu.concatenate %47, %50 in 0 : vector<1x128xf32>, vector<1x128xf32> -> vector<2x128xf32>
    %52 = vector.shape_cast %51 : vector<2x128xf32> to vector<1x1x2x128xf32>
    %c0_17 = arith.constant 0 : index
    %c0_18 = arith.constant 0 : index
    %c0_19 = arith.constant 0 : index
    %c0_20 = arith.constant 0 : index
    %53 = vector.load %arg7[%c0_17, %c0_18, %c0_19, %c0_20] : memref<1x1x2x128xf32, #tpu.memory_space<vmem>>, vector<1x1x2x128xf32>
    tpu.vector_store %arg7[%c0_17, %c0_18, %c0_19, %c0_20], %52 {strides = array<i32>} : memref<1x1x2x128xf32, #tpu.memory_space<vmem>>, vector<1x1x2x128xf32>,
    %54 = vector.shape_cast %45 : vector<128x128xf32> to vector<1x8x16x128xf32>
    %55 = arith.truncf %54 : vector<1x8x16x128xf32> to vector<1x8x16x128xbf16>
    %c0_21 = arith.constant 0 : index
    %c0_22 = arith.constant 0 : index
    %c0_23 = arith.constant 0 : index
    %c0_24 = arith.constant 0 : index
    %56 = vector.load %arg6[%c0_21, %c0_22, %c0_23, %c0_24] : memref<1x8x16x128xbf16, #tpu.memory_space<vmem>>, vector<1x8x16x128xbf16>
    tpu.vector_store %arg6[%c0_21, %c0_22, %c0_23, %c0_24], %55 {strides = array<i32>} : memref<1x8x16x128xbf16, #tpu.memory_space<vmem>>, vector<1x8x16x128xbf16>,
    return
  }
  func.func @transform_0(%arg0: i32, %arg1: i32) -> (i32, i32, i32, i32) {
    %c8_i32 = arith.constant 8 : i32
    %0 = arith.muli %arg1, %c8_i32 : i32
    %c1_i32 = arith.constant 1 : i32
    %1 = arith.subi %0, %c1_i32 : i32
    %c0_i32 = arith.constant 0 : i32
    %2 = arith.maxsi %1, %c0_i32 : i32
    %c0_i32_0 = arith.constant 0 : i32
    %c0_i32_1 = arith.constant 0 : i32
    %c0_i32_2 = arith.constant 0 : i32
    return %arg0, %2, %c0_i32_0, %c0_i32_1 : i32, i32, i32, i32
  }
  func.func @transform_1(%arg0: i32, %arg1: i32) -> (i32, i32, i32, i32) {
    %c0_i32 = arith.constant 0 : i32
    %c0_i32_0 = arith.constant 0 : i32
    %c0_i32_1 = arith.constant 0 : i32
    return %arg0, %arg1, %c0_i32, %c0_i32_0 : i32, i32, i32, i32
  }
  func.func @transform_2(%arg0: i32, %arg1: i32) -> (i32, i32, i32, i32) {
    %c1_i32 = arith.constant 1 : i32
    %0 = arith.addi %arg1, %c1_i32 : i32
    %c8_i32 = arith.constant 8 : i32
    %1 = arith.muli %0, %c8_i32 : i32
    %c15_i32 = arith.constant 15 : i32
    %2 = arith.minsi %1, %c15_i32 : i32
    %c0_i32 = arith.constant 0 : i32
    %c0_i32_0 = arith.constant 0 : i32
    %c0_i32_1 = arith.constant 0 : i32
    return %arg0, %2, %c0_i32, %c0_i32_0 : i32, i32, i32, i32
  }
  func.func @transform_3(%arg0: i32, %arg1: i32) -> (i32, i32) {
    %c0_i32 = arith.constant 0 : i32
    %c0_i32_0 = arith.constant 0 : i32
    %c0_i32_1 = arith.constant 0 : i32
    return %c0_i32, %c0_i32_0 : i32, i32
  }
  func.func @transform_4(%arg0: i32, %arg1: i32) -> (i32, i32, i32, i32) {
    %c0_i32 = arith.constant 0 : i32
    %c0_i32_0 = arith.constant 0 : i32
    %c0_i32_1 = arith.constant 0 : i32
    return %arg0, %arg1, %c0_i32, %c0_i32_0 : i32, i32, i32, i32
  }
  func.func @transform_5(%arg0: i32, %arg1: i32) -> (i32, i32, i32, i32) {
    %c0_i32 = arith.constant 0 : i32
    %c0_i32_0 = arith.constant 0 : i32
    %c0_i32_1 = arith.constant 0 : i32
    return %arg0, %arg1, %c0_i32, %c0_i32_0 : i32, i32, i32, i32
  }
}

module attributes {stable_mosaic.version = 11 : i64} {
  func.func @_bn_relu_kernel(%arg0: i32, %arg1: i32, %arg2: memref<1x8x16x128xbf16, #tpu.memory_space<vmem>>, %arg3: memref<1x128xf32, #tpu.memory_space<vmem>>, %arg4: memref<1x128xf32, #tpu.memory_space<vmem>>, %arg5: memref<1x8x16x8xf32, #tpu.memory_space<vmem>>) attributes {dimension_semantics = [#tpu.dimension_semantics<parallel>, #tpu.dimension_semantics<parallel>], iteration_bounds = array<i64: 2, 2>, scalar_prefetch = 0 : i64, scratch_operands = 0 : i64, tpu.core_type = #tpu.core_type<tc>, window_params = [{transform_indices = @transform_0, window_bounds = array<i64: 1, 8, 16, 128>}, {pipeline_mode = #tpu.pipeline_mode<synchronous>, transform_indices = @transform_1, window_bounds = array<i64: 1, 128>}, {pipeline_mode = #tpu.pipeline_mode<synchronous>, transform_indices = @transform_2, window_bounds = array<i64: 1, 128>}, {transform_indices = @transform_3, window_bounds = array<i64: 1, 8, 16, 8>}]} {
    %c0 = arith.constant 0 : index
    %c0_0 = arith.constant 0 : index
    %c0_1 = arith.constant 0 : index
    %c0_2 = arith.constant 0 : index
    %0 = vector.load %arg2[%c0, %c0_0, %c0_1, %c0_2] : memref<1x8x16x128xbf16, #tpu.memory_space<vmem>>, vector<1x8x16x128xbf16>
    %1 = vector.shape_cast %0 : vector<1x8x16x128xbf16> to vector<8x16x128xbf16>
    %2 = arith.extf %1 : vector<8x16x128xbf16> to vector<8x16x128xf32>
    %c0_3 = arith.constant 0 : index
    %c0_4 = arith.constant 0 : index
    %3 = vector.load %arg3[%c0_3, %c0_4] : memref<1x128xf32, #tpu.memory_space<vmem>>, vector<1x128xf32>
    %4 = vector.shape_cast %3 : vector<1x128xf32> to vector<1x1x128xf32>
    %5 = vector.broadcast %4 : vector<1x1x128xf32> to vector<8x16x128xf32>
    %6 = arith.mulf %2, %5 : vector<8x16x128xf32>
    %c0_5 = arith.constant 0 : index
    %c0_6 = arith.constant 0 : index
    %7 = vector.load %arg4[%c0_5, %c0_6] : memref<1x128xf32, #tpu.memory_space<vmem>>, vector<1x128xf32>
    %8 = vector.shape_cast %7 : vector<1x128xf32> to vector<1x1x128xf32>
    %9 = vector.broadcast %8 : vector<1x1x128xf32> to vector<8x16x128xf32>
    %10 = arith.addf %6, %9 : vector<8x16x128xf32>
    %cst = arith.constant 0.000000e+00 : f32
    %11 = vector.broadcast %cst : f32 to vector<8x16x128xf32>
    %12 = arith.maximumf %10, %11 : vector<8x16x128xf32>
    %13 = vector.extract_strided_slice %12 {offsets = [0, 0, 0], sizes = [8, 16, 8], strides = [1, 1, 1]} : vector<8x16x128xf32> to vector<8x16x8xf32>
    %14 = vector.shape_cast %13 : vector<8x16x8xf32> to vector<1x8x16x8xf32>
    %c0_7 = arith.constant 0 : index
    %c0_8 = arith.constant 0 : index
    %c0_9 = arith.constant 0 : index
    %c0_10 = arith.constant 0 : index
    %15 = vector.load %arg5[%c0_7, %c0_8, %c0_9, %c0_10] : memref<1x8x16x8xf32, #tpu.memory_space<vmem>>, vector<1x8x16x8xf32>
    tpu.vector_store %arg5[%c0_7, %c0_8, %c0_9, %c0_10], %14 {strides = array<i32>} : memref<1x8x16x8xf32, #tpu.memory_space<vmem>>, vector<1x8x16x8xf32>,
    return
  }
  func.func @transform_0(%arg0: i32, %arg1: i32) -> (i32, i32, i32, i32) {
    %c0_i32 = arith.constant 0 : i32
    %c0_i32_0 = arith.constant 0 : i32
    %c0_i32_1 = arith.constant 0 : i32
    return %arg0, %arg1, %c0_i32, %c0_i32_0 : i32, i32, i32, i32
  }
  func.func @transform_1(%arg0: i32, %arg1: i32) -> (i32, i32) {
    %c0_i32 = arith.constant 0 : i32
    %c0_i32_0 = arith.constant 0 : i32
    %c0_i32_1 = arith.constant 0 : i32
    return %c0_i32, %c0_i32_0 : i32, i32
  }
  func.func @transform_2(%arg0: i32, %arg1: i32) -> (i32, i32) {
    %c0_i32 = arith.constant 0 : i32
    %c0_i32_0 = arith.constant 0 : i32
    %c0_i32_1 = arith.constant 0 : i32
    return %c0_i32, %c0_i32_0 : i32, i32
  }
  func.func @transform_3(%arg0: i32, %arg1: i32) -> (i32, i32, i32, i32) {
    %c0_i32 = arith.constant 0 : i32
    %c0_i32_0 = arith.constant 0 : i32
    %c0_i32_1 = arith.constant 0 : i32
    return %arg0, %arg1, %c0_i32, %c0_i32_0 : i32, i32, i32, i32
  }
}

</mosaic_0001>

<bundles_post_ra>
// kernel: double_conv.5
= control target key start
LH: loop header
LB: loop body
LE: loop exit
PB: predicated region body
PF: predicated region fallthrough
CT: control target
= control target key end

     0   :  { %s581_s12 = smov 0   ;;  %s583_s13 = smov 0   ;;  %s722_s0 = inlined_call_operand.vmem [shape: bf16[2,16,16,128], index: 0, kind: input, shape index: {}]   ;;  %s723_s1 = inlined_call_operand.vmem [shape: f32[1,128], index: 1, kind: input, shape index: {}]   ;;  %s724_s2 = inlined_call_operand.vmem [shape: f32[1,128], index: 2, kind: input, shape index: {}]   ;;  %s725_s3 = inlined_call_operand.vmem [shape: f32[2,16,16,8], index: 3, kind: output, shape index: {}]  }
   0x1   :  { %s585_s14 = smov 0   ;;  %s587_s15 = smov 0  }
   0x2   :  { %s589_s16 = smov 0  }
   0x3 LB: > { %s22_s17 = sadd.s32 1, %s551_s14  ;;  %s25_s18 = sadd.s32 1, %s555_s15  ;;  %s559_s16 = sphi %s589_s16, %s13_s16   ;;  %s555_s15 = sphi %s587_s15, %s729_s15   ;;  %s551_s14 = sphi %s585_s14, %s728_s14   ;;  %s547_s13 = sphi %s583_s13, %s727_s13   ;;  %s543_s12 = sphi %s581_s12, %s726_s12  }
   0x4   : > { %p23_p0 = scmp.ge.s32.totalorder %s22_s17, 2  ;;  %p429_p1 = scmp.ge.s32.totalorder %s559_s16, 1 }
   0x5   : > { %p159_p2 = scmp.lt.s32.totalorder %s559_s16, 5 }
   0x6   : > { %s731_s17 = smov (%p23_p0, %s22_s17), 0  ;;  %s733_s18 = smov (!%p23_p0, %s25_s18), %s555_s15 }
   0x7   : > { %p160_p3 = pnand %p429_p1, %p159_p2  ;;  %p27_p4 = scmp.ge.s32.totalorder %s733_s18, 2 }
   0x8   : > { %s430_s19 = sshll.u32 (!%p160_p3), %s543_s12, 3  ;;  %p194_p5 = scmp.lt.s32.totalorder (!%p160_p3), %s547_s13, 1  ;;  %v622_v0 = vld [vmem:[%s723_s1] ss:$0 sm:$0xff] (!%p160_p3)  ;;  %vm309_vm0 = vcmask (!%p160_p3), 64512  }
   0x9   : > { %s735_s18 = smov (%p27_p4, %s733_s18), 0  ;;  %163 = sbr.rel (%p160_p3) target bundleno = 42 (0x2a), region = 32 }
   0xa   : > { %p196_p6 = scmp.lt.s32.totalorder (!%p160_p3), %s430_s19, 15  ;;  %v631_v9 = vld [vmem:[%s724_s2] ss:$0 sm:$0xff] (!%p160_p3) }
  0x10   : > { %s737_s13 = smov (!%p194_p5, %s547_s13), 1  ;;  %s739_s19 = smov (!%p196_p6, %s430_s19), 15 }
  0x11   : > { %s432_s20 = sshll.u32 %s737_s13, 5  ;;  %s431_s21 = sshll.u32 %s739_s19, 1 }
  0x12   : > { %s611_s22 = sadd.s32 %s432_s20, %s431_s21 }
  0x13   : > { %s433_s23 = sshll.u32 %s611_s22, 2  ;;  %s437_s4 = sshll.u32 %s611_s22, 3 }
  0x14   : > { %s617_s26 = scalar_lea.vmem %s722_s0, %s433_s23  ;;  %s649_s7 = scalar_lea.vmem %s725_s3, %s437_s4 }
  0x15   : > { %v443_v1 = vld [vmem:[%s617_s26] sm:$0xff]   ;;  %v474_v2 = vld [vmem:[%s617_s26 + $0x8] sm:$0xff]   ;;  %v475_v3 = vld [vmem:[%s617_s26 + $0x10] sm:$0xff]  }
  0x16   : > { %v444_v4 = vunpack.c.l.bf16 %v443_v1  ;;  %v445_v5 = vunpack.c.h.bf16 %v443_v1  ;;  %v448_v6 = vunpack.c.l.bf16 %v474_v2  ;;  %v449_v7 = vunpack.c.h.bf16 %v474_v2  ;;  %v476_v8 = vld [vmem:[%s617_s26 + $0x18] sm:$0xff]   ;;  %v477_v30 = vld [vmem:[%s617_s26 + $0x20] sm:$0xff]   ;;  %v478_v31 = vld [vmem:[%s617_s26 + $0x28] sm:$0xff]  }
  0x17   : > { %v452_v10 = vunpack.c.l.bf16 %v475_v3  ;;  %v453_v11 = vunpack.c.h.bf16 %v475_v3  ;;  %v456_v12 = vunpack.c.l.bf16 %v476_v8  ;;  %v457_v13 = vunpack.c.h.bf16 %v476_v8  ;;  %v479_v36 = vld [vmem:[%s617_s26 + $0x30] sm:$0xff]   ;;  %v480_v37 = vld [vmem:[%s617_s26 + $0x38] sm:$0xff]  }
  0x18   : > { %v254_v14 = vmul.f32 %v444_v4, %v622_v0  ;;  %v255_v15 = vmul.f32 %v445_v5, %v622_v0  ;;  %v256_v16 = vmul.f32 %v448_v6, %v622_v0  ;;  %v257_v17 = vmul.f32 %v449_v7, %v622_v0 }
  0x19   : > { %v258_v18 = vmul.f32 %v452_v10, %v622_v0  ;;  %v259_v19 = vmul.f32 %v453_v11, %v622_v0  ;;  %v260_v20 = vmul.f32 %v456_v12, %v622_v0  ;;  %v261_v21 = vmul.f32 %v457_v13, %v622_v0 }
  0x1a   : > { %v277_v22 = vadd.f32 %v631_v9, %v254_v14  ;;  %v278_v23 = vadd.f32 %v631_v9, %v255_v15  ;;  %v279_v24 = vadd.f32 %v631_v9, %v256_v16  ;;  %v280_v25 = vadd.f32 %v631_v9, %v257_v17 }
  0x1b   : > { %v281_v26 = vadd.f32 %v631_v9, %v258_v18  ;;  %v282_v27 = vadd.f32 %v631_v9, %v259_v19  ;;  %v283_v28 = vadd.f32 %v631_v9, %v260_v20  ;;  %v284_v29 = vadd.f32 %v631_v9, %v261_v21 }
  0x1c   : > { %v293_v32 = vmax.f32 %v277_v22, 0.0  ;;  %v294_v33 = vmax.f32 %v278_v23, 0.0  ;;  %v295_v34 = vmax.f32 %v279_v24, 0.0  ;;  %v296_v35 = vmax.f32 %v280_v25, 0.0 }
  0x1d   : > { %v297_v38 = vmax.f32 %v281_v26, 0.0  ;;  %v298_v39 = vmax.f32 %v282_v27, 0.0  ;;  %v299_v40 = vmax.f32 %v283_v28, 0.0  ;;  %v300_v41 = vmax.f32 %v284_v29, 0.0 }
  0x1e   : > { %310 = vst.msk [vmem:[%s649_s7] sm:$0xff] %vm309_vm0, %v293_v32  ;;  %311 = vst.msk [vmem:[%s649_s7 + $0x8] sm:$0xff] %vm309_vm0, %v294_v33  ;;  %v460_v42 = vunpack.c.l.bf16 %v477_v30  ;;  %v461_v43 = vunpack.c.h.bf16 %v477_v30  ;;  %v464_v44 = vunpack.c.l.bf16 %v478_v31  ;;  %v465_v45 = vunpack.c.h.bf16 %v478_v31 }
  0x1f   : > { %312 = vst.msk [vmem:[%s649_s7 + $0x10] sm:$0xff] %vm309_vm0, %v295_v34  ;;  %313 = vst.msk [vmem:[%s649_s7 + $0x18] sm:$0xff] %vm309_vm0, %v296_v35  ;;  %v468_v46 = vunpack.c.l.bf16 %v479_v36  ;;  %v469_v47 = vunpack.c.h.bf16 %v479_v36  ;;  %v472_v48 = vunpack.c.l.bf16 %v480_v37  ;;  %v473_v49 = vunpack.c.h.bf16 %v480_v37 }
  0x20   : > { %314 = vst.msk [vmem:[%s649_s7 + $0x20] sm:$0xff] %vm309_vm0, %v297_v38  ;;  %315 = vst.msk [vmem:[%s649_s7 + $0x28] sm:$0xff] %vm309_vm0, %v298_v39  ;;  %v262_v50 = vmul.f32 %v460_v42, %v622_v0  ;;  %v263_v51 = vmul.f32 %v461_v43, %v622_v0  ;;  %v264_v52 = vmul.f32 %v464_v44, %v622_v0 }
  0x21   : > { %316 = vst.msk [vmem:[%s649_s7 + $0x30] sm:$0xff] %vm309_vm0, %v299_v40  ;;  %317 = vst.msk [vmem:[%s649_s7 + $0x38] sm:$0xff] %vm309_vm0, %v300_v41  ;;  %v265_v53 = vmul.f32 %v465_v45, %v622_v0  ;;  %v266_v54 = vmul.f32 %v468_v46, %v622_v0  ;;  %v267_v55 = vmul.f32 %v469_v47, %v622_v0 }
  0x22   : > { %v268_v56 = vmul.f32 %v472_v48, %v622_v0  ;;  %v269_v57 = vmul.f32 %v473_v49, %v622_v0  ;;  %v285_v58 = vadd.f32 %v631_v9, %v262_v50  ;;  %v286_v59 = vadd.f32 %v631_v9, %v263_v51 }
  0x23   : > { %v287_v60 = vadd.f32 %v631_v9, %v264_v52  ;;  %v288_v61 = vadd.f32 %v631_v9, %v265_v53  ;;  %v289_v62 = vadd.f32 %v631_v9, %v266_v54  ;;  %v290_v63 = vadd.f32 %v631_v9, %v267_v55 }
  0x24   : > { %v291_v0 = vadd.f32 %v631_v9, %v268_v56  ;;  %v292_v1 = vadd.f32 %v631_v9, %v269_v57  ;;  %v301_v2 = vmax.f32 %v285_v58, 0.0  ;;  %v302_v3 = vmax.f32 %v286_v59, 0.0 }
  0x25   : > { %v303_v4 = vmax.f32 %v287_v60, 0.0  ;;  %v304_v5 = vmax.f32 %v288_v61, 0.0  ;;  %v305_v6 = vmax.f32 %v289_v62, 0.0  ;;  %v306_v7 = vmax.f32 %v290_v63, 0.0 }
  0x26   : > { %v307_v8 = vmax.f32 %v291_v0, 0.0  ;;  %v308_v10 = vmax.f32 %v292_v1, 0.0  ;;  %318 = vst.msk [vmem:[%s649_s7 + $0x40] sm:$0xff] %vm309_vm0, %v301_v2  ;;  %319 = vst.msk [vmem:[%s649_s7 + $0x48] sm:$0xff] %vm309_vm0, %v302_v3 }
  0x27   : > { %320 = vst.msk [vmem:[%s649_s7 + $0x50] sm:$0xff] %vm309_vm0, %v303_v4  ;;  %321 = vst.msk [vmem:[%s649_s7 + $0x58] sm:$0xff] %vm309_vm0, %v304_v5 }
  0x28   : > { %322 = vst.msk [vmem:[%s649_s7 + $0x60] sm:$0xff] %vm309_vm0, %v305_v6  ;;  %323 = vst.msk [vmem:[%s649_s7 + $0x68] sm:$0xff] %vm309_vm0, %v306_v7 }
  0x29   : > { %324 = vst.msk [vmem:[%s649_s7 + $0x70] sm:$0xff] %vm309_vm0, %v307_v8  ;;  %325 = vst.msk [vmem:[%s649_s7 + $0x78] sm:$0xff] %vm309_vm0, %v308_v10 }
  0x2a PF: > { %s13_s16 = sadd.s32 1, %s559_s16   ;;  %s726_s12 = smov %s551_s14 }
  0x2b   : > { %p10_p7 = scmp.ge.s32.totalorder %s13_s16, 6   ;;  %s727_s13 = smov %s555_s15 }
  0x2c   : > { %s728_s14 = smov %s731_s17  ;;  %s729_s15 = smov %s735_s18 }
  0x2d   :  { %12 = sbr.rel (!%p10_p7) target bundleno = 3 (0x3), region = 62 }

// kernel: double_conv.3
= control target key start
LH: loop header
LB: loop body
LE: loop exit
PB: predicated region body
PF: predicated region fallthrough
CT: control target
= control target key end

     0   :  { %s3001_s18 = smov 0   ;;  %s3003_s19 = smov 0   ;;  %s3719_s0 = inlined_call_operand.vmem [shape: bf16[2,16,16,128], index: 0, kind: input, shape index: {}, may-alias: {0,1,2}]   ;;  %s3720_s1 = inlined_call_operand.vmem [shape: bf16[2,16,16,128], index: 1, kind: input, shape index: {}, may-alias: {0,1,2}]   ;;  %s3721_s2 = inlined_call_operand.vmem [shape: bf16[2,16,16,128], index: 2, kind: input, shape index: {}, may-alias: {0,1,2}]   ;;  %s3722_s3 = inlined_call_operand.vmem [shape: bf16[1152,128], index: 3, kind: input, shape index: {}]   ;;  %s3723_s4 = inlined_call_operand.vmem [shape: bf16[2,16,16,128], index: 4, kind: output, shape index: {0}]   ;;  %s3724_s5 = inlined_call_operand.vmem [shape: f32[2,2,2,128], index: 5, kind: output, shape index: {1}]  }
   0x1   :  { %s3005_s20 = smov 0   ;;  %s3007_s21 = smov 0  }
   0x2   :  { %s3009_s22 = smov 0  }
   0x3 LB: > { %s25_s23 = sadd.s32 1, %s2960_s20  ;;  %s28_s24 = sadd.s32 1, %s2964_s21  ;;  %s2968_s22 = sphi %s3009_s22, %s16_s22   ;;  %s2964_s21 = sphi %s3007_s21, %s3730_s21   ;;  %s2960_s20 = sphi %s3005_s20, %s3729_s20   ;;  %s2956_s19 = sphi %s3003_s19, %s3728_s19   ;;  %s2952_s18 = sphi %s3001_s18, %s3727_s18  }
   0x4   : > { %p26_p0 = scmp.ge.s32.totalorder %s25_s23, 2  ;;  %p2296_p1 = scmp.ge.s32.totalorder %s2968_s22, 1 }
   0x5   : > { %p278_p2 = scmp.lt.s32.totalorder %s2968_s22, 5 }
   0x6   : > { %s3732_s23 = smov (%p26_p0, %s25_s23), 0  ;;  %s3734_s24 = smov (!%p26_p0, %s28_s24), %s2964_s21 }
   0x7   : > { %p279_p3 = pnand %p2296_p1, %p278_p2  ;;  %p30_p4 = scmp.ge.s32.totalorder %s3734_s24, 2 }
   0x8   : > { %v2858_v0 = vld [vmem:[%s3722_s3 + $0x40] sm:$0xff] (!%p279_p3)   ;;  %s3039_s27 = sshll.u32 (!%p279_p3), %s2952_s18, 3  ;;  %v2862_v4 = vld [vmem:[%s3722_s3 + $0x48] sm:$0xff] (!%p279_p3)   ;;  %p354_p6 = scmp.lt.s32.totalorder (!%p279_p3), %s2956_s19, 1  ;;  %v2866_v8 = vld [vmem:[%s3722_s3 + $0x50] sm:$0xff] (!%p279_p3)   ;;  %v435_v15 = vlaneseq (!%p279_p3)  ;;  %vm681_vm3 = vcmask (!%p279_p3), 1040384  }
   0x9   : > { %s3736_s24 = smov (%p30_p4, %s3734_s24), 0  ;;  %282 = sbr.rel (%p279_p3) target bundleno = 438 (0x1b6), region = 36 }
   0xa   : > { %v2859_v1 = vld [vmem:[%s3722_s3 + $0xc0] sm:$0xff] (!%p279_p3)   ;;  %s3045_s30 = sadd.s32 (!%p279_p3), 4294967295, %s3039_s27  ;;  %2497 = vmatprep.subr.bf16.mxu0 (!%p279_p3), %v2858_v0  ;;  %v2863_v5 = vld [vmem:[%s3722_s3 + $0xc8] sm:$0xff] (!%p279_p3)   ;;  %v2867_v9 = vld [vmem:[%s3722_s3 + $0xd0] sm:$0xff] (!%p279_p3)   ;;  %p370_p8 = scmp.lt.s32.totalorder (!%p279_p3), %s3039_s27, 15  ;;  %v3112_v20 = vshrl.u32 (!%p279_p3), %v435_v15, 7 }
   0xb   : > { %v2860_v2 = vld [vmem:[%s3722_s3] sm:$0xff] (!%p279_p3)   ;;  %2561 = vmatprep.subr.bf16.mxu1 (!%p279_p3), %v2859_v1  ;;  %p352_p5 = scmp.gt.s32.totalorder (!%p279_p3), %s3045_s30, 0  ;;  %v2864_v6 = vld [vmem:[%s3722_s3 + $0x8] sm:$0xff] (!%p279_p3)   ;;  %p2299_p7 = scmp.lt.s32.totalorder (!%p279_p3), %s3045_s30, 15  ;;  %v2868_v10 = vld [vmem:[%s3722_s3 + $0x10] sm:$0xff] (!%p279_p3)   ;;  %v440_v22 = vstv (!%p279_p3), %s3045_s30  ;;  %v2970_v42 = vmov (!%p279_p3), 0  }
   0xc   : > { %v2861_v3 = vld [vmem:[%s3722_s3 + $0x80] sm:$0xff] (!%p279_p3)   ;;  %2498 = vmatpush3.bf16.msra.mxu0 (!%p279_p3), %v2860_v2  ;;  %v2865_v7 = vld [vmem:[%s3722_s3 + $0x88] sm:$0xff] (!%p279_p3)   ;;  %v2869_v11 = vld [vmem:[%s3722_s3 + $0x90] sm:$0xff] (!%p279_p3)   ;;  %v441_v26 = vadd.s32 (!%p279_p3), %v440_v22, %v3112_v20  ;;  %v453_v33 = vsub.s32 (!%p279_p3), 0, %v3112_v20  ;;  %v457_v35 = vsub.s32 (!%p279_p3), 1, %v3112_v20  ;;  %v461_v37 = vsub.s32 (!%p279_p3), 2, %v3112_v20 }
   0xd   : > { %2562 = vmatpush3.bf16.msra.mxu1 (!%p279_p3), %v2861_v3  ;;  %2499 = vmatprep.subr.bf16.mxu0 (!%p279_p3), %v2862_v4  ;;  %v2870_v12 = vld [vmem:[%s3722_s3 + $0x58] sm:$0xff] (!%p279_p3)   ;;  %v2874_v17 = vld [vmem:[%s3722_s3 + $0x60] sm:$0xff] (!%p279_p3)   ;;  %v2878_v23 = vld [vmem:[%s3722_s3 + $0x68] sm:$0xff] (!%p279_p3)   ;;  %v465_v39 = vsub.s32 (!%p279_p3), 3, %v3112_v20  ;;  %vm682_vm4 = vsmask.f32 (!%p279_p3), 256 }
   0xe   : > { %2563 = vmatprep.subr.bf16.mxu1 (!%p279_p3), %v2863_v5  ;;  %v2871_v13 = vld [vmem:[%s3722_s3 + $0xd8] sm:$0xff] (!%p279_p3)   ;;  %v2875_v18 = vld [vmem:[%s3722_s3 + $0xe0] sm:$0xff] (!%p279_p3)   ;;  %v2879_v24 = vld [vmem:[%s3722_s3 + $0xe8] sm:$0xff] (!%p279_p3)   ;;  %vm443_vm0 = vcmp.ge.s32.totalorder (!%p279_p3), %v441_v26, 0  ;;  %vm445_vm1 = vcmp.lt.s32.totalorder (!%p279_p3), %v441_v26, 16  ;;  %vm825_vm7 = vcmask (!%p279_p3), 1046528  }
   0xf   : > { %v2872_v14 = vld [vmem:[%s3722_s3 + $0x18] sm:$0xff] (!%p279_p3)   ;;  %v2876_v19 = vld [vmem:[%s3722_s3 + $0x20] sm:$0xff] (!%p279_p3)   ;;  %v2880_v25 = vld [vmem:[%s3722_s3 + $0x28] sm:$0xff] (!%p279_p3)   ;;  %v469_v59 = vsub.s32 (!%p279_p3), 4, %v3112_v20  ;;  %v473_v62 = vsub.s32 (!%p279_p3), 5, %v3112_v20  ;;  %s2433_s14 = sadd.s32 (!%p279_p3), 8, %s3039_s27 }
  0x10   : > { %s353_s25 = scalar_select %p352_p5, %s3045_s30, 0  ;;  %2500 = vmatpush3.bf16.msra.mxu0 %v2864_v6  ;;  %v2873_v16 = vld [vmem:[%s3722_s3 + $0x98] sm:$0xff]   ;;  %v2877_v21 = vld [vmem:[%s3722_s3 + $0xa0] sm:$0xff]   ;;  %v2881_v27 = vld [vmem:[%s3722_s3 + $0xa8] sm:$0xff]   ;;  %vm704_vm10 = vsmask.f32 7424 }
  0x11   : > { %2564 = vmatpush3.bf16.msra.mxu1 %v2865_v7  ;;  %2501 = vmatprep.subr.bf16.mxu0 %v2866_v8  ;;  %s3738_s19 = smov (!%p354_p6, %s2956_s19), 1  ;;  %v2882_v28 = vld [vmem:[%s3722_s3 + $0x70] sm:$0xff]   ;;  %v2886_v32 = vld [vmem:[%s3722_s3 + $0x78] sm:$0xff]   ;;  %vm447_vm2 = vmand %vm443_vm0, %vm445_vm1  ;;  %v477_v7 = vsub.s32 6, %v3112_v20  ;;  %p380_p9 = scmp.lt.s32.totalorder %s2433_s14, 15 }
  0x12   : > { %2565 = vmatprep.subr.bf16.mxu1 %v2867_v9  ;;  %s3740_s25 = smov (!%p2299_p7, %s353_s25), 15  ;;  %s3101_s29 = sshll.u32 %s3738_s19, 5  ;;  %v2883_v29 = vld [vmem:[%s3722_s3 + $0xf0] sm:$0xff]   ;;  %v2887_v34 = vld [vmem:[%s3722_s3 + $0xf8] sm:$0xff]   ;;  %v3179_v43 = vsel %vm447_vm2, 1, %v2970_v42  ;;  %v2890_v45 = vld [vmem:[%s3722_s3 + $0x140] sm:$0xff]  }
  0x13   : > { %s371_s17 = scalar_select %p370_p8, %s3039_s27, 15  ;;  %v2884_v30 = vld [vmem:[%s3722_s3 + $0x30] sm:$0xff]   ;;  %v2888_v36 = vld [vmem:[%s3722_s3 + $0x38] sm:$0xff]   ;;  %v454_v46 = vrot.slane %v3179_v43, %v453_v33  ;;  %v458_v48 = vrot.slane %v3179_v43, %v457_v35  ;;  %v462_v49 = vrot.slane %v3179_v43, %v461_v37  ;;  %v466_v50 = vrot.slane %v3179_v43, %v465_v39  ;;  %vm3206_vm11 = vmand %vm681_vm3, %vm682_vm4 }
  0x14   : > { %2502 = vmatpush3.bf16.msra.mxu0 %v2868_v10  ;;  %s2304_s8 = sshll.u32 %s3740_s25, 1  ;;  %v2885_v31 = vld [vmem:[%s3722_s3 + $0xb0] sm:$0xff]   ;;  %v2889_v38 = vld [vmem:[%s3722_s3 + $0xb8] sm:$0xff]   ;;  %s3742_s14 = smov (!%p380_p9, %s2433_s14), 15 }
  0x15   : > { %2566 = vmatpush3.bf16.msra.mxu1 %v2869_v11  ;;  %2503 = vmatprep.subr.bf16.mxu0 %v2870_v12  ;;  %s2308_s11 = sshll.u32 %s371_s17, 1  ;;  %s360_s26 = sadd.s32 %s3101_s29, %s2304_s8  ;;  %vm491_vm5 = vcmp.ne.s32.totalorder %v454_v46, 0  ;;  %vm492_vm6 = vcmp.ne.s32.totalorder %v458_v48, 0  ;;  %vm493_vm8 = vcmp.ne.s32.totalorder %v462_v49, 0  ;;  %vm494_vm9 = vcmp.ne.s32.totalorder %v466_v50, 0  ;;  %v2895_v11 = vld [vmem:[%s3722_s3 + $0x1c0] sm:$0xff]  }
  0x16   : > { %2567 = vmatprep.subr.bf16.mxu1 %v2871_v13  ;;  %s3126_s6 = sadd.s32 %s2308_s11, %s3101_s29  ;;  %s2306_s8 = sshll.u32 %s360_s26, 2  ;;  %v2891_v48 = vld [vmem:[%s3722_s3 + $0x100] sm:$0xff]  }
  0x17   : > { %s2310_s11 = sshll.u32 %s3126_s6, 2  ;;  %s362_s15 = scalar_lea.vmem %s3719_s0, %s2306_s8 }
  0x18   : > { %2504 = vmatpush3.bf16.msra.mxu0 %v2872_v14  ;;  %s3169_s28 = scalar_lea.vmem %s3720_s1, %s2310_s11  ;;  %v415_v40 = vld [vmem:[%s362_s15] sm:$0xf]  ;;  %v416_v41 = vld [vmem:[%s362_s15 + $0x4] sm:$0xf]  ;;  %s3744_s14 = smov (!%p380_p9, %s3742_s14), 15 }
  0x19   : > { %2568 = vmatpush3.bf16.msra.mxu1 %v2873_v16  ;;  %2505 = vmatprep.subr.bf16.mxu0 %v2874_v17  ;;  %v417_v44 = vld [vmem:[%s3169_s28] sm:$0xf]  ;;  %v418_v47 = vld [vmem:[%s3169_s28 + $0x4] sm:$0xf]  ;;  %v419_v51 = vld [vmem:[%s3169_s28 + $0x8] sm:$0xf] }
  0x1a   : > { %2569 = vmatprep.subr.bf16.mxu1 %v2875_v18  ;;  %v420_v52 = vld [vmem:[%s3169_s28 + $0xc] sm:$0xf]  ;;  %v521_v53 = vsel %vm491_vm5, %v415_v40, 0  ;;  %v522_v54 = vsel %vm491_vm5, %v416_v41, 0  ;;  %v523_v55 = vsel %vm492_vm6, %v417_v44, 0  ;;  %v524_v56 = vsel %vm492_vm6, %v418_v47, 0 }
  0x1b   : > { %v2326_v57 = vcombine.low %v521_v53, %v522_v54  ;;  %v2327_v58 = vcombine.low %v523_v55, %v524_v56  ;;  %v525_v60 = vsel %vm493_vm8, %v419_v51, 0  ;;  %v526_v61 = vsel %vm493_vm8, %v420_v52, 0  ;;  %v421_v3 = vld [vmem:[%s3169_s28 + $0x10] sm:$0xf]  ;;  %v422_v5 = vld [vmem:[%s3169_s28 + $0x14] sm:$0xf] }
  0x1c   : > { %2506 = vmatpush3.bf16.msra.mxu0 %v2876_v19  ;;  %v2328_v4 = vcombine.low %v525_v60, %v526_v61  ;;  %v527_v6 = vsel %vm494_vm9, %v421_v3, 0  ;;  %v528_v10 = vsel %vm494_vm9, %v422_v5, 0  ;;  %v2899_v47 = vld [vmem:[%s3722_s3 + $0x1c8] sm:$0xff]   ;;  %v423_v53 = vld [vmem:[%s3169_s28 + $0x18] sm:$0xf]  ;;  %v481_v60 = vsub.s32 7, %v3112_v20 }
  0x1d   : > { %2570 = vmatpush3.bf16.msra.mxu1 %v2877_v21  ;;  %2507 = vmatprep.subr.bf16.mxu0 %v2878_v23  ;;  %v592_v63 = vshrl.u32 %v2326_v57, 16  ;;  %v595_v0 = vshll.u32 %v2326_v57, 16  ;;  %v599_v1 = vshrl.u32 %v2327_v58, 16  ;;  %v602_v2 = vshll.u32 %v2327_v58, 16  ;;  %v2893_v5 = vld [vmem:[%s3722_s3 + $0x108] sm:$0xff]   ;;  %s2315_s27 = sshll.u32 %s3744_s14, 1 }
  0x1e   : > { %2571 = vmatprep.subr.bf16.mxu1 %v2879_v24  ;;  %v606_v13 = vshrl.u32 %v2328_v4, 16  ;;  %v609_v14 = vshll.u32 %v2328_v4, 16  ;;  %v2329_v15 = vcombine.low %v527_v6, %v528_v10  ;;  %v474_v3 = vrot.slane %v3179_v43, %v473_v62  ;;  %v2894_v10 = vld [vmem:[%s3722_s3 + $0x150] sm:$0xff]   ;;  %s388_s16 = sadd.s32 %s2315_s27, %s3101_s29  ;;  %p408_p10 = scmp.lt.s32.totalorder %s2952_s18, 1 }
  0x1f   : > { %v594_v8 = vrot.slane %v592_v63, 7  ;;  %v601_v9 = vrot.slane %v599_v1, 7  ;;  %v2892_v63 = vld [vmem:[%s3722_s3 + $0x148] sm:$0xff]   ;;  %s2317_s30 = sshll.u32 %s388_s16, 2  ;;  %s2322_s6 = sshll.u32 %s3738_s19, 1 }
  0x20   : > { %2508 = vmatpush3.bf16.msra.mxu0 %v2880_v25  ;;  %v608_v25 = vrot.slane %v606_v13, 7  ;;  %v616_v58 = vshll.u32 %v2329_v15, 16  ;;  %vm496_vm13 = vcmp.ne.s32.totalorder %v474_v3, 0  ;;  %v2904_v3 = vld [vmem:[%s3722_s3 + $0x120] sm:$0xff]   ;;  %s3746_s18 = smov (!%p408_p10, %s2952_s18), 1 }
  0x21   : > { %2572 = vmatpush3.bf16.msra.mxu1 %v2881_v27  ;;  %2509 = vmatprep.subr.bf16.mxu0 %v2882_v28  ;;  %v597_v16 = vor.u32 %v595_v0, %v594_v8  ;;  %v694_v17 = vsel %vm3206_vm11, %v594_v8, 0  ;;  %v604_v18 = vor.u32 %v602_v2, %v601_v9  ;;  %v695_v19 = vsel %vm3206_vm11, %v601_v9, 0  ;;  %v2901_v2 = vld [vmem:[%s3722_s3 + $0x188] sm:$0xff]  }
  0x22   : > { %2573 = vmatprep.subr.bf16.mxu1 %v2883_v29  ;;  %v713_v21 = vshll.u32 %v694_v17, 16  ;;  %v827_v23 = vrot.slane %v694_v17, 1  ;;  %v725_v24 = vshll.u32 %v695_v19, 16  ;;  %v613_v28 = vshrl.u32 %v2329_v15, 16  ;;  %v2897_v29 = vld [vmem:[%s3722_s3 + $0x180] sm:$0xff]  }
  0x23   : > { %v684_v26 = vsel %vm3206_vm11, 0, %v597_v16  ;;  %v3218_v27 = vsel %vm3206_vm11, 0, %v604_v18  ;;  %v611_v40 = vor.u32 %v609_v14, %v608_v25  ;;  %v3230_v46 = vsel %vm3206_vm11, %v608_v25, 0  ;;  %v425_v17 = vld [vmem:[%s3169_s28 + $0x20] sm:$0xf] }
  0x24   : > { %2510 = vmatpush3.bf16.msra.mxu0 %v2884_v30  ;;  %v470_v30 = vrot.slane %v3179_v43, %v469_v59  ;;  %1601 = vmatprep.mubr.bf16.mxu1 %v3218_v27  ;;  %v715_v37 = vrot.slane %v713_v21, 1  ;;  %v720_v39 = vshll.u32 %v3218_v27, 16  ;;  %v829_v51 = vrot.slane %v3218_v27, 1  ;;  %v424_v59 = vld [vmem:[%s3169_s28 + $0x1c] sm:$0xf] }
  0x25   : > { %2574 = vmatpush3.bf16.msra.mxu1 %v2885_v31  ;;  %2511 = vmatprep.subr.bf16.mxu0 %v2886_v32  ;;  %v706_v31 = vshrl.u32 %v684_v26, 16  ;;  %v708_v32 = vshll.u32 %v684_v26, 16  ;;  %v3240_v50 = vsel %vm3206_vm11, 0, %v611_v40  ;;  %v615_v52 = vrot.slane %v613_v28, 7  ;;  %v426_v18 = vld [vmem:[%s3169_s28 + $0x24] sm:$0xf] }
  0x26   : > { %2575 = vmatprep.subr.bf16.mxu1 %v2887_v34  ;;  %v826_v34 = vrot.slane %v684_v26, 1  ;;  %v722_v49 = vrot.slane %v720_v39, 1  ;;  %v732_v55 = vshll.u32 %v3240_v50, 16  ;;  %v737_v56 = vshll.u32 %v3230_v46, 16  ;;  %v2896_v28 = vld [vmem:[%s3722_s3 + $0x110] sm:$0xff]  }
  0x27   : > { %v710_v41 = vrot.slane %v708_v32, 1  ;;  %v730_v0 = vshrl.u32 %v3240_v50, 16  ;;  %v618_v6 = vor.u32 %v616_v58, %v615_v52  ;;  %v3268_v8 = vsel %vm3206_vm11, %v615_v52, 0  ;;  %v2898_v32 = vld [vmem:[%s3722_s3 + $0x158] sm:$0xff]  }
  0x28   : > { %2512 = vmatpush3.bf16.msra.mxu0 %v2888_v36  ;;  %v830_v36 = vrot.slane %v695_v19, 1  ;;  %v828_v44 = vsel %vm825_vm7, %v826_v34, %v827_v23  ;;  %v734_v1 = vrot.slane %v732_v55, 1  ;;  %vm495_vm12 = vcmp.ne.s32.totalorder %v470_v30, 0  ;;  %v2907_v52 = vld [vmem:[%s3722_s3 + $0x1d8] sm:$0xff]  }
  0x29   : > { %2576 = vmatpush3.bf16.msra.mxu1 %v2889_v38  ;;  %2625 = vmatprep.subr.bf16.mxu0 %v2890_v45  ;;  %v718_v38 = vshrl.u32 %v3218_v27, 16  ;;  %v727_v45 = vrot.slane %v725_v24, 1  ;;  %v711_v54 = vor.u32 %v710_v41, %v706_v31  ;;  %v739_v62 = vrot.slane %v737_v56, 1 }
  0x2a   : > { %2689 = vmatprep.subr.bf16.mxu1 %v2895_v11  ;;  %v3271_v9 = vsel %vm825_vm7, %v829_v51, %v830_v36  ;;  %v529_v11 = vsel %vm495_vm12, %v423_v53, 0  ;;  %v530_v13 = vsel %vm495_vm12, %v424_v59, 0  ;;  %v3279_v14 = vsel %vm3206_vm11, 0, %v618_v6 }
  0x2b   : > { %v723_v57 = vor.u32 %v722_v49, %v718_v38  ;;  %v716_v61 = vsel %vm704_vm10, %v711_v54, %v715_v37  ;;  %v832_v15 = vrot.slane %v3240_v50, 1  ;;  %v2330_v16 = vcombine.low %v529_v11, %v530_v13  ;;  %v2905_v37 = vld [vmem:[%s3722_s3 + $0x190] sm:$0xff]   ;;  %v428_v49 = vld [vmem:[%s3169_s28 + $0x2c] sm:$0xf] }
  0x2c   : > { %1602 = vmatmul.mubr.bf16.vlgmr.msra.gmra.mrb[0].mxu1 %v828_v44  ;;  %1504 = vmatprep.mubr.bf16.mxu0 %v716_v61  ;;  %v478_v19 = vrot.slane %v3179_v43, %v477_v7  ;;  %v735_v21 = vor.u32 %v734_v1, %v730_v0  ;;  %v833_v23 = vrot.slane %v3230_v46, 1  ;;  %v744_v24 = vshll.u32 %v3279_v14, 16  ;;  %v427_v46 = vld [vmem:[%s3169_s28 + $0x28] sm:$0xf]  ;;  %v2909_v0 = vld [vmem:[%s3722_s3 + $0x198] sm:$0xff]  }
  0x2d   : > { %1609 = vmatprep.mubr.bf16.mxu1 %v3240_v50  ;;  %2690 = vmatpush3.bf16.msra.mxu1 %v2897_v29  ;;  %v3261_v4 = vsel %vm704_vm10, %v723_v57, %v727_v45  ;;  %v749_v25 = vshll.u32 %v3268_v8, 16  ;;  %v742_v7 = vshrl.u32 %v3279_v14, 16  ;;  %v620_v29 = vshrl.u32 %v2330_v16, 16 }
  0x2e   : > { %2691 = vmatprep.subr.bf16.mxu1 %v2899_v47  ;;  %1505 = vmatmul.mubr.bf16.vlgmr.msra.gmra.mrb[0].mxu0 %v684_v26  ;;  %v2903_v26 = vld [vmem:[%s3722_s3 + $0x1d0] sm:$0xff]   ;;  %v623_v30 = vshll.u32 %v2330_v16, 16  ;;  %v746_v31 = vrot.slane %v744_v24, 1  ;;  %v531_v34 = vsel %vm496_vm13, %v425_v17, 0  ;;  %v532_v36 = vsel %vm496_vm13, %v426_v18, 0  ;;  %v2911_v16 = vld [vmem:[%s3722_s3 + $0x1e0] sm:$0xff]  }
  0x2f   : > { %2626 = vmatpush3.bf16.msra.mxu0 %v2891_v48  ;;  %1512 = vmatprep.mubr.bf16.mxu0 %v3261_v4  ;;  %v622_v38 = vrot.slane %v620_v29, 7  ;;  %v2331_v39 = vcombine.low %v531_v34, %v532_v36  ;;  %vm497_vm14 = vcmp.ne.s32.totalorder %v478_v19, 0  ;;  %v3306_v40 = vsel %vm704_vm10, %v735_v21, %v739_v62  ;;  %v2900_v48 = vld [vmem:[%s3722_s3 + $0x118] sm:$0xff]   ;;  %v429_v19 = vld [vmem:[%s3169_s28 + $0x30] sm:$0xf] }
  0x30   : > { %2627 = vmatprep.subr.bf16.mxu0 %v2892_v63  ;;  %v3311_v47 = vsel %vm825_vm7, %v832_v15, %v833_v23  ;;  %v533_v51 = vsel %vm497_vm14, %v427_v46, 0  ;;  %v482_v53 = vrot.slane %v3179_v43, %v481_v60  ;;  %v534_v56 = vsel %vm497_vm14, %v428_v49, 0  ;;  %v2902_v43 = vld [vmem:[%s3722_s3 + $0x160] sm:$0xff]   ;;  %v430_v24 = vld [vmem:[%s3169_s28 + $0x34] sm:$0xf] }
  0x31   : > { %2692 = vmatpush3.bf16.msra.mxu1 %v2901_v2  ;;  %v625_v41 = vor.u32 %v623_v30, %v622_v38  ;;  %v627_v44 = vshrl.u32 %v2331_v39, 16  ;;  %v630_v45 = vshll.u32 %v2331_v39, 16  ;;  %v3331_v54 = vsel %vm3206_vm11, %v622_v38, 0  ;;  %v2912_v46 = vld [vmem:[%s3722_s3 + $0x130] sm:$0xff]  }
  0x32   : > { %2693 = vmatprep.subr.bf16.mxu1 %v2903_v26  ;;  %v747_v57 = vor.u32 %v746_v31, %v742_v7  ;;  %v751_v58 = vrot.slane %v749_v25, 1  ;;  %v836_v60 = vrot.slane %v3268_v8, 1  ;;  %v2332_v63 = vcombine.low %v533_v51, %v534_v56 }
  0x33   : > { %2628 = vmatpush3.bf16.msra.mxu0 %v2893_v5  ;;  %v629_v55 = vrot.slane %v627_v44, 7  ;;  %v835_v1 = vrot.slane %v3279_v14, 1  ;;  %v761_v2 = vshll.u32 %v3331_v54, 16  ;;  %v2906_v5 = vld [vmem:[%s3722_s3 + $0x168] sm:$0xff]   ;;  %vm498_vm15 = vcmp.ne.s32.totalorder %v482_v53, 0 }
  0x34   : > { %1610 = vmatmul.mubr.bf16.gmra.mrb[4].mxu1 %v3271_v9  ;;  %2629 = vmatprep.subr.bf16.mxu0 %v2894_v10  ;;  %v634_v8 = vshrl.u32 %v2332_v63, 16  ;;  %v637_v62 = vshll.u32 %v2332_v63, 16  ;;  %v3357_v10 = vsel %vm704_vm10, %v747_v57, %v751_v58  ;;  %v839_v15 = vrot.slane %v3331_v54, 1 }
  0x35   : > { %1617 = vmatprep.mubr.bf16.mxu1 %v3279_v14  ;;  %2694 = vmatpush3.bf16.msra.mxu1 %v2905_v37  ;;  %v632_v61 = vor.u32 %v630_v45, %v629_v55  ;;  %v3366_v17 = vsel %vm3206_vm11, %v629_v55, 0  ;;  %v3371_v21 = vsel %vm825_vm7, %v835_v1, %v836_v60  ;;  %v535_v25 = vsel %vm498_vm15, %v429_v19, 0  ;;  %v2917_v1 = vld [vmem:[%s3722_s3 + $0x1f0] sm:$0xff]  }
  0x36   : > { %1513 = vmatmul.mubr.bf16.gmra.mrb[4].mxu0 %v3218_v27  ;;  %v3327_v27 = vsel %vm3206_vm11, 0, %v625_v41  ;;  %2695 = vmatprep.subr.bf16.mxu1 %v2907_v52  ;;  %v636_v18 = vrot.slane %v634_v8, 7  ;;  %v536_v7 = vsel %vm498_vm15, %v430_v24, 0  ;;  %v763_v30 = vrot.slane %v761_v2, 1  ;;  %v2913_v41 = vld [vmem:[%s3722_s3 + $0x1a0] sm:$0xff]   ;;  %v2915_v52 = vld [vmem:[%s3722_s3 + $0x1a8] sm:$0xff]  }
  0x37   : > { %1520 = vmatprep.mubr.bf16.mxu0 %v3306_v40  ;;  %2630 = vmatpush3.bf16.msra.mxu0 %v2896_v28  ;;  %v756_v59 = vshll.u32 %v3327_v27, 16  ;;  %v3354_v6 = vsel %vm3206_vm11, 0, %v632_v61  ;;  %v754_v11 = vshrl.u32 %v3327_v27, 16  ;;  %v2908_v28 = vld [vmem:[%s3722_s3 + $0x128] sm:$0xff]   ;;  %v2333_v31 = vcombine.low %v535_v25, %v536_v7 }
  0x38   : > { %2631 = vmatprep.subr.bf16.mxu0 %v2898_v32  ;;  %v768_v23 = vshll.u32 %v3354_v6, 16  ;;  %v639_v26 = vor.u32 %v637_v62, %v636_v18  ;;  %v2910_v32 = vld [vmem:[%s3722_s3 + $0x170] sm:$0xff]   ;;  %v838_v34 = vrot.slane %v3327_v27, 1  ;;  %v773_v36 = vshll.u32 %v3366_v17, 16  ;;  %v431_v62 = vld [vmem:[%s3169_s28 + $0x38] sm:$0xf] }
  0x39   : > { %2696 = vmatpush3.bf16.msra.mxu1 %v2909_v0  ;;  %v758_v13 = vrot.slane %v756_v59, 1  ;;  %v766_v37 = vshrl.u32 %v3354_v6, 16  ;;  %v3391_v39 = vsel %vm3206_vm11, %v636_v18, 0  ;;  %v641_v45 = vshrl.u32 %v2333_v31, 16 }
  0x3a   : > { %2697 = vmatprep.subr.bf16.mxu1 %v2911_v16  ;;  %v770_v38 = vrot.slane %v768_v23, 1  ;;  %v3398_v44 = vsel %vm3206_vm11, 0, %v639_v26  ;;  %v644_v51 = vshll.u32 %v2333_v31, 16  ;;  %v437_v54 = vadd.s32 8, %v3112_v20  ;;  %v2922_v23 = vld [vmem:[%s3722_s3 + $0x200] sm:$0xff]  }
  0x3b   : > { %2632 = vmatpush3.bf16.msra.mxu0 %v2900_v48  ;;  %v759_v29 = vor.u32 %v758_v13, %v754_v11  ;;  %v2914_v48 = vld [vmem:[%s3722_s3 + $0x1e8] sm:$0xff]   ;;  %v643_v53 = vrot.slane %v641_v45, 7  ;;  %v3415_v55 = vsel %vm825_vm7, %v838_v34, %v839_v15  ;;  %v780_v56 = vshll.u32 %v3398_v44, 16  ;;  %v432_v11 = vld [vmem:[%s3169_s28 + $0x3c] sm:$0xf]  ;;  %s390_s28 = scalar_lea.vmem %s3721_s2, %s2317_s30  ;;  %s3655_s30 = scalar_lea.vmem %s3723_s4, %s2310_s11 }
  0x3c   : > { %1618 = vmatmul.mubr.bf16.gmra.mrb[8].mxu1 %v3311_v47  ;;  %2633 = vmatprep.subr.bf16.mxu0 %v2902_v43  ;;  %v785_v57 = vshll.u32 %v3391_v39, 16  ;;  %v842_v58 = vrot.slane %v3366_v17, 1  ;;  %v442_v59 = vadd.s32 %v440_v22, %v437_v54  ;;  %v2916_v43 = vld [vmem:[%s3722_s3 + $0x178] sm:$0xff]   ;;  %v771_v60 = vor.u32 %v770_v38, %v766_v37  ;;  %v433_v20 = vld [vmem:[%s390_s28] sm:$0xf]  ;;  %s411_s11 = sadd.s32 %s2322_s6, %s3746_s18 }
  0x3d   : > { %1625 = vmatprep.mubr.bf16.mxu1 %v3327_v27  ;;  %v3407_v49 = vsel %vm704_vm10, %v759_v29, %v763_v30  ;;  %2698 = vmatpush3.bf16.msra.mxu1 %v2913_v41  ;;  %v775_v61 = vrot.slane %v773_v36, 1  ;;  %v841_v63 = vrot.slane %v3354_v6, 1  ;;  %v646_v0 = vor.u32 %v644_v51, %v643_v53  ;;  %v2918_v22 = vld [vmem:[%s3722_s3 + $0x138] sm:$0xff]   ;;  %s2323_s29 = sshll.u32 %s411_s11, 1 }
  0x3e   : > { %1521 = vmatmul.mubr.bf16.gmra.mrb[8].mxu0 %v3240_v50  ;;  %2699 = vmatprep.subr.bf16.mxu1 %v2914_v48  ;;  %v778_v2 = vshrl.u32 %v3398_v44, 16  ;;  %vm444_vm0 = vcmp.ge.s32.totalorder %v442_v59, 0  ;;  %vm446_vm1 = vcmp.lt.s32.totalorder %v442_v59, 16  ;;  %v787_v8 = vrot.slane %v785_v57, 1  ;;  %v2920_v15 = vld [vmem:[%s3722_s3 + $0x1f8] sm:$0xff]   ;;  %v2923_v57 = vld [vmem:[%s3722_s3 + $0x208] sm:$0xff]   ;;  %s413_s9 = scalar_lea.vmem %s3724_s5, %s2323_s29 }
  0x3f   : > { %1528 = vmatprep.mubr.bf16.mxu0 %v3357_v10  ;;  %2634 = vmatpush3.bf16.msra.mxu0 %v2904_v3  ;;  %v2919_v3 = vld [vmem:[%s3722_s3 + $0x1b0] sm:$0xff]   ;;  %vm448_vm2 = vmand %vm444_vm0, %vm446_vm1  ;;  %v3448_v16 = vsel %vm704_vm10, %v771_v60, %v775_v61  ;;  %v3452_v17 = vsel %vm3206_vm11, 0, %v646_v0  ;;  %v3462_v19 = vsel %vm825_vm7, %v841_v63, %v842_v58  ;;  %v701_v7 = vsel %vm3206_vm11, %v643_v53, 0 }
  0x40   : > { %2635 = vmatprep.subr.bf16.mxu0 %v2906_v5  ;;  %v782_v5 = vrot.slane %v780_v56, 1  ;;  %v3442_v13 = vsel %vm448_vm2, 1, %v2970_v42  ;;  %v2921_v42 = vld [vmem:[%s3722_s3 + $0x1b8] sm:$0xff]   ;;  %v844_v29 = vrot.slane %v3398_v44, 1  ;;  %v845_v30 = vrot.slane %v3391_v39, 1  ;;  %v2924_v58 = vld [vmem:[%s3722_s3 + $0x210] sm:$0xff]  }
  0x41   : > { %2700 = vmatpush3.bf16.msra.mxu1 %v2915_v52  ;;  %v486_v18 = vrot.slane %v3442_v13, %v453_v33  ;;  %v792_v33 = vshll.u32 %v3452_v17, 16  ;;  %v790_v36 = vshrl.u32 %v3452_v17, 16  ;;  %v797_v38 = vshll.u32 %v701_v7, 16 }
  0x42   : > { %2701 = vmatprep.subr.bf16.mxu1 %v2917_v1  ;;  %v783_v24 = vor.u32 %v782_v5, %v778_v2  ;;  %v3483_v45 = vsel %vm825_vm7, %v844_v29, %v845_v30  ;;  %v847_v52 = vrot.slane %v3452_v17, 1  ;;  %v848_v53 = vrot.slane %v701_v7, 1 }
  0x43   : > { %2636 = vmatpush3.bf16.msra.mxu0 %v2908_v28  ;;  %vm499_vm4 = vcmp.ne.s32.totalorder %v486_v18, 0  ;;  %v794_v37 = vrot.slane %v792_v33, 1  ;;  %v799_v48 = vrot.slane %v797_v38, 1 }
  0x44   : > { %1626 = vmatmul.mubr.bf16.gmra.mrb[12].mxu1 %v3371_v21  ;;  %2637 = vmatprep.subr.bf16.mxu0 %v2910_v32  ;;  %v537_v25 = vsel %vm499_vm4, %v431_v62, 0  ;;  %v538_v26 = vsel %vm499_vm4, %v432_v11, 0  ;;  %v3476_v34 = vsel %vm704_vm10, %v783_v24, %v787_v8  ;;  %v3500_v56 = vsel %vm825_vm7, %v847_v52, %v848_v53 }
  0x45   : > { %1633 = vmatprep.mubr.bf16.mxu1 %v3354_v6  ;;  %2702 = vmatpush3.bf16.msra.mxu1 %v2919_v3  ;;  %v2334_v28 = vcombine.low %v537_v25, %v538_v26  ;;  %v795_v39 = vor.u32 %v794_v37, %v790_v36 }
  0x46   : > { %1529 = vmatmul.mubr.bf16.gmra.mrb[12].mxu0 %v3279_v14  ;;  %2703 = vmatprep.subr.bf16.mxu1 %v2920_v15 }
  0x47   : > { %1536 = vmatprep.mubr.bf16.mxu0 %v3407_v49  ;;  %2638 = vmatpush3.bf16.msra.mxu0 %v2912_v46  ;;  %v648_v31 = vshrl.u32 %v2334_v28, 16  ;;  %v651_v32 = vshll.u32 %v2334_v28, 16  ;;  %v3496_v54 = vsel %vm704_vm10, %v795_v39, %v799_v48 }
  0x48   : > { %2639 = vmatprep.subr.bf16.mxu0 %v2916_v43 }
  0x49   : > { %2704 = vmatpush3.bf16.msra.mxu1 %v2921_v42  ;;  %v3479_v41 = vrot.slane %v648_v31, 7 }
  0x4a   : > { %2801 = vmatprep.subr.bf16.mxu1 %v2922_v23 }
  0x4b   : > { %2640 = vmatpush3.bf16.msra.mxu0 %v2918_v22  ;;  %v653_v46 = vor.u32 %v651_v32, %v3479_v41  ;;  %v702_v1 = vsel %vm3206_vm11, %v3479_v41, 0 }
  0x4c   : > { %1634 = vmatmul.mubr.bf16.gmra.mrb[16].mxu1 %v3415_v55  ;;  %2769 = vmatprep.subr.bf16.mxu0 %v2922_v23  ;;  %v866_v3 = vshll.u32 %v702_v1, 16  ;;  %v874_v24 = vrot.slane %v702_v1, 1 }
  0x4d   : > { %1641 = vmatprep.mubr.bf16.mxu1 %v3398_v44  ;;  %v3490_v51 = vsel %vm3206_vm11, 0, %v653_v46 }
  0x4e   : > { %1537 = vmatmul.mubr.bf16.gmra.mrb[16].mxu0 %v3327_v27  ;;  %v868_v62 = vrot.slane %v866_v3, 1 }
  0x4f   : > { %1544 = vmatprep.mubr.bf16.mxu0 %v3448_v16 }
  0x54   : > { %1642 = vmatmul.mubr.bf16.gmra.mrb[20].mxu1 %v3462_v19 }
  0x55   : > { %1649 = vmatprep.mubr.bf16.mxu1 %v3452_v17 }
  0x56   : > { %1545 = vmatmul.mubr.bf16.gmra.mrb[20].mxu0 %v3354_v6 }
  0x57   : > { %1552 = vmatprep.mubr.bf16.mxu0 %v3476_v34 }
  0x5c   : > { %1650 = vmatmul.mubr.bf16.gmra.mrb[24].mxu1 %v3483_v45 }
  0x5d   : > { %1657 = vmatprep.mubr.bf16.mxu1 %v3490_v51 }
  0x5e   : > { %1553 = vmatmul.mubr.bf16.gmra.mrb[24].mxu0 %v3398_v44 }
  0x5f   : > { %1560 = vmatprep.mubr.bf16.mxu0 %v3496_v54 }
  0x64   : > { %1658 = vmatmul.mubr.bf16.gmra.mrb[28].mxu1 %v3500_v56 }
  0x65   : > { %1795 = vmatprep.mubr.bf16.mxu1 %v3306_v40 }
  0x66   : > { %1561 = vmatmul.mubr.bf16.gmra.mrb[28].mxu0 %v3452_v17 }
  0x67   : > { %1698 = vmatprep.mubr.bf16.mxu0 %v3271_v9  ;;  %v490_v9 = vrot.slane %v3442_v13, %v457_v35  ;;  %v434_v35 = vld [vmem:[%s390_s28 + $0x4] sm:$0xf] }
  0x69   : > { %vm500_vm5 = vcmp.ne.s32.totalorder %v490_v9, 0 }
  0x6a   : > { %v539_v59 = vsel %vm500_vm5, %v433_v20, 0  ;;  %v540_v43 = vsel %vm500_vm5, %v434_v35, 0 }
  0x6b   : > { %v2335_v60 = vcombine.low %v539_v59, %v540_v43 }
  0x6c   : > { %1796 = vmatmul.mubr.bf16.vlgmr.msra.gmra.mrb[32].mxu1 %v3240_v50  ;;  %v2925_v50 = vld [vmem:[%s3722_s3 + $0x218] sm:$0xff]  }
  0x6d   : > { %1803 = vmatprep.mubr.bf16.mxu1 %v3357_v10  ;;  %2809 = vmatpush3.bf16.msra.mxu1 %v2922_v23  ;;  %v655_v61 = vshrl.u32 %v2335_v60, 16  ;;  %v658_v0 = vshll.u32 %v2335_v60, 16 }
  0x6e   : > { %2802 = vmatprep.subr.bf16.mxu1 %v2923_v57  ;;  %1699 = vmatmul.mubr.bf16.vlgmr.msra.gmra.mrb[32].mxu0 %v3261_v4  ;;  %v2926_v4 = vld [vmem:[%s3722_s3 + $0x220] sm:$0xff]  }
  0x6f   : > { %2770 = vmatpush3.bf16.msra.mxu0 %v2922_v23  ;;  %1706 = vmatprep.mubr.bf16.mxu0 %v3311_v47  ;;  %v657_v63 = vrot.slane %v655_v61, 7 }
  0x70   : > { %2771 = vmatprep.subr.bf16.mxu0 %v2923_v57 }
  0x71   : > { %2810 = vmatpush3.bf16.msra.mxu1 %v2923_v57  ;;  %v660_v22 = vor.u32 %v658_v0, %v657_v63 }
  0x72   : > { %2803 = vmatprep.subr.bf16.mxu1 %v2924_v58 }
  0x73   : > { %2772 = vmatpush3.bf16.msra.mxu0 %v2923_v57  ;;  %v693_v5 = vsel %vm3206_vm11, 0, %v660_v22 }
  0x74   : > { %1804 = vmatmul.mubr.bf16.gmra.mrb[36].mxu1 %v3279_v14  ;;  %2773 = vmatprep.subr.bf16.mxu0 %v2924_v58  ;;  %v2927_v14 = vld [vmem:[%s3722_s3 + $0x228] sm:$0xff]   ;;  %v880_v11 = vshll.u32 %v693_v5, 16  ;;  %v878_v15 = vshrl.u32 %v693_v5, 16 }
  0x75   : > { %1811 = vmatprep.mubr.bf16.mxu1 %v3407_v49  ;;  %2811 = vmatpush3.bf16.msra.mxu1 %v2924_v58 }
  0x76   : > { %2804 = vmatprep.subr.bf16.mxu1 %v2925_v50  ;;  %1707 = vmatmul.mubr.bf16.gmra.mrb[36].mxu0 %v3306_v40  ;;  %v2928_v40 = vld [vmem:[%s3722_s3 + $0x230] sm:$0xff]   ;;  %v882_v18 = vrot.slane %v880_v11, 1 }
  0x77   : > { %1714 = vmatprep.mubr.bf16.mxu0 %v3371_v21  ;;  %2774 = vmatpush3.bf16.msra.mxu0 %v2924_v58 }
  0x78   : > { %2775 = vmatprep.subr.bf16.mxu0 %v2925_v50 }
  0x79   : > { %2812 = vmatpush3.bf16.msra.mxu1 %v2925_v50 }
  0x7a   : > { %2805 = vmatprep.subr.bf16.mxu1 %v2926_v4 }
  0x7b   : > { %2776 = vmatpush3.bf16.msra.mxu0 %v2925_v50 }
  0x7c   : > { %1812 = vmatmul.mubr.bf16.gmra.mrb[40].mxu1 %v3327_v27  ;;  %2777 = vmatprep.subr.bf16.mxu0 %v2926_v4  ;;  %v2929_v27 = vld [vmem:[%s3722_s3 + $0x238] sm:$0xff]  }
  0x7d   : > { %1819 = vmatprep.mubr.bf16.mxu1 %v3448_v16  ;;  %2813 = vmatpush3.bf16.msra.mxu1 %v2926_v4 }
  0x7e   : > { %2806 = vmatprep.subr.bf16.mxu1 %v2927_v14  ;;  %1715 = vmatmul.mubr.bf16.gmra.mrb[40].mxu0 %v3357_v10  ;;  %v861_v10 = vshll.u32 %v3490_v51, 16 }
  0x7f   : > { %1722 = vmatprep.mubr.bf16.mxu0 %v3415_v55  ;;  %2778 = vmatpush3.bf16.msra.mxu0 %v2926_v4 }
  0x80   : > { %2779 = vmatprep.subr.bf16.mxu0 %v2927_v14  ;;  %v863_v2 = vrot.slane %v861_v10, 1 }
  0x81   : > { %2814 = vmatpush3.bf16.msra.mxu1 %v2927_v14 }
  0x82   : > { %2807 = vmatprep.subr.bf16.mxu1 %v2928_v40 }
  0x83   : > { %2780 = vmatpush3.bf16.msra.mxu0 %v2927_v14 }
  0x84   : > { %1820 = vmatmul.mubr.bf16.gmra.mrb[44].mxu1 %v3354_v6  ;;  %2781 = vmatprep.subr.bf16.mxu0 %v2928_v40  ;;  %v859_v6 = vshrl.u32 %v3490_v51, 16 }
  0x85   : > { %1827 = vmatprep.mubr.bf16.mxu1 %v3476_v34  ;;  %2815 = vmatpush3.bf16.msra.mxu1 %v2928_v40 }
  0x86   : > { %2808 = vmatprep.subr.bf16.mxu1 %v2929_v27  ;;  %1723 = vmatmul.mubr.bf16.gmra.mrb[44].mxu0 %v3407_v49  ;;  %v864_v8 = vor.u32 %v863_v2, %v859_v6  ;;  %v703_v49 = vsel %vm3206_vm11, %v657_v63, 0 }
  0x87   : > { %1730 = vmatprep.mubr.bf16.mxu0 %v3462_v19  ;;  %2782 = vmatpush3.bf16.msra.mxu0 %v2928_v40  ;;  %v885_v42 = vshll.u32 %v703_v49, 16  ;;  %v893_v25 = vrot.slane %v703_v49, 1 }
  0x88   : > { %2783 = vmatprep.subr.bf16.mxu0 %v2929_v27  ;;  %v869_v13 = vsel %vm704_vm10, %v864_v8, %v868_v62 }
  0x89   : > { %2816 = vmatpush3.bf16.msra.mxu1 %v2929_v27  ;;  %v887_v23 = vrot.slane %v885_v42, 1 }
  0x8b   : > { %2784 = vmatpush3.bf16.msra.mxu0 %v2929_v27 }
  0x8c   : > { %1828 = vmatmul.mubr.bf16.gmra.mrb[48].mxu1 %v3398_v44  ;;  %v883_v44 = vor.u32 %v882_v18, %v878_v15 }
  0x8d   : > { %1835 = vmatprep.mubr.bf16.mxu1 %v3496_v54 }
  0x8e   : > { %1731 = vmatmul.mubr.bf16.gmra.mrb[48].mxu0 %v3448_v16  ;;  %v888_v12 = vsel %vm704_vm10, %v883_v44, %v887_v23  ;;  %v873_v16 = vrot.slane %v3490_v51, 1 }
  0x8f   : > { %1738 = vmatprep.mubr.bf16.mxu0 %v3483_v45 }
  0x90   : > { %v875_v33 = vsel %vm825_vm7, %v873_v16, %v874_v24 }
  0x94   : > { %1836 = vmatmul.mubr.bf16.gmra.mrb[52].mxu1 %v3452_v17  ;;  %v892_v17 = vrot.slane %v693_v5, 1 }
  0x95   : > { %1843 = vmatprep.mubr.bf16.mxu1 %v869_v13 }
  0x96   : > { %1739 = vmatmul.mubr.bf16.gmra.mrb[52].mxu0 %v3476_v34  ;;  %v894_v26 = vsel %vm825_vm7, %v892_v17, %v893_v25 }
  0x97   : > { %1746 = vmatprep.mubr.bf16.mxu0 %v3500_v56 }
  0x9c   : > { %1844 = vmatmul.mubr.bf16.gmra.mrb[56].mxu1 %v3490_v51 }
  0x9d   : > { %1851 = vmatprep.mubr.bf16.mxu1 %v888_v12 }
  0x9e   : > { %1747 = vmatmul.mubr.bf16.gmra.mrb[56].mxu0 %v3496_v54 }
  0x9f   : > { %1754 = vmatprep.mubr.bf16.mxu0 %v875_v33 }
  0xa4   : > { %1852 = vmatmul.mubr.bf16.gmra.mrb[60].mxu1 %v693_v5 }
  0xa5   : > { %2793 = vmatprep.mubr.bf16.mxu1 %v3483_v45 }
  0xa6   : > { %1755 = vmatmul.mubr.bf16.gmra.mrb[60].mxu0 %v869_v13 }
  0xa7   : > { %2785 = vmatprep.mubr.bf16.mxu0 %v3311_v47 }
  0xac   : > { %2794 = vmatmul.mubr.bf16.vlgmr.msra.gmra.mrb[64].mxu1 %v3500_v56 }
  0xad   : > { %2797 = vmatprep.mubr.bf16.mxu1 %v875_v33 }
  0xae   : > { %2786 = vmatmul.mubr.bf16.vlgmr.msra.gmra.mrb[64].mxu0 %v3371_v21 }
  0xaf   : > { %2789 = vmatprep.mubr.bf16.mxu0 %v3415_v55 }
  0xb4   : > { %2798 = vmatmul.mubr.bf16.gmra.mrb[68].mxu1 %v894_v26 }
  0xb6   : > { %2790 = vmatmul.mubr.bf16.gmra.mrb[68].mxu0 %v3462_v19 }
  0xff   : > { %v2577_v28 = vpop.f32.mrb[0].mxu1 }
 0x100   : > { %v2578_v7 = vpop.f32.mrb[1].mxu1 }
 0x101   : > { %v2579_v29 = vadd.f32 %v2578_v7, %v2577_v28  ;;  %v2580_v30 = vpop.f32.mrb[2].mxu1  ;;  %v2513_v32 = vpop.f32.mrb[0].mxu0 }
 0x102   : > { %v2581_v31 = vpop.f32.mrb[3].mxu1  ;;  %v2514_v34 = vpop.f32.mrb[1].mxu0 }
 0x103   : > { %v2582_v47 = vadd.f32 %v2581_v31, %v2580_v30  ;;  %v2515_v36 = vadd.f32 %v2514_v34, %v2513_v32  ;;  %v2516_v37 = vpop.f32.mrb[2].mxu0 }
 0x104   : > { %v2517_v38 = vpop.f32.mrb[3].mxu0 }
 0x105   : > { %v3580_v21 = vadd.f32 %v2579_v29, %v2515_v36  ;;  %v2518_v45 = vadd.f32 %v2517_v38, %v2516_v37 }
 0x107   : > { %v2583_v41 = vpop.f32.mrb[4].mxu1  ;;  %v3582_v48 = vadd.f32 %v2582_v47, %v2518_v45 }
 0x108   : > { %v2584_v46 = vpop.f32.mrb[5].mxu1 }
 0x109   : > { %v2585_v55 = vadd.f32 %v2584_v46, %v2583_v41  ;;  %v2586_v39 = vpop.f32.mrb[6].mxu1  ;;  %v2519_v52 = vpop.f32.mrb[4].mxu0 }
 0x10a   : > { %v2587_v19 = vpop.f32.mrb[7].mxu1  ;;  %v2520_v53 = vpop.f32.mrb[5].mxu0 }
 0x10b   : > { %v2588_v51 = vadd.f32 %v2587_v19, %v2586_v39  ;;  %v2521_v54 = vadd.f32 %v2520_v53, %v2519_v52  ;;  %v2522_v56 = vpop.f32.mrb[6].mxu0 }
 0x10c   : > { %v2523_v57 = vpop.f32.mrb[7].mxu0 }
 0x10d   : > { %v3584_v9 = vadd.f32 %v2585_v55, %v2521_v54  ;;  %v2524_v50 = vadd.f32 %v2523_v57, %v2522_v56 }
 0x10f   : > { %v2589_v58 = vpop.f32.mrb[8].mxu1  ;;  %v3586_v59 = vadd.f32 %v2588_v51, %v2524_v50 }
 0x110   : > { %v2590_v20 = vpop.f32.mrb[9].mxu1 }
 0x111   : > { %v2591_v35 = vadd.f32 %v2590_v20, %v2589_v58  ;;  %v2592_v4 = vpop.f32.mrb[10].mxu1  ;;  %v2525_v60 = vpop.f32.mrb[8].mxu0 }
 0x112   : > { %v2593_v43 = vpop.f32.mrb[11].mxu1  ;;  %v2526_v40 = vpop.f32.mrb[9].mxu0 }
 0x113   : > { %v2594_v14 = vadd.f32 %v2593_v43, %v2592_v4  ;;  %v2527_v61 = vadd.f32 %v2526_v40, %v2525_v60  ;;  %v2528_v27 = vpop.f32.mrb[10].mxu0 }
 0x114   : > { %v2529_v63 = vpop.f32.mrb[11].mxu0 }
 0x115   : > { %v3588_v10 = vadd.f32 %v2591_v35, %v2527_v61  ;;  %v2530_v1 = vadd.f32 %v2529_v63, %v2528_v27 }
 0x117   : > { %v2595_v0 = vpop.f32.mrb[12].mxu1  ;;  %v3590_v3 = vadd.f32 %v2594_v14, %v2530_v1 }
 0x118   : > { %v2596_v22 = vpop.f32.mrb[13].mxu1 }
 0x119   : > { %v2597_v6 = vadd.f32 %v2596_v22, %v2595_v0  ;;  %v2598_v2 = vpop.f32.mrb[14].mxu1  ;;  %v2531_v62 = vpop.f32.mrb[12].mxu0 }
 0x11a   : > { %v2599_v5 = vpop.f32.mrb[15].mxu1  ;;  %v2532_v11 = vpop.f32.mrb[13].mxu0 }
 0x11b   : > { %v2600_v8 = vadd.f32 %v2599_v5, %v2598_v2  ;;  %v2533_v49 = vadd.f32 %v2532_v11, %v2531_v62  ;;  %v2534_v13 = vpop.f32.mrb[14].mxu0 }
 0x11c   : > { %v2535_v15 = vpop.f32.mrb[15].mxu0 }
 0x11d   : > { %v3592_v42 = vadd.f32 %v2597_v6, %v2533_v49  ;;  %v2536_v44 = vadd.f32 %v2535_v15, %v2534_v13 }
 0x11f   : > { %v2601_v18 = vpop.f32.mrb[16].mxu1  ;;  %v3594_v24 = vadd.f32 %v2600_v8, %v2536_v44 }
 0x120   : > { %v2602_v23 = vpop.f32.mrb[17].mxu1 }
 0x121   : > { %v2603_v12 = vadd.f32 %v2602_v23, %v2601_v18  ;;  %v2604_v16 = vpop.f32.mrb[18].mxu1  ;;  %v2537_v25 = vpop.f32.mrb[16].mxu0 }
 0x122   : > { %v2605_v33 = vpop.f32.mrb[19].mxu1  ;;  %v2538_v26 = vpop.f32.mrb[17].mxu0 }
 0x123   : > { %v2606_v17 = vadd.f32 %v2605_v33, %v2604_v16  ;;  %v2539_v28 = vadd.f32 %v2538_v26, %v2537_v25  ;;  %v2540_v7 = vpop.f32.mrb[18].mxu0 }
 0x124   : > { %v2541_v29 = vpop.f32.mrb[19].mxu0 }
 0x125   : > { %v3596_v31 = vadd.f32 %v2603_v12, %v2539_v28  ;;  %v2542_v47 = vadd.f32 %v2541_v29, %v2540_v7 }
 0x127   : > { %v2607_v30 = vpop.f32.mrb[20].mxu1  ;;  %v3598_v37 = vadd.f32 %v2606_v17, %v2542_v47 }
 0x128   : > { %v2608_v32 = vpop.f32.mrb[21].mxu1 }
 0x129   : > { %v2609_v34 = vadd.f32 %v2608_v32, %v2607_v30  ;;  %v2610_v36 = vpop.f32.mrb[22].mxu1  ;;  %v2543_v45 = vpop.f32.mrb[20].mxu0 }
 0x12a   : > { %v2611_v38 = vpop.f32.mrb[23].mxu1  ;;  %v2544_v46 = vpop.f32.mrb[21].mxu0 }
 0x12b   : > { %v2612_v41 = vadd.f32 %v2611_v38, %v2610_v36  ;;  %v2545_v55 = vadd.f32 %v2544_v46, %v2543_v45  ;;  %v2546_v39 = vpop.f32.mrb[22].mxu0 }
 0x12c   : > { %v2547_v19 = vpop.f32.mrb[23].mxu0 }
 0x12d   : > { %v3600_v52 = vadd.f32 %v2609_v34, %v2545_v55  ;;  %v2548_v53 = vadd.f32 %v2547_v19, %v2546_v39 }
 0x12f   : > { %v2613_v51 = vpop.f32.mrb[24].mxu1  ;;  %v3602_v58 = vadd.f32 %v2612_v41, %v2548_v53 }
 0x130   : > { %v2614_v54 = vpop.f32.mrb[25].mxu1 }
 0x131   : > { %v2615_v56 = vadd.f32 %v2614_v54, %v2613_v51  ;;  %v2616_v57 = vpop.f32.mrb[26].mxu1  ;;  %v2549_v35 = vpop.f32.mrb[24].mxu0 }
 0x132   : > { %v2617_v50 = vpop.f32.mrb[27].mxu1  ;;  %v2550_v4 = vpop.f32.mrb[25].mxu0 }
 0x133   : > { %v2618_v20 = vadd.f32 %v2617_v50, %v2616_v57  ;;  %v2551_v43 = vadd.f32 %v2550_v4, %v2549_v35  ;;  %v2552_v14 = vpop.f32.mrb[26].mxu0 }
 0x134   : > { %v2553_v60 = vpop.f32.mrb[27].mxu0 }
 0x135   : > { %v3604_v61 = vadd.f32 %v2615_v56, %v2551_v43  ;;  %v2554_v27 = vadd.f32 %v2553_v60, %v2552_v14 }
 0x137   : > { %v2619_v40 = vpop.f32.mrb[28].mxu1  ;;  %v3606_v22 = vadd.f32 %v2618_v20, %v2554_v27 }
 0x138   : > { %v2620_v63 = vpop.f32.mrb[29].mxu1 }
 0x139   : > { %v2621_v0 = vadd.f32 %v2620_v63, %v2619_v40  ;;  %v2622_v1 = vpop.f32.mrb[30].mxu1  ;;  %v2555_v5 = vpop.f32.mrb[28].mxu0 }
 0x13a   : > { %v2623_v6 = vpop.f32.mrb[31].mxu1  ;;  %v2556_v8 = vpop.f32.mrb[29].mxu0 }
 0x13b   : > { %v2624_v2 = vadd.f32 %v2623_v6, %v2622_v1  ;;  %v2557_v62 = vadd.f32 %v2556_v8, %v2555_v5  ;;  %v2558_v11 = vpop.f32.mrb[30].mxu0 }
 0x13c   : > { %v2559_v49 = vpop.f32.mrb[31].mxu0 }
 0x13d   : > { %v3608_v15 = vadd.f32 %v2621_v0, %v2557_v62  ;;  %v2560_v18 = vadd.f32 %v2559_v49, %v2558_v11 }
 0x13f   : > { %v2705_v13 = vpop.f32.mrb[32].mxu1  ;;  %v3610_v16 = vadd.f32 %v2624_v2, %v2560_v18 }
 0x140   : > { %v2706_v44 = vpop.f32.mrb[33].mxu1 }
 0x141   : > { %v2707_v23 = vadd.f32 %v2706_v44, %v2705_v13  ;;  %v2708_v12 = vpop.f32.mrb[34].mxu1  ;;  %v2641_v25 = vpop.f32.mrb[32].mxu0 }
 0x142   : > { %v2709_v33 = vpop.f32.mrb[35].mxu1  ;;  %v2642_v26 = vpop.f32.mrb[33].mxu0 }
 0x143   : > { %v2710_v17 = vadd.f32 %v2709_v33, %v2708_v12  ;;  %v2643_v28 = vadd.f32 %v2642_v26, %v2641_v25  ;;  %v2644_v7 = vpop.f32.mrb[34].mxu0 }
 0x144   : > { %v2645_v29 = vpop.f32.mrb[35].mxu0 }
 0x145   : > { %v1701_v47 = vadd.f32 %v2643_v28, %v3580_v21  ;;  %v2646_v32 = vadd.f32 %v2645_v29, %v2644_v7 }
 0x147   : > { %v2711_v30 = vpop.f32.mrb[36].mxu1  ;;  %v1704_v41 = vadd.f32 %v2646_v32, %v3582_v48  ;;  %v3614_v46 = vadd.f32 %v2707_v23, %v1701_v47 }
 0x148   : > { %v2712_v34 = vpop.f32.mrb[37].mxu1 }
 0x149   : > { %v2713_v36 = vadd.f32 %v2712_v34, %v2711_v30  ;;  %v2714_v38 = vpop.f32.mrb[38].mxu1  ;;  %v2647_v39 = vpop.f32.mrb[36].mxu0  ;;  %v3616_v19 = vadd.f32 %v2710_v17, %v1704_v41 }
 0x14a   : > { %v2715_v45 = vpop.f32.mrb[39].mxu1  ;;  %v2648_v51 = vpop.f32.mrb[37].mxu0 }
 0x14b   : > { %v2716_v55 = vadd.f32 %v2715_v45, %v2714_v38  ;;  %v2649_v53 = vadd.f32 %v2648_v51, %v2647_v39  ;;  %v2650_v54 = vpop.f32.mrb[38].mxu0 }
 0x14c   : > { %v2651_v56 = vpop.f32.mrb[39].mxu0 }
 0x14d   : > { %v1709_v21 = vadd.f32 %v2649_v53, %v3584_v9  ;;  %v2652_v50 = vadd.f32 %v2651_v56, %v2650_v54 }
 0x14f   : > { %v2717_v57 = vpop.f32.mrb[40].mxu1  ;;  %v1712_v48 = vadd.f32 %v2652_v50, %v3586_v59  ;;  %v3620_v14 = vadd.f32 %v2713_v36, %v1709_v21 }
 0x150   : > { %v2718_v20 = vpop.f32.mrb[41].mxu1 }
 0x151   : > { %v2719_v35 = vadd.f32 %v2718_v20, %v2717_v57  ;;  %v2720_v4 = vpop.f32.mrb[42].mxu1  ;;  %v2653_v40 = vpop.f32.mrb[40].mxu0  ;;  %v3622_v27 = vadd.f32 %v2716_v55, %v1712_v48 }
 0x152   : > { %v2721_v43 = vpop.f32.mrb[43].mxu1  ;;  %v2654_v63 = vpop.f32.mrb[41].mxu0 }
 0x153   : > { %v2722_v60 = vadd.f32 %v2721_v43, %v2720_v4  ;;  %v2655_v0 = vadd.f32 %v2654_v63, %v2653_v40  ;;  %v2656_v1 = vpop.f32.mrb[42].mxu0 }
 0x154   : > { %v2657_v6 = vpop.f32.mrb[43].mxu0 }
 0x155   : > { %v1717_v9 = vadd.f32 %v2655_v0, %v3588_v10  ;;  %v2658_v5 = vadd.f32 %v2657_v6, %v2656_v1 }
 0x157   : > { %v2723_v2 = vpop.f32.mrb[44].mxu1  ;;  %v1720_v59 = vadd.f32 %v2658_v5, %v3590_v3  ;;  %v3626_v13 = vadd.f32 %v2719_v35, %v1717_v9 }
 0x158   : > { %v2724_v8 = vpop.f32.mrb[45].mxu1 }
 0x159   : > { %v2725_v62 = vadd.f32 %v2724_v8, %v2723_v2  ;;  %v2726_v11 = vpop.f32.mrb[46].mxu1  ;;  %v2659_v44 = vpop.f32.mrb[44].mxu0  ;;  %v3628_v23 = vadd.f32 %v2722_v60, %v1720_v59 }
 0x15a   : > { %v2727_v49 = vpop.f32.mrb[47].mxu1  ;;  %v2660_v12 = vpop.f32.mrb[45].mxu0 }
 0x15b   : > { %v2728_v18 = vadd.f32 %v2727_v49, %v2726_v11  ;;  %v2661_v33 = vadd.f32 %v2660_v12, %v2659_v44  ;;  %v2662_v17 = vpop.f32.mrb[46].mxu0 }
 0x15c   : > { %v2663_v25 = vpop.f32.mrb[47].mxu0 }
 0x15d   : > { %v1725_v10 = vadd.f32 %v2661_v33, %v3592_v42  ;;  %v2664_v28 = vadd.f32 %v2663_v25, %v2662_v17 }
 0x15f   : > { %v2729_v26 = vpop.f32.mrb[48].mxu1  ;;  %v1728_v3 = vadd.f32 %v2664_v28, %v3594_v24  ;;  %v3632_v32 = vadd.f32 %v2725_v62, %v1725_v10 }
 0x160   : > { %v2730_v7 = vpop.f32.mrb[49].mxu1 }
 0x161   : > { %v2731_v29 = vadd.f32 %v2730_v7, %v2729_v26  ;;  %v2732_v30 = vpop.f32.mrb[50].mxu1  ;;  %v2665_v36 = vpop.f32.mrb[48].mxu0  ;;  %v3634_v38 = vadd.f32 %v2728_v18, %v1728_v3 }
 0x162   : > { %v2733_v47 = vpop.f32.mrb[51].mxu1  ;;  %v2666_v41 = vpop.f32.mrb[49].mxu0 }
 0x163   : > { %v2734_v34 = vadd.f32 %v2733_v47, %v2732_v30  ;;  %v2667_v45 = vadd.f32 %v2666_v41, %v2665_v36  ;;  %v2668_v55 = vpop.f32.mrb[50].mxu0 }
 0x164   : > { %v2669_v39 = vpop.f32.mrb[51].mxu0 }
 0x165   : > { %v1733_v42 = vadd.f32 %v2667_v45, %v3596_v31  ;;  %v2670_v53 = vadd.f32 %v2669_v39, %v2668_v55 }
 0x167   : > { %v2735_v51 = vpop.f32.mrb[52].mxu1  ;;  %v1736_v24 = vadd.f32 %v2670_v53, %v3598_v37  ;;  %v1830_v50 = vadd.f32 %v2731_v29, %v1733_v42 }
 0x168   : > { %v2736_v54 = vpop.f32.mrb[53].mxu1 }
 0x169   : > { %v2737_v56 = vadd.f32 %v2736_v54, %v2735_v51  ;;  %v2738_v57 = vpop.f32.mrb[54].mxu1  ;;  %v2671_v35 = vpop.f32.mrb[52].mxu0  ;;  %v1833_v4 = vadd.f32 %v2734_v34, %v1736_v24 }
 0x16a   : > { %v2739_v21 = vpop.f32.mrb[55].mxu1  ;;  %v2672_v48 = vpop.f32.mrb[53].mxu0 }
 0x16b   : > { %v2740_v20 = vadd.f32 %v2739_v21, %v2738_v57  ;;  %v2673_v43 = vadd.f32 %v2672_v48, %v2671_v35  ;;  %v2674_v60 = vpop.f32.mrb[54].mxu0 }
 0x16c   : > { %v2675_v40 = vpop.f32.mrb[55].mxu0 }
 0x16d   : > { %v1741_v0 = vadd.f32 %v2673_v43, %v3600_v52  ;;  %v2676_v1 = vadd.f32 %v2675_v40, %v2674_v60 }
 0x16f   : > { %v2741_v63 = vpop.f32.mrb[56].mxu1  ;;  %v1744_v9 = vadd.f32 %v2676_v1, %v3602_v58  ;;  %v1838_v37 = vadd.f32 %v2737_v56, %v1741_v0 }
 0x170   : > { %v2742_v31 = vpop.f32.mrb[57].mxu1 }
 0x171   : > { %v2743_v6 = vadd.f32 %v2742_v31, %v2741_v63  ;;  %v2744_v2 = vpop.f32.mrb[58].mxu1  ;;  %v2677_v62 = vpop.f32.mrb[56].mxu0  ;;  %v1841_v11 = vadd.f32 %v2740_v20, %v1744_v9 }
 0x172   : > { %v2745_v5 = vpop.f32.mrb[59].mxu1  ;;  %v2678_v59 = vpop.f32.mrb[57].mxu0 }
 0x173   : > { %v2746_v8 = vadd.f32 %v2745_v5, %v2744_v2  ;;  %v2679_v49 = vadd.f32 %v2678_v59, %v2677_v62  ;;  %v2680_v18 = vpop.f32.mrb[58].mxu0 }
 0x174   : > { %v2681_v44 = vpop.f32.mrb[59].mxu0 }
 0x175   : > { %v1749_v33 = vadd.f32 %v2679_v49, %v3604_v61  ;;  %v2682_v17 = vadd.f32 %v2681_v44, %v2680_v18 }
 0x177   : > { %v2747_v12 = vpop.f32.mrb[60].mxu1  ;;  %v1752_v10 = vadd.f32 %v2682_v17, %v3606_v22  ;;  %v1846_v58 = vadd.f32 %v2743_v6, %v1749_v33 }
 0x178   : > { %v2748_v52 = vpop.f32.mrb[61].mxu1 }
 0x179   : > { %v2749_v25 = vadd.f32 %v2748_v52, %v2747_v12  ;;  %v2750_v26 = vpop.f32.mrb[62].mxu1  ;;  %v2683_v29 = vpop.f32.mrb[60].mxu0  ;;  %v1849_v30 = vadd.f32 %v2746_v8, %v1752_v10 }
 0x17a   : > { %v2751_v28 = vpop.f32.mrb[63].mxu1  ;;  %v2684_v3 = vpop.f32.mrb[61].mxu0 }
 0x17b   : > { %v2752_v7 = vadd.f32 %v2751_v28, %v2750_v26  ;;  %v2685_v47 = vadd.f32 %v2684_v3, %v2683_v29  ;;  %v2686_v34 = vpop.f32.mrb[62].mxu0 }
 0x17c   : > { %v2687_v36 = vpop.f32.mrb[63].mxu0 }
 0x17d   : > { %v1757_v45 = vadd.f32 %v2685_v47, %v3608_v15  ;;  %v2688_v61 = vadd.f32 %v2687_v36, %v2686_v34 }
 0x17f   : > { %v2795_v41 = vpop.f32.mrb[64].mxu1  ;;  %v1760_v42 = vadd.f32 %v2688_v61, %v3610_v16  ;;  %v1854_v56 = vadd.f32 %v2749_v25, %v1757_v45 }
 0x180   : > { %v3643_v55 = vadd.f32 %v2795_v41, %v1838_v37  ;;  %v1926_v39 = vpop.f32.mrb[65].mxu1 }
 0x181   : > { %v3645_v51 = vadd.f32 %v1926_v39, %v1830_v50  ;;  %v2796_v22 = vpop.f32.mrb[66].mxu1  ;;  %v2787_v57 = vpop.f32.mrb[64].mxu0  ;;  %v1857_v21 = vadd.f32 %v2752_v7, %v1760_v42 }
 0x182   : > { %v3648_v53 = vadd.f32 %v2796_v22, %v1841_v11  ;;  %v1929_v54 = vpop.f32.mrb[67].mxu1  ;;  %v1903_v16 = vadd.f32 %v2787_v57, %v3620_v14  ;;  %v1894_v50 = vpop.f32.mrb[65].mxu0  ;;  %v1988_v57 = vmul.f32 %v3643_v55, %v3643_v55 }
 0x183   : > { %v3657_v15 = vadd.f32 %v1929_v54, %v1833_v4  ;;  %v1895_v35 = vadd.f32 %v1894_v50, %v3614_v46  ;;  %v2788_v48 = vpop.f32.mrb[66].mxu0  ;;  %v1986_v39 = vmul.f32 %v3645_v51, %v3645_v51 }
 0x184   : > { %v2478_v24 = vpack.c.bf16 %v3648_v53, %v3643_v55  ;;  %v1906_v43 = vadd.f32 %v2788_v48, %v3622_v27  ;;  %v1897_v4 = vpop.f32.mrb[67].mxu0  ;;  %v1980_v8 = vmul.f32 %v1903_v16, %v1903_v16 }
 0x185   : > { %v2473_v20 = vpack.c.bf16 %v3657_v15, %v3645_v51  ;;  %v1898_v40 = vadd.f32 %v1897_v4, %v3616_v19  ;;  %v1978_v6 = vmul.f32 %v1895_v35, %v1895_v35  ;;  %v1987_v42 = vmul.f32 %v3657_v15, %v3657_v15 }
 0x186   : > { %2494 = vst [vmem:[%s3655_s30 + $0x28] sm:$0xff] %v2478_v24   ;;  %v2458_v0 = vpack.c.bf16 %v1906_v43, %v1903_v16  ;;  %v1981_v59 = vmul.f32 %v1906_v43, %v1906_v43 }
 0x187   : > { %2493 = vst [vmem:[%s3655_s30 + $0x20] sm:$0xff] %v2473_v20   ;;  %v2799_v60 = vpop.f32.mrb[68].mxu1  ;;  %v1957_v2 = vadd.f32 %v1898_v40, %v1895_v35  ;;  %v1979_v46 = vmul.f32 %v1898_v40, %v1898_v40  ;;  %v2453_v9 = vpack.c.bf16 %v1898_v40, %v1895_v35 }
 0x188   : > { %v3669_v63 = vadd.f32 %v2799_v60, %v1854_v56  ;;  %v1942_v14 = vpop.f32.mrb[69].mxu1  ;;  %2490 = vst [vmem:[%s3655_s30 + $0x8] sm:$0xff] %v2458_v0  }
 0x189   : > { %v1943_v1 = vadd.f32 %v1942_v14, %v1846_v58  ;;  %v2800_v31 = vpop.f32.mrb[70].mxu1  ;;  %v1958_v62 = vadd.f32 %v1957_v2, %v1903_v16  ;;  %v1994_v11 = vadd.f32 %v1979_v46, %v1978_v6  ;;  %2454 = vst [vmem:[%s3655_s30] sm:$0xff] %v2453_v9   ;;  %v2791_v19 = vpop.f32.mrb[68].mxu0  ;;  %v1989_v16 = vmul.f32 %v3648_v53, %v3648_v53 }
 0x18a   : > { %v1945_v5 = vpop.f32.mrb[71].mxu1  ;;  %v1954_v37 = vadd.f32 %v2800_v31, %v1857_v21  ;;  %v1919_v49 = vadd.f32 %v2791_v19, %v3632_v32  ;;  %v1910_v18 = vpop.f32.mrb[69].mxu0  ;;  %v1992_v60 = vmul.f32 %v3669_v63, %v3669_v63 }
 0x18b   : > { %v1946_v27 = vadd.f32 %v1945_v5, %v1849_v30  ;;  %v1995_v12 = vadd.f32 %v1994_v11, %v1980_v8  ;;  %v1911_v33 = vadd.f32 %v1910_v18, %v3626_v13  ;;  %v1959_v17 = vadd.f32 %v1958_v62, %v1906_v43  ;;  %v2792_v52 = vpop.f32.mrb[70].mxu0 }
 0x18c   : > { %v2488_v44 = vpack.c.bf16 %v1954_v37, %v3669_v63  ;;  %v1922_v26 = vadd.f32 %v2792_v52, %v3634_v38  ;;  %v1913_v10 = vpop.f32.mrb[71].mxu0  ;;  %v1984_v34 = vmul.f32 %v1919_v49, %v1919_v49  ;;  %v1990_v20 = vmul.f32 %v1943_v1, %v1943_v1 }
 0x18d   : > { %v2483_v25 = vpack.c.bf16 %v1946_v27, %v1943_v1  ;;  %v1960_v28 = vadd.f32 %v1959_v17, %v1911_v33  ;;  %v1982_v58 = vmul.f32 %v1911_v33, %v1911_v33  ;;  %v1996_v7 = vadd.f32 %v1995_v12, %v1981_v59 }
 0x18e   : > { %2496 = vst [vmem:[%s3655_s30 + $0x38] sm:$0xff] %v2488_v44   ;;  %v1914_v32 = vadd.f32 %v1913_v10, %v3628_v23  ;;  %v2468_v29 = vpack.c.bf16 %v1922_v26, %v1919_v49  ;;  %v1985_v38 = vmul.f32 %v1922_v26, %v1922_v26  ;;  %v1993_v14 = vmul.f32 %v1954_v37, %v1954_v37 }
 0x18f   : > { %2495 = vst [vmem:[%s3655_s30 + $0x30] sm:$0xff] %v2483_v25   ;;  %v1997_v30 = vadd.f32 %v1996_v7, %v1982_v58 }
 0x190   : > { %v1961_v3 = vadd.f32 %v1960_v28, %v1914_v32  ;;  %v1983_v47 = vmul.f32 %v1914_v32, %v1914_v32  ;;  %v2463_v13 = vpack.c.bf16 %v1914_v32, %v1911_v33  ;;  %2492 = vst [vmem:[%s3655_s30 + $0x18] sm:$0xff] %v2468_v29  }
 0x192   : > { %v1962_v36 = vadd.f32 %v1961_v3, %v1919_v49  ;;  %v1998_v41 = vadd.f32 %v1997_v30, %v1983_v47  ;;  %2491 = vst [vmem:[%s3655_s30 + $0x10] sm:$0xff] %v2463_v13  }
 0x194   : > { %v1963_v45 = vadd.f32 %v1962_v36, %v1922_v26  ;;  %v1999_v61 = vadd.f32 %v1998_v41, %v1984_v34 }
 0x196   : > { %v1964_v22 = vadd.f32 %v1963_v45, %v3645_v51  ;;  %v2000_v23 = vadd.f32 %v1999_v61, %v1985_v38 }
 0x198   : > { %v2001_v54 = vadd.f32 %v2000_v23, %v1986_v39  ;;  %v1965_v56 = vadd.f32 %v1964_v22, %v3657_v15  ;;  %v1991_v15 = vmul.f32 %v1946_v27, %v1946_v27 }
 0x19a   : > { %v1966_v24 = vadd.f32 %v1965_v56, %v3643_v55  ;;  %v2002_v21 = vadd.f32 %v2001_v54, %v1987_v42 }
 0x19c   : > { %v1967_v50 = vadd.f32 %v1966_v24, %v3648_v53  ;;  %v2003_v51 = vadd.f32 %v2002_v21, %v1988_v57 }
 0x19e   : > { %v1968_v35 = vadd.f32 %v1967_v50, %v1943_v1  ;;  %v2004_v48 = vadd.f32 %v2003_v51, %v1989_v16 }
 0x1a0   : > { %v1969_v43 = vadd.f32 %v1968_v35, %v1946_v27  ;;  %v2005_v4 = vadd.f32 %v2004_v48, %v1990_v20 }
 0x1a2   : > { %v1970_v55 = vadd.f32 %v1969_v43, %v3669_v63  ;;  %v2006_v40 = vadd.f32 %v2005_v4, %v1991_v15 }
 0x1a4   : > { %v1971_v0 = vadd.f32 %v1970_v55, %v1954_v37  ;;  %v2007_v31 = vadd.f32 %v2006_v40, %v1992_v60 }
 0x1a6   : > { %v1972_v53 = vrot.slane %v1971_v0, 4  ;;  %v2008_v6 = vadd.f32 %v2007_v31, %v1993_v14 }
 0x1a8   : > { %v1973_v2 = vadd.f32 %v1972_v53, %v1971_v0  ;;  %v2009_v1 = vrot.slane %v2008_v6, 4 }
 0x1aa   : > { %v1974_v46 = vrot.slane %v1973_v2, 2  ;;  %v2010_v9 = vadd.f32 %v2009_v1, %v2008_v6 }
 0x1ac   : > { %v1975_v5 = vadd.f32 %v1974_v46, %v1973_v2  ;;  %v2011_v27 = vrot.slane %v2010_v9, 2 }
 0x1ae   : > { %v1976_v8 = vrot.slane %v1975_v5, 1  ;;  %v2012_v62 = vadd.f32 %v2011_v27, %v2010_v9 }
 0x1b0   : > { %v2013_v63 = vrot.slane %v2012_v62, 1  ;;  %v1977_v37 = vadd.f32 %v1976_v8, %v1975_v5 }
 0x1b2   : > { %v2014_v11 = vadd.f32 %v2013_v63, %v2012_v62 }
 0x1b4   : > { %v2016_v19 = vsel %vm681_vm3, %v1977_v37, %v2014_v11 }
 0x1b5   : > { %2017 = vst [vmem:[%s413_s9] sm:$0x3] %v2016_v19 }
 0x1b6 PF: > { %s16_s22 = sadd.s32 1, %s2968_s22   ;;  %s3727_s18 = smov %s2960_s20 }
 0x1b7   : > { %p13_p11 = scmp.ge.s32.totalorder %s16_s22, 6   ;;  %s3728_s19 = smov %s2964_s21 }
 0x1b8   : > { %s3729_s20 = smov %s3732_s23  ;;  %s3730_s21 = smov %s3736_s24 }
 0x1b9   :  { %15 = sbr.rel (!%p13_p11) target bundleno = 3 (0x3), region = 84 }

// kernel: double_conv.4
= control target key start
LH: loop header
LB: loop body
LE: loop exit
PB: predicated region body
PF: predicated region fallthrough
CT: control target
= control target key end

     0   :  { %s3158_s24 = smov 0   ;;  %s3160_s25 = smov 0   ;;  %s3989_s0 = inlined_call_operand.vmem [shape: bf16[2,16,16,128], index: 0, kind: input, shape index: {}, may-alias: {0,1,2}]   ;;  %s3990_s1 = inlined_call_operand.vmem [shape: bf16[2,16,16,128], index: 1, kind: input, shape index: {}, may-alias: {0,1,2}]   ;;  %s3991_s2 = inlined_call_operand.vmem [shape: bf16[2,16,16,128], index: 2, kind: input, shape index: {}, may-alias: {0,1,2}]   ;;  %s3992_s3 = inlined_call_operand.vmem [shape: bf16[1152,128], index: 3, kind: input, shape index: {}]   ;;  %s3993_s4 = inlined_call_operand.vmem [shape: f32[1,128], index: 4, kind: input, shape index: {}]   ;;  %s3994_s5 = inlined_call_operand.vmem [shape: f32[1,128], index: 5, kind: input, shape index: {}]   ;;  %s3995_s6 = inlined_call_operand.vmem [shape: bf16[2,16,16,128], index: 6, kind: output, shape index: {0}]   ;;  %s3996_s7 = inlined_call_operand.vmem [shape: f32[2,2,2,128], index: 7, kind: output, shape index: {1}]  }
   0x1   :  { %s3162_s26 = smov 0   ;;  %s3164_s27 = smov 0  }
   0x2   :  { %s3166_s28 = smov 0  }
   0x3 LB: > { %s27_s29 = sadd.s32 1, %s3107_s26  ;;  %s30_s30 = sadd.s32 1, %s3111_s27  ;;  %s3115_s28 = sphi %s3166_s28, %s18_s28   ;;  %s3111_s27 = sphi %s3164_s27, %s4003_s27   ;;  %s3107_s26 = sphi %s3162_s26, %s4002_s26   ;;  %s3103_s25 = sphi %s3160_s25, %s4001_s25   ;;  %s3099_s24 = sphi %s3158_s24, %s4000_s24  }
   0x4   : > { %p28_p0 = scmp.ge.s32.totalorder %s27_s29, 2  ;;  %p2404_p1 = scmp.ge.s32.totalorder %s3115_s28, 1 }
   0x5   : > { %p328_p2 = scmp.lt.s32.totalorder %s3115_s28, 5 }
   0x6   : > { %s4005_s29 = smov (%p28_p0, %s27_s29), 0  ;;  %s4007_s30 = smov (!%p28_p0, %s30_s30), %s3111_s27 }
   0x7   : > { %p329_p3 = pnand %p2404_p1, %p328_p2  ;;  %p32_p4 = scmp.ge.s32.totalorder %s4007_s30, 2 }
   0x8   : > { %v3005_v0 = vld [vmem:[%s3992_s3 + $0xc0] sm:$0xff] (!%p329_p3)   ;;  %v3009_v4 = vld [vmem:[%s3992_s3 + $0xc8] sm:$0xff] (!%p329_p3)   ;;  %s3208_s18 = sshll.u32 (!%p329_p3), %s3099_s24, 3  ;;  %p408_p5 = scmp.lt.s32.totalorder (!%p329_p3), %s3103_s25, 1  ;;  %v3013_v8 = vld [vmem:[%s3992_s3 + $0xd0] sm:$0xff] (!%p329_p3)   ;;  %v489_v15 = vlaneseq (!%p329_p3)  ;;  %v3117_v43 = vmov (!%p329_p3), 0  }
   0x9   : > { %s4009_s30 = smov (%p32_p4, %s4007_s30), 0  ;;  %332 = sbr.rel (%p329_p3) target bundleno = 445 (0x1bd), region = 44 }
   0xa   : > { %v3006_v1 = vld [vmem:[%s3992_s3 + $0x80] sm:$0xff] (!%p329_p3)   ;;  %2708 = vmatprep.subr.bf16.mxu1 (!%p329_p3), %v3005_v0  ;;  %v3010_v5 = vld [vmem:[%s3992_s3 + $0x88] sm:$0xff] (!%p329_p3)   ;;  %p424_p6 = scmp.lt.s32.totalorder (!%p329_p3), %s3208_s18, 15  ;;  %v3014_v9 = vld [vmem:[%s3992_s3 + $0x90] sm:$0xff] (!%p329_p3)   ;;  %s3243_s21 = sadd.s32 (!%p329_p3), 4294967295, %s3208_s18  ;;  %v3270_v20 = vshrl.u32 (!%p329_p3), %v489_v15, 7 }
   0xb   : > { %v3007_v2 = vld [vmem:[%s3992_s3 + $0x40] sm:$0xff] (!%p329_p3)   ;;  %2709 = vmatpush3.bf16.msra.mxu1 (!%p329_p3), %v3006_v1  ;;  %v3011_v6 = vld [vmem:[%s3992_s3 + $0x48] sm:$0xff] (!%p329_p3)   ;;  %v3015_v10 = vld [vmem:[%s3992_s3 + $0x50] sm:$0xff] (!%p329_p3)   ;;  %p406_p7 = scmp.gt.s32.totalorder (!%p329_p3), %s3243_s21, 0  ;;  %p2407_p8 = scmp.lt.s32.totalorder (!%p329_p3), %s3243_s21, 15  ;;  %v494_v22 = vstv (!%p329_p3), %s3243_s21  ;;  %vm789_vm4 = vcmask (!%p329_p3), 1040384  }
   0xc   : > { %v3008_v3 = vld [vmem:[%s3992_s3] sm:$0xff] (!%p329_p3)   ;;  %2644 = vmatprep.subr.bf16.mxu0 (!%p329_p3), %v3007_v2  ;;  %2710 = vmatprep.subr.bf16.mxu1 (!%p329_p3), %v3009_v4  ;;  %v3012_v7 = vld [vmem:[%s3992_s3 + $0x8] sm:$0xff] (!%p329_p3)   ;;  %v3016_v11 = vld [vmem:[%s3992_s3 + $0x10] sm:$0xff] (!%p329_p3)   ;;  %v495_v26 = vadd.s32 (!%p329_p3), %v494_v22, %v3270_v20  ;;  %v511_v30 = vsub.s32 (!%p329_p3), 1, %v3270_v20  ;;  %v507_v35 = vsub.s32 (!%p329_p3), 0, %v3270_v20  ;;  %s2533_s10 = sadd.s32 (!%p329_p3), 8, %s3208_s18 }
   0xd   : > { %2645 = vmatpush3.bf16.msra.mxu0 (!%p329_p3), %v3008_v3  ;;  %v3017_v12 = vld [vmem:[%s3992_s3 + $0xd8] sm:$0xff] (!%p329_p3)   ;;  %v3021_v17 = vld [vmem:[%s3992_s3 + $0xe0] sm:$0xff] (!%p329_p3)   ;;  %v3025_v23 = vld [vmem:[%s3992_s3 + $0xe8] sm:$0xff] (!%p329_p3)   ;;  %v515_v38 = vsub.s32 (!%p329_p3), 2, %v3270_v20  ;;  %v519_v39 = vsub.s32 (!%p329_p3), 3, %v3270_v20  ;;  %v491_v40 = vadd.s32 (!%p329_p3), 8, %v3270_v20 }
   0xe   : > { %2646 = vmatprep.subr.bf16.mxu0 (!%p329_p3), %v3011_v6  ;;  %v3018_v13 = vld [vmem:[%s3992_s3 + $0x98] sm:$0xff] (!%p329_p3)   ;;  %v3022_v18 = vld [vmem:[%s3992_s3 + $0xa0] sm:$0xff] (!%p329_p3)   ;;  %v3026_v24 = vld [vmem:[%s3992_s3 + $0xa8] sm:$0xff] (!%p329_p3)   ;;  %vm497_vm0 = vcmp.ge.s32.totalorder (!%p329_p3), %v495_v26, 0  ;;  %vm499_vm1 = vcmp.lt.s32.totalorder (!%p329_p3), %v495_v26, 16  ;;  %p3335_p9 = scmp.lt.s32.totalorder (!%p329_p3), %s2533_s10, 15 }
   0xf   : > { %2711 = vmatpush3.bf16.msra.mxu1 (!%p329_p3), %v3010_v5  ;;  %v3019_v14 = vld [vmem:[%s3992_s3 + $0x58] sm:$0xff] (!%p329_p3)   ;;  %v3023_v19 = vld [vmem:[%s3992_s3 + $0x60] sm:$0xff] (!%p329_p3)   ;;  %v3027_v25 = vld [vmem:[%s3992_s3 + $0x68] sm:$0xff] (!%p329_p3)   ;;  %v523_v46 = vsub.s32 (!%p329_p3), 4, %v3270_v20  ;;  %v527_v52 = vsub.s32 (!%p329_p3), 5, %v3270_v20  ;;  %v531_v53 = vsub.s32 (!%p329_p3), 6, %v3270_v20  ;;  %v3375_v61 = vadd.s32 (!%p329_p3), %v494_v22, %v491_v40 }
  0x10   : > { %s4011_s25 = smov (!%p408_p5, %s3103_s25), 1  ;;  %2712 = vmatprep.subr.bf16.mxu1 %v3013_v8  ;;  %v3020_v16 = vld [vmem:[%s3992_s3 + $0x18] sm:$0xff]   ;;  %v3024_v21 = vld [vmem:[%s3992_s3 + $0x20] sm:$0xff]   ;;  %v3028_v27 = vld [vmem:[%s3992_s3 + $0x28] sm:$0xff]   ;;  %s4015_s10 = smov (!%p3335_p9, %s2533_s10), 15  ;;  %v535_v60 = vsub.s32 7, %v3270_v20 }
  0x11   : > { %2647 = vmatpush3.bf16.msra.mxu0 %v3012_v7  ;;  %s3234_s15 = scalar_select %p424_p6, %s3208_s18, 15  ;;  %v3029_v28 = vld [vmem:[%s3992_s3 + $0xf0] sm:$0xff]   ;;  %v3033_v33 = vld [vmem:[%s3992_s3 + $0xf8] sm:$0xff]   ;;  %vm501_vm2 = vmand %vm497_vm0, %vm499_vm1  ;;  %vm790_vm5 = vsmask.f32 256  ;;  %vm933_vm8 = vcmask 1046528  }
  0x12   : > { %2648 = vmatprep.subr.bf16.mxu0 %v3015_v10  ;;  %s3249_s8 = sshll.u32 %s4011_s25, 5  ;;  %v3030_v29 = vld [vmem:[%s3992_s3 + $0xb0] sm:$0xff]   ;;  %v3034_v34 = vld [vmem:[%s3992_s3 + $0xb8] sm:$0xff]   ;;  %v3340_v44 = vsel %vm501_vm2, 1, %v3117_v43  ;;  %v3345_v45 = vld [vmem:[%s3993_s4] ss:$0 sm:$0xff] }
  0x13   : > { %2713 = vmatpush3.bf16.msra.mxu1 %v3014_v9  ;;  %s2416_s11 = sshll.u32 %s3234_s15, 1  ;;  %v3031_v31 = vld [vmem:[%s3992_s3 + $0x70] sm:$0xff]   ;;  %v3035_v36 = vld [vmem:[%s3992_s3 + $0x78] sm:$0xff]   ;;  %v512_v47 = vrot.slane %v3340_v44, %v511_v30  ;;  %v3354_v48 = vld [vmem:[%s3994_s5] ss:$0 sm:$0xff]  ;;  %v508_v51 = vrot.slane %v3340_v44, %v507_v35  ;;  %v516_v59 = vrot.slane %v3340_v44, %v515_v38  ;;  %s4017_s10 = smov (!%p3335_p9, %s4015_s10), 15  ;;  %v520_v5 = vrot.slane %v3340_v44, %v519_v39 }
  0x14   : > { %2714 = vmatprep.subr.bf16.mxu1 %v3017_v12  ;;  %s407_s15 = scalar_select %p406_p7, %s3243_s21, 0  ;;  %v3032_v32 = vld [vmem:[%s3992_s3 + $0x30] sm:$0xff]   ;;  %v3036_v49 = vld [vmem:[%s3992_s3 + $0x38] sm:$0xff]   ;;  %v3037_v58 = vld [vmem:[%s3992_s3 + $0x140] sm:$0xff]   ;;  %vm812_vm11 = vsmask.f32 7424 }
  0x15   : > { %2649 = vmatpush3.bf16.msra.mxu0 %v3016_v11  ;;  %s3280_s13 = sadd.s32 %s2416_s11, %s3249_s8  ;;  %vm546_vm3 = vcmp.ne.s32.totalorder %v512_v47, 0  ;;  %vm545_vm6 = vcmp.ne.s32.totalorder %v508_v51, 0  ;;  %s3390_s21 = sshll.u32 %s4017_s10, 1  ;;  %vm547_vm7 = vcmp.ne.s32.totalorder %v516_v59, 0  ;;  %vm548_vm9 = vcmp.ne.s32.totalorder %v520_v5, 0  ;;  %vm3410_vm10 = vmand %vm789_vm4, %vm790_vm5 }
  0x16   : > { %2650 = vmatprep.subr.bf16.mxu0 %v3019_v14  ;;  %s4013_s15 = smov (!%p2407_p8, %s407_s15), 15  ;;  %s2418_s11 = sshll.u32 %s3280_s13, 2  ;;  %v3426_v59 = vrot.slane %v3340_v44, %v527_v52  ;;  %vm498_vm0 = vcmp.ge.s32.totalorder %v3375_v61, 0  ;;  %vm500_vm1 = vcmp.lt.s32.totalorder %v3375_v61, 16 }
  0x17   : > { %2715 = vmatpush3.bf16.msra.mxu1 %v3018_v13  ;;  %s2412_s17 = sshll.u32 %s4013_s15, 1  ;;  %s3317_s14 = scalar_lea.vmem %s3990_s1, %s2418_s11  ;;  %vm502_vm2 = vmand %vm498_vm0, %vm500_vm1 }
  0x18   : > { %2716 = vmatprep.subr.bf16.mxu1 %v3021_v17  ;;  %s414_s15 = sadd.s32 %s3249_s8, %s2412_s17  ;;  %v2555_v37 = vld [vmem:[%s3317_s14] sm:$0xff]   ;;  %v2630_v2 = vld [vmem:[%s3317_s14 + $0x8] sm:$0xff]   ;;  %v2631_v10 = vld [vmem:[%s3317_s14 + $0x10] sm:$0xff]   ;;  %vm550_vm13 = vcmp.ne.s32.totalorder %v3426_v59, 0  ;;  %p462_p10 = scmp.lt.s32.totalorder %s3099_s24, 1 }
  0x19   : > { %2651 = vmatpush3.bf16.msra.mxu0 %v3020_v16  ;;  %s2414_s17 = sshll.u32 %s414_s15, 2  ;;  %v2556_v41 = vunpack.c.l.bf16 %v2555_v37  ;;  %v2557_v42 = vunpack.c.h.bf16 %v2555_v37  ;;  %v2560_v3 = vunpack.c.l.bf16 %v2630_v2  ;;  %v2561_v4 = vunpack.c.h.bf16 %v2630_v2  ;;  %s3925_s15 = scalar_lea.vmem %s3995_s6, %s2418_s11 }
  0x1a   : > { %2652 = vmatprep.subr.bf16.mxu0 %v3023_v19  ;;  %s416_s9 = scalar_lea.vmem %s3989_s0, %s2414_s17  ;;  %v2564_v13 = vunpack.c.l.bf16 %v2631_v10  ;;  %v2565_v14 = vunpack.c.h.bf16 %v2631_v10  ;;  %v3044_v10 = vld [vmem:[%s3992_s3 + $0x180] sm:$0xff]   ;;  %s4019_s24 = smov (!%p462_p10, %s3099_s24), 1 }
  0x1b   : > { %2717 = vmatpush3.bf16.msra.mxu1 %v3022_v18  ;;  %v2551_v50 = vld [vmem:[%s416_s9] sm:$0xff]   ;;  %v584_v54 = vmul.f32 %v2556_v41, %v3345_v45  ;;  %v585_v55 = vmul.f32 %v2557_v42, %v3345_v45  ;;  %v586_v11 = vmul.f32 %v2560_v3, %v3345_v45  ;;  %v587_v12 = vmul.f32 %v2561_v4, %v3345_v45  ;;  %s442_s9 = sadd.s32 %s3390_s21, %s3249_s8  ;;  %v3070_v41 = vld [vmem:[%s3992_s3 + $0x208] sm:$0xff]   ;;  %s2430_s13 = sshll.u32 %s4011_s25, 1 }
  0x1c   : > { %2718 = vmatprep.subr.bf16.mxu1 %v3025_v23  ;;  %v2552_v56 = vunpack.c.l.bf16 %v2551_v50  ;;  %v2553_v57 = vunpack.c.h.bf16 %v2551_v50  ;;  %v3042_v23 = vld [vmem:[%s3992_s3 + $0x1c0] sm:$0xff]   ;;  %v588_v26 = vmul.f32 %v2564_v13, %v3345_v45  ;;  %v3418_v50 = vrot.slane %v3340_v44, %v523_v46  ;;  %s3676_s18 = sshll.u32 %s442_s9, 2  ;;  %s465_s11 = sadd.s32 %s2430_s13, %s4019_s24 }
  0x1d   : > { %2653 = vmatpush3.bf16.msra.mxu0 %v3024_v21  ;;  %v611_v62 = vadd.f32 %v3354_v48, %v584_v54  ;;  %v612_v63 = vadd.f32 %v3354_v48, %v585_v55  ;;  %v613_v21 = vadd.f32 %v3354_v48, %v586_v11  ;;  %v614_v22 = vadd.f32 %v3354_v48, %v587_v12  ;;  %v2632_v11 = vld [vmem:[%s3317_s14 + $0x18] sm:$0xff]   ;;  %s444_s9 = scalar_lea.vmem %s3991_s2, %s3676_s18  ;;  %s2431_s20 = sshll.u32 %s465_s11, 1 }
  0x1e   : > { %2654 = vmatprep.subr.bf16.mxu0 %v3027_v25  ;;  %v582_v0 = vmul.f32 %v2552_v56, %v3345_v45  ;;  %v583_v1 = vmul.f32 %v2553_v57, %v3345_v45  ;;  %vm549_vm12 = vcmp.ne.s32.totalorder %v3418_v50, 0  ;;  %s467_s23 = scalar_lea.vmem %s3996_s7, %s2431_s20 }
  0x1f   : > { %2719 = vmatpush3.bf16.msra.mxu1 %v3026_v24  ;;  %v631_v6 = vmax.f32 %v611_v62, 0.0  ;;  %v632_v7 = vmax.f32 %v612_v63, 0.0 }
  0x20   : > { %2720 = vmatprep.subr.bf16.mxu1 %v3029_v28  ;;  %v609_v8 = vadd.f32 %v3354_v48, %v582_v0  ;;  %v610_v9 = vadd.f32 %v3354_v48, %v583_v1 }
  0x21   : > { %2655 = vmatpush3.bf16.msra.mxu0 %v3028_v27  ;;  %v671_v15 = vsel %vm546_vm3, %v631_v6, 0.0  ;;  %v672_v16 = vsel %vm546_vm3, %v632_v7, 0.0  ;;  %v589_v27 = vmul.f32 %v2565_v14, %v3345_v45 }
  0x22   : > { %2656 = vmatprep.subr.bf16.mxu0 %v3031_v31  ;;  %v629_v17 = vmax.f32 %v609_v8, 0.0  ;;  %v630_v18 = vmax.f32 %v610_v9, 0.0  ;;  %v690_v19 = vpack.c.bf16 %v672_v16, %v671_v15 }
  0x23   : > { %2721 = vmatpush3.bf16.msra.mxu1 %v3030_v29 }
  0x24   : > { %2722 = vmatprep.subr.bf16.mxu1 %v3033_v33  ;;  %v669_v24 = vsel %vm545_vm6, %v629_v17, 0.0  ;;  %v670_v25 = vsel %vm545_vm6, %v630_v18, 0.0  ;;  %v707_v28 = vshrl.u32 %v690_v19, 16  ;;  %v710_v29 = vshll.u32 %v690_v19, 16  ;;  %v3046_v19 = vld [vmem:[%s3992_s3 + $0x1c8] sm:$0xff]  }
  0x25   : > { %2657 = vmatpush3.bf16.msra.mxu0 %v3032_v32  ;;  %v689_v31 = vpack.c.bf16 %v670_v25, %v669_v24  ;;  %v633_v32 = vmax.f32 %v613_v21, 0.0  ;;  %v634_v33 = vmax.f32 %v614_v22, 0.0  ;;  %v3038_v25 = vld [vmem:[%s3992_s3 + $0x100] sm:$0xff]  }
  0x26   : > { %2658 = vmatprep.subr.bf16.mxu0 %v3035_v36  ;;  %v616_v36 = vadd.f32 %v3354_v48, %v589_v27  ;;  %v709_v37 = vrot.slane %v707_v28, 7  ;;  %v2568_v28 = vunpack.c.l.bf16 %v2632_v11 }
  0x27   : > { %2723 = vmatpush3.bf16.msra.mxu1 %v3034_v34  ;;  %v615_v34 = vadd.f32 %v3354_v48, %v588_v26  ;;  %v700_v38 = vshrl.u32 %v689_v31, 16  ;;  %v703_v39 = vshll.u32 %v689_v31, 16  ;;  %v673_v40 = vsel %vm547_vm7, %v633_v32, 0.0  ;;  %v3048_v31 = vld [vmem:[%s3992_s3 + $0x188] sm:$0xff]  }
  0x28   : > { %2836 = vmatprep.subr.bf16.mxu1 %v3042_v23  ;;  %v674_v42 = vsel %vm547_vm7, %v634_v33, 0.0  ;;  %v712_v51 = vor.u32 %v710_v29, %v709_v37  ;;  %v803_v56 = vsel %vm3410_vm10, %v709_v37, 0  ;;  %v2569_v29 = vunpack.c.h.bf16 %v2632_v11  ;;  %v3039_v33 = vld [vmem:[%s3992_s3 + $0x148] sm:$0xff]   ;;  %v3054_v11 = vld [vmem:[%s3992_s3 + $0x1d8] sm:$0xff]  }
  0x29   : > { %2659 = vmatpush3.bf16.msra.mxu0 %v3036_v49  ;;  %v635_v47 = vmax.f32 %v615_v34, 0.0  ;;  %v636_v49 = vmax.f32 %v616_v36, 0.0  ;;  %v702_v54 = vrot.slane %v700_v38, 7  ;;  %v691_v55 = vpack.c.bf16 %v674_v42, %v673_v40  ;;  %v2633_v38 = vld [vmem:[%s3317_s14 + $0x20] sm:$0xff]  }
  0x2a   : > { %2772 = vmatprep.subr.bf16.mxu0 %v3037_v58  ;;  %v938_v57 = vrot.slane %v803_v56, 1  ;;  %v833_v58 = vshll.u32 %v803_v56, 16  ;;  %v3430_v46 = vsel %vm3410_vm10, 0, %v712_v51 }
  0x2b   : > { %v675_v62 = vsel %vm548_vm9, %v635_v47, 0.0  ;;  %v705_v63 = vor.u32 %v703_v39, %v702_v54  ;;  %v802_v0 = vsel %vm3410_vm10, %v702_v54, 0  ;;  %v714_v1 = vshrl.u32 %v691_v55, 16  ;;  %1709 = vmatprep.mubr.bf16.mxu1 %v3430_v46 }
  0x2c   : > { %v935_v2 = vrot.slane %v802_v0, 1  ;;  %v821_v3 = vshll.u32 %v802_v0, 16  ;;  %v717_v4 = vshll.u32 %v691_v55, 16  ;;  %v676_v6 = vsel %vm548_vm9, %v636_v49, 0.0  ;;  %v3050_v49 = vld [vmem:[%s3992_s3 + $0x1d0] sm:$0xff]  }
  0x2d   : > { %v792_v52 = vsel %vm3410_vm10, 0, %v705_v63  ;;  %v716_v7 = vrot.slane %v714_v1, 7  ;;  %v826_v8 = vshrl.u32 %v3430_v46, 16  ;;  %v828_v9 = vshll.u32 %v3430_v46, 16 }
  0x2e   : > { %v934_v12 = vrot.slane %v792_v52, 1  ;;  %v814_v13 = vshrl.u32 %v792_v52, 16  ;;  %v816_v14 = vshll.u32 %v792_v52, 16  ;;  %v937_v15 = vrot.slane %v3430_v46, 1 }
  0x2f   : > { %v823_v5 = vrot.slane %v821_v3, 1  ;;  %v719_v16 = vor.u32 %v717_v4, %v716_v7  ;;  %v830_v17 = vrot.slane %v828_v9, 1  ;;  %v835_v18 = vrot.slane %v833_v58, 1  ;;  %v3041_v3 = vld [vmem:[%s3992_s3 + $0x150] sm:$0xff]  }
  0x30   : > { %v936_v21 = vsel %vm933_vm8, %v934_v12, %v935_v2  ;;  %v818_v22 = vrot.slane %v816_v14, 1  ;;  %v692_v23 = vpack.c.bf16 %v676_v6, %v675_v62  ;;  %v3451_v24 = vsel %vm3410_vm10, %v716_v7, 0  ;;  %v3052_v7 = vld [vmem:[%s3992_s3 + $0x190] sm:$0xff]  }
  0x31   : > { %1710 = vmatmul.mubr.bf16.vlgmr.msra.gmra.mrb[0].mxu1 %v936_v21  ;;  %v3458_v26 = vsel %vm3410_vm10, 0, %v719_v16  ;;  %v831_v27 = vor.u32 %v830_v17, %v826_v8  ;;  %v845_v37 = vshll.u32 %v3451_v24, 16  ;;  %v3470_v39 = vsel %vm933_vm8, %v937_v15, %v938_v57  ;;  %v3040_v57 = vld [vmem:[%s3992_s3 + $0x108] sm:$0xff]   ;;  %v3043_v15 = vld [vmem:[%s3992_s3 + $0x110] sm:$0xff]  }
  0x32   : > { %v819_v32 = vor.u32 %v818_v22, %v814_v13  ;;  %1717 = vmatprep.mubr.bf16.mxu1 %v3458_v26  ;;  %v721_v34 = vshrl.u32 %v692_v23, 16  ;;  %v724_v36 = vshll.u32 %v692_v23, 16  ;;  %2837 = vmatpush3.bf16.msra.mxu1 %v3044_v10  ;;  %v941_v40 = vrot.slane %v3451_v24, 1  ;;  %v2634_v10 = vld [vmem:[%s3317_s14 + $0x28] sm:$0xff]   ;;  %v3045_v23 = vld [vmem:[%s3992_s3 + $0x158] sm:$0xff]  }
  0x33   : > { %v838_v42 = vshrl.u32 %v3458_v26, 16  ;;  %v840_v47 = vshll.u32 %v3458_v26, 16  ;;  %2838 = vmatprep.subr.bf16.mxu1 %v3046_v19  ;;  %v3480_v54 = vsel %vm812_vm11, %v831_v27, %v835_v18  ;;  %v940_v56 = vrot.slane %v3458_v26, 1  ;;  %v3056_v27 = vld [vmem:[%s3992_s3 + $0x198] sm:$0xff]  }
  0x34   : > { %v824_v51 = vsel %vm812_vm11, %v819_v32, %v823_v5  ;;  %v723_v55 = vrot.slane %v721_v34, 7  ;;  %v590_v62 = vmul.f32 %v2568_v28, %v3345_v45  ;;  %v591_v63 = vmul.f32 %v2569_v29, %v3345_v45 }
  0x35   : > { %1612 = vmatprep.mubr.bf16.mxu0 %v824_v51  ;;  %v842_v58 = vrot.slane %v840_v47, 1  ;;  %v2572_v0 = vunpack.c.l.bf16 %v2633_v38  ;;  %v847_v2 = vrot.slane %v845_v37, 1  ;;  %v2573_v6 = vunpack.c.h.bf16 %v2633_v38  ;;  %v2635_v38 = vld [vmem:[%s3317_s14 + $0x30] sm:$0xff]  }
  0x36   : > { %1613 = vmatmul.mubr.bf16.vlgmr.msra.gmra.mrb[0].mxu0 %v792_v52  ;;  %v726_v1 = vor.u32 %v724_v36, %v723_v55  ;;  %v3493_v4 = vsel %vm3410_vm10, %v723_v55, 0  ;;  %2839 = vmatpush3.bf16.msra.mxu1 %v3048_v31  ;;  %v617_v8 = vadd.f32 %v3354_v48, %v590_v62  ;;  %v618_v9 = vadd.f32 %v3354_v48, %v591_v63 }
  0x37   : > { %2773 = vmatpush3.bf16.msra.mxu0 %v3038_v25  ;;  %1620 = vmatprep.mubr.bf16.mxu0 %v3480_v54  ;;  %v843_v52 = vor.u32 %v842_v58, %v838_v42  ;;  %v592_v13 = vmul.f32 %v2572_v0, %v3345_v45  ;;  %v593_v14 = vmul.f32 %v2573_v6, %v3345_v45  ;;  %v944_v17 = vrot.slane %v3493_v4, 1  ;;  %v3057_v42 = vld [vmem:[%s3992_s3 + $0x1e0] sm:$0xff]  }
  0x38   : > { %2774 = vmatprep.subr.bf16.mxu0 %v3039_v33  ;;  %v3508_v12 = vsel %vm3410_vm10, 0, %v726_v1  ;;  %2840 = vmatprep.subr.bf16.mxu1 %v3050_v49  ;;  %v637_v5 = vmax.f32 %v617_v8, 0.0  ;;  %v638_v16 = vmax.f32 %v618_v9, 0.0  ;;  %v857_v18 = vshll.u32 %v3493_v4, 16  ;;  %v3047_v49 = vld [vmem:[%s3992_s3 + $0x118] sm:$0xff]   ;;  %v3058_v0 = vld [vmem:[%s3992_s3 + $0x1a0] sm:$0xff]  }
  0x39   : > { %1718 = vmatmul.mubr.bf16.gmra.mrb[4].mxu1 %v3470_v39  ;;  %v943_v19 = vrot.slane %v3508_v12, 1  ;;  %v850_v21 = vshrl.u32 %v3508_v12, 16  ;;  %v852_v22 = vshll.u32 %v3508_v12, 16  ;;  %v619_v25 = vadd.f32 %v3354_v48, %v592_v13 }
  0x3a   : > { %1725 = vmatprep.mubr.bf16.mxu1 %v3508_v12  ;;  %2841 = vmatpush3.bf16.msra.mxu1 %v3052_v7  ;;  %v3531_v28 = vsel %vm812_vm11, %v843_v52, %v847_v2  ;;  %v677_v29 = vsel %vm549_vm12, %v637_v5, 0.0  ;;  %v678_v31 = vsel %vm549_vm12, %v638_v16, 0.0  ;;  %v620_v32 = vadd.f32 %v3354_v48, %v593_v14  ;;  %v3062_v14 = vld [vmem:[%s3992_s3 + $0x1a8] sm:$0xff]  }
  0x3b   : > { %2775 = vmatpush3.bf16.msra.mxu0 %v3040_v57  ;;  %2842 = vmatprep.subr.bf16.mxu1 %v3054_v11  ;;  %v693_v33 = vpack.c.bf16 %v678_v31, %v677_v29  ;;  %v854_v34 = vrot.slane %v852_v22, 1  ;;  %v639_v36 = vmax.f32 %v619_v25, 0.0  ;;  %v2576_v37 = vunpack.c.l.bf16 %v2634_v10  ;;  %v3053_v22 = vld [vmem:[%s3992_s3 + $0x168] sm:$0xff]  }
  0x3c   : > { %2776 = vmatprep.subr.bf16.mxu0 %v3041_v3  ;;  %v859_v47 = vrot.slane %v857_v18, 1  ;;  %v640_v50 = vmax.f32 %v620_v32, 0.0  ;;  %v2577_v51 = vunpack.c.h.bf16 %v2634_v10  ;;  %v532_v55 = vrot.slane %v3340_v44, %v531_v53  ;;  %v3049_v3 = vld [vmem:[%s3992_s3 + $0x160] sm:$0xff]  }
  0x3d   : > { %v3554_v57 = vsel %vm933_vm8, %v940_v56, %v941_v40  ;;  %v728_v58 = vshrl.u32 %v693_v33, 16  ;;  %v731_v62 = vshll.u32 %v693_v33, 16  ;;  %v679_v63 = vsel %vm550_vm13, %v639_v36, 0.0  ;;  %v3061_v56 = vld [vmem:[%s3992_s3 + $0x1e8] sm:$0xff]  }
  0x3e   : > { %1621 = vmatmul.mubr.bf16.gmra.mrb[4].mxu0 %v3430_v46  ;;  %2843 = vmatpush3.bf16.msra.mxu1 %v3056_v27  ;;  %v855_v53 = vor.u32 %v854_v34, %v850_v21  ;;  %v680_v46 = vsel %vm550_vm13, %v640_v50, 0.0  ;;  %v594_v24 = vmul.f32 %v2576_v37, %v3345_v45  ;;  %v595_v40 = vmul.f32 %v2577_v51, %v3345_v45  ;;  %v3063_v27 = vld [vmem:[%s3992_s3 + $0x1f0] sm:$0xff]   ;;  %v3055_v34 = vld [vmem:[%s3992_s3 + $0x128] sm:$0xff]   ;;  %v3067_v50 = vld [vmem:[%s3992_s3 + $0x1f8] sm:$0xff]  }
  0x3f   : > { %1628 = vmatprep.mubr.bf16.mxu0 %v3531_v28  ;;  %2777 = vmatpush3.bf16.msra.mxu0 %v3043_v15  ;;  %v730_v1 = vrot.slane %v728_v58, 7  ;;  %v694_v2 = vpack.c.bf16 %v680_v46, %v679_v63  ;;  %v2580_v6 = vunpack.c.l.bf16 %v2635_v38  ;;  %v2581_v7 = vunpack.c.h.bf16 %v2635_v38 }
  0x40   : > { %2778 = vmatprep.subr.bf16.mxu0 %v3045_v23  ;;  %2844 = vmatprep.subr.bf16.mxu1 %v3057_v42  ;;  %vm551_vm14 = vcmp.ne.s32.totalorder %v532_v55, 0  ;;  %v621_v59 = vadd.f32 %v3354_v48, %v594_v24  ;;  %v622_v52 = vadd.f32 %v3354_v48, %v595_v40  ;;  %v3578_v8 = vrot.slane %v3340_v44, %v535_v60  ;;  %v3051_v44 = vld [vmem:[%s3992_s3 + $0x120] sm:$0xff]   ;;  %v3060_v24 = vld [vmem:[%s3992_s3 + $0x130] sm:$0xff]   ;;  %v2636_v40 = vld [vmem:[%s3317_s14 + $0x38] sm:$0xff]  }
  0x41   : > { %1726 = vmatmul.mubr.bf16.gmra.mrb[8].mxu1 %v3554_v57  ;;  %v733_v9 = vor.u32 %v731_v62, %v730_v1  ;;  %v735_v10 = vshrl.u32 %v694_v2, 16  ;;  %v738_v11 = vshll.u32 %v694_v2, 16  ;;  %v3582_v13 = vsel %vm3410_vm10, %v730_v1, 0 }
  0x42   : > { %2845 = vmatpush3.bf16.msra.mxu1 %v3058_v0  ;;  %v3588_v15 = vsel %vm812_vm11, %v855_v53, %v859_v47  ;;  %v869_v5 = vshll.u32 %v3582_v13, 16  ;;  %v641_v60 = vmax.f32 %v621_v59, 0.0  ;;  %v642_v16 = vmax.f32 %v622_v52, 0.0 }
  0x43   : > { %2779 = vmatpush3.bf16.msra.mxu0 %v3047_v49  ;;  %2846 = vmatprep.subr.bf16.mxu1 %v3061_v56  ;;  %v3596_v18 = vsel %vm3410_vm10, 0, %v733_v9  ;;  %v737_v21 = vrot.slane %v735_v10, 7  ;;  %v596_v23 = vmul.f32 %v2580_v6, %v3345_v45  ;;  %v597_v25 = vmul.f32 %v2581_v7, %v3345_v45 }
  0x44   : > { %2780 = vmatprep.subr.bf16.mxu0 %v3049_v3  ;;  %1733 = vmatprep.mubr.bf16.mxu1 %v3596_v18  ;;  %v3612_v29 = vsel %vm933_vm8, %v943_v19, %v944_v17  ;;  %v947_v31 = vrot.slane %v3582_v13, 1  ;;  %v862_v32 = vshrl.u32 %v3596_v18, 16  ;;  %v864_v33 = vshll.u32 %v3596_v18, 16  ;;  %v3059_v17 = vld [vmem:[%s3992_s3 + $0x170] sm:$0xff]   ;;  %v3068_v3 = vld [vmem:[%s3992_s3 + $0x1b8] sm:$0xff]  }
  0x45   : > { %v740_v36 = vor.u32 %v738_v11, %v737_v21  ;;  %v681_v4 = vsel %vm551_vm14, %v641_v60, 0.0  ;;  %v682_v37 = vsel %vm551_vm14, %v642_v16, 0.0  ;;  %vm552_vm15 = vcmp.ne.s32.totalorder %v3578_v8, 0  ;;  %v3064_v19 = vld [vmem:[%s3992_s3 + $0x1b0] sm:$0xff]   ;;  %v3065_v13 = vld [vmem:[%s3992_s3 + $0x178] sm:$0xff]  }
  0x46   : > { %1629 = vmatmul.mubr.bf16.gmra.mrb[8].mxu0 %v3458_v26  ;;  %2847 = vmatpush3.bf16.msra.mxu1 %v3062_v14  ;;  %v946_v38 = vrot.slane %v3596_v18, 1  ;;  %v866_v42 = vrot.slane %v864_v33, 1  ;;  %v871_v47 = vrot.slane %v869_v5, 1  ;;  %v695_v49 = vpack.c.bf16 %v682_v37, %v681_v4  ;;  %v3668_v14 = vld [vmem:[%s3992_s3 + $0x200] sm:$0xff]  }
  0x47   : > { %1636 = vmatprep.mubr.bf16.mxu0 %v3588_v15  ;;  %2781 = vmatpush3.bf16.msra.mxu0 %v3051_v44  ;;  %v3637_v51 = vsel %vm3410_vm10, 0, %v740_v36  ;;  %v3641_v55 = vsel %vm3410_vm10, %v737_v21, 0  ;;  %v623_v58 = vadd.f32 %v3354_v48, %v596_v23  ;;  %v624_v62 = vadd.f32 %v3354_v48, %v597_v25 }
  0x48   : > { %2782 = vmatprep.subr.bf16.mxu0 %v3053_v22  ;;  %2848 = vmatprep.subr.bf16.mxu1 %v3063_v27  ;;  %v867_v63 = vor.u32 %v866_v42, %v862_v32  ;;  %v742_v0 = vshrl.u32 %v695_v49, 16  ;;  %v745_v53 = vshll.u32 %v695_v49, 16  ;;  %v881_v46 = vshll.u32 %v3641_v55, 16  ;;  %v3066_v22 = vld [vmem:[%s3992_s3 + $0x138] sm:$0xff]  }
  0x49   : > { %1734 = vmatmul.mubr.bf16.gmra.mrb[12].mxu1 %v3612_v29  ;;  %v874_v56 = vshrl.u32 %v3637_v51, 16  ;;  %v876_v1 = vshll.u32 %v3637_v51, 16  ;;  %v643_v2 = vmax.f32 %v623_v58, 0.0  ;;  %v644_v59 = vmax.f32 %v624_v62, 0.0  ;;  %v2587_v58 = vld [vmem:[%s444_s9] sm:$0xff]  }
  0x4a   : > { %1741 = vmatprep.mubr.bf16.mxu1 %v3637_v51  ;;  %2849 = vmatpush3.bf16.msra.mxu1 %v3064_v19  ;;  %v3658_v6 = vsel %vm812_vm11, %v867_v63, %v871_v47  ;;  %v744_v7 = vrot.slane %v742_v0, 7  ;;  %v2584_v10 = vunpack.c.l.bf16 %v2636_v40  ;;  %v2585_v11 = vunpack.c.h.bf16 %v2636_v40 }
  0x4b   : > { %2783 = vmatpush3.bf16.msra.mxu0 %v3055_v34  ;;  %2850 = vmatprep.subr.bf16.mxu1 %v3067_v50  ;;  %v878_v52 = vrot.slane %v876_v1, 1  ;;  %v683_v9 = vsel %vm552_vm15, %v643_v2, 0.0  ;;  %v684_v44 = vsel %vm552_vm15, %v644_v59, 0.0  ;;  %v3680_v60 = vsel %vm933_vm8, %v946_v38, %v947_v31 }
  0x4c   : > { %2784 = vmatprep.subr.bf16.mxu0 %v3059_v17  ;;  %v747_v5 = vor.u32 %v745_v53, %v744_v7  ;;  %v950_v16 = vrot.slane %v3641_v55, 1  ;;  %v696_v21 = vpack.c.bf16 %v684_v44, %v683_v9  ;;  %v598_v23 = vmul.f32 %v2584_v10, %v3345_v45 }
  0x4d   : > { %v599_v25 = vmul.f32 %v2585_v11, %v3345_v45  ;;  %v879_v27 = vor.u32 %v878_v52, %v874_v56  ;;  %v883_v31 = vrot.slane %v881_v46, 1  ;;  %v949_v34 = vrot.slane %v3637_v51, 1 }
  0x4e   : > { %1637 = vmatmul.mubr.bf16.gmra.mrb[12].mxu0 %v3508_v12  ;;  %2851 = vmatpush3.bf16.msra.mxu1 %v3068_v3  ;;  %v3689_v8 = vsel %vm3410_vm10, 0, %v747_v5  ;;  %v749_v32 = vshrl.u32 %v696_v21, 16  ;;  %v752_v33 = vshll.u32 %v696_v21, 16  ;;  %v808_v36 = vsel %vm3410_vm10, %v744_v7, 0 }
  0x4f   : > { %1644 = vmatprep.mubr.bf16.mxu0 %v3658_v6  ;;  %2785 = vmatpush3.bf16.msra.mxu0 %v3060_v24  ;;  %v888_v4 = vshll.u32 %v3689_v8, 16  ;;  %v504_v37 = vsel %vm502_vm2, 1, %v3117_v43  ;;  %v893_v17 = vshll.u32 %v808_v36, 16  ;;  %v625_v38 = vadd.f32 %v3354_v48, %v598_v23 }
  0x50   : > { %2786 = vmatprep.subr.bf16.mxu0 %v3065_v13  ;;  %2948 = vmatprep.subr.bf16.mxu1 %v3668_v14  ;;  %v751_v61 = vrot.slane %v749_v32, 7  ;;  %v540_v19 = vrot.slane %v504_v37, %v507_v35  ;;  %v886_v42 = vshrl.u32 %v3689_v8, 16  ;;  %v626_v49 = vadd.f32 %v3354_v48, %v599_v25 }
  0x51   : > { %1742 = vmatmul.mubr.bf16.gmra.mrb[16].mxu1 %v3680_v60  ;;  %v890_v47 = vrot.slane %v888_v4, 1  ;;  %v3714_v43 = vsel %vm812_vm11, %v879_v27, %v883_v31  ;;  %v645_v55 = vmax.f32 %v625_v38, 0.0  ;;  %v3719_v35 = vsel %vm933_vm8, %v949_v34, %v950_v16 }
  0x52   : > { %1749 = vmatprep.mubr.bf16.mxu1 %v3689_v8  ;;  %v754_v50 = vor.u32 %v752_v33, %v751_v61  ;;  %vm553_vm3 = vcmp.ne.s32.totalorder %v540_v19, 0  ;;  %v646_v62 = vmax.f32 %v626_v49, 0.0  ;;  %v2588_v0 = vunpack.c.l.bf16 %v2587_v58 }
  0x53   : > { %2787 = vmatpush3.bf16.msra.mxu0 %v3066_v22  ;;  %v685_v63 = vsel %vm553_vm3, %v645_v55, 0.0  ;;  %v2589_v53 = vunpack.c.h.bf16 %v2587_v58  ;;  %v891_v24 = vor.u32 %v890_v47, %v886_v42  ;;  %v895_v40 = vrot.slane %v893_v17, 1 }
  0x54   : > { %2916 = vmatprep.subr.bf16.mxu0 %v3668_v14  ;;  %v3724_v46 = vsel %vm3410_vm10, 0, %v754_v50  ;;  %v686_v56 = vsel %vm553_vm3, %v646_v62, 0.0  ;;  %v544_v3 = vrot.slane %v504_v37, %v511_v30  ;;  %v953_v7 = vrot.slane %v808_v36, 1 }
  0x55   : > { %v697_v1 = vpack.c.bf16 %v686_v56, %v685_v63  ;;  %v900_v2 = vshll.u32 %v3724_v46, 16  ;;  %v600_v59 = vmul.f32 %v2588_v0, %v3345_v45  ;;  %v601_v52 = vmul.f32 %v2589_v53, %v3345_v45 }
  0x56   : > { %1645 = vmatmul.mubr.bf16.gmra.mrb[16].mxu0 %v3596_v18  ;;  %v952_v9 = vrot.slane %v3689_v8, 1  ;;  %v809_v13 = vsel %vm3410_vm10, %v751_v61, 0  ;;  %v3737_v5 = vsel %vm812_vm11, %v891_v24, %v895_v40  ;;  %v898_v45 = vshrl.u32 %v3724_v46, 16 }
  0x57   : > { %1652 = vmatprep.mubr.bf16.mxu0 %v3714_v43  ;;  %v756_v10 = vshrl.u32 %v697_v1, 16  ;;  %v759_v11 = vshll.u32 %v697_v1, 16  ;;  %v905_v20 = vshll.u32 %v809_v13, 16  ;;  %v627_v30 = vadd.f32 %v3354_v48, %v600_v59 }
  0x58   : > { %v628_v44 = vadd.f32 %v3354_v48, %v601_v52  ;;  %v902_v21 = vrot.slane %v900_v2, 1  ;;  %vm554_vm5 = vcmp.ne.s32.totalorder %v544_v3, 0  ;;  %v3744_v25 = vsel %vm933_vm8, %v952_v9, %v953_v7 }
  0x59   : > { %1750 = vmatmul.mubr.bf16.gmra.mrb[20].mxu1 %v3719_v35  ;;  %v758_v16 = vrot.slane %v756_v10, 7  ;;  %v647_v22 = vmax.f32 %v627_v30, 0.0  ;;  %v907_v37 = vrot.slane %v905_v20, 1  ;;  %v955_v42 = vrot.slane %v3724_v46, 1 }
  0x5a   : > { %1757 = vmatprep.mubr.bf16.mxu1 %v3724_v46  ;;  %v648_v23 = vmax.f32 %v628_v44, 0.0  ;;  %v903_v4 = vor.u32 %v902_v21, %v898_v45  ;;  %v956_v47 = vrot.slane %v809_v13, 1  ;;  %v3071_v44 = vld [vmem:[%s3992_s3 + $0x210] sm:$0xff]  }
  0x5b   : > { %v761_v27 = vor.u32 %v759_v11, %v758_v16  ;;  %v810_v31 = vsel %vm3410_vm10, %v758_v16, 0  ;;  %v687_v48 = vsel %vm554_vm5, %v647_v22, 0.0 }
  0x5c   : > { %v974_v32 = vshll.u32 %v810_v31, 16  ;;  %v688_v33 = vsel %vm554_vm5, %v648_v23, 0.0  ;;  %v982_v34 = vrot.slane %v810_v31, 1  ;;  %v3763_v63 = vsel %vm812_vm11, %v903_v4, %v907_v37 }
  0x5d   : > { %v3751_v36 = vsel %vm3410_vm10, 0, %v761_v27  ;;  %v698_v61 = vpack.c.bf16 %v688_v33, %v687_v48  ;;  %v3767_v24 = vsel %vm933_vm8, %v955_v42, %v956_v47 }
  0x5e   : > { %1653 = vmatmul.mubr.bf16.gmra.mrb[20].mxu0 %v3637_v51  ;;  %v967_v17 = vshrl.u32 %v3751_v36, 16  ;;  %v969_v19 = vshll.u32 %v3751_v36, 16  ;;  %v981_v38 = vrot.slane %v3751_v36, 1  ;;  %v976_v58 = vrot.slane %v974_v32, 1 }
  0x5f   : > { %1660 = vmatprep.mubr.bf16.mxu0 %v3737_v5  ;;  %v763_v49 = vshrl.u32 %v698_v61, 16  ;;  %v766_v50 = vshll.u32 %v698_v61, 16 }
  0x60   : > { %v971_v55 = vrot.slane %v969_v19, 1  ;;  %v3760_v62 = vsel %vm933_vm8, %v981_v38, %v982_v34 }
  0x61   : > { %1758 = vmatmul.mubr.bf16.gmra.mrb[24].mxu1 %v3744_v25  ;;  %v765_v0 = vrot.slane %v763_v49, 7 }
  0x62   : > { %1765 = vmatprep.mubr.bf16.mxu1 %v3751_v36  ;;  %v972_v53 = vor.u32 %v971_v55, %v967_v17 }
  0x63   : > { %v768_v40 = vor.u32 %v766_v50, %v765_v0  ;;  %v811_v56 = vsel %vm3410_vm10, %v765_v0, 0 }
  0x64   : > { %v3773_v1 = vsel %vm812_vm11, %v972_v53, %v976_v58  ;;  %v993_v2 = vshll.u32 %v811_v56, 16  ;;  %v1001_v3 = vrot.slane %v811_v56, 1 }
  0x65   : > { %v3777_v7 = vsel %vm3410_vm10, 0, %v768_v40 }
  0x66   : > { %1661 = vmatmul.mubr.bf16.gmra.mrb[24].mxu0 %v3689_v8  ;;  %v986_v59 = vshrl.u32 %v3777_v7, 16  ;;  %v988_v52 = vshll.u32 %v3777_v7, 16  ;;  %v1000_v9 = vrot.slane %v3777_v7, 1  ;;  %v995_v11 = vrot.slane %v993_v2, 1 }
  0x67   : > { %1668 = vmatprep.mubr.bf16.mxu0 %v3763_v63 }
  0x68   : > { %v990_v10 = vrot.slane %v988_v52, 1  ;;  %v3785_v13 = vsel %vm933_vm8, %v1000_v9, %v1001_v3 }
  0x69   : > { %1766 = vmatmul.mubr.bf16.gmra.mrb[28].mxu1 %v3767_v24 }
  0x6a   : > { %1903 = vmatprep.mubr.bf16.mxu1 %v3531_v28  ;;  %v991_v20 = vor.u32 %v990_v10, %v986_v59 }
  0x6c   : > { %v996_v30 = vsel %vm812_vm11, %v991_v20, %v995_v11 }
  0x6e   : > { %1669 = vmatmul.mubr.bf16.gmra.mrb[28].mxu0 %v3724_v46 }
  0x6f   : > { %1806 = vmatprep.mubr.bf16.mxu0 %v3470_v39  ;;  %v3073_v39 = vld [vmem:[%s3992_s3 + $0x220] sm:$0xff]  }
  0x71   : > { %1904 = vmatmul.mubr.bf16.vlgmr.msra.gmra.mrb[32].mxu1 %v3458_v26  ;;  %v3072_v26 = vld [vmem:[%s3992_s3 + $0x218] sm:$0xff]  }
  0x72   : > { %1911 = vmatprep.mubr.bf16.mxu1 %v3588_v15  ;;  %2956 = vmatpush3.bf16.msra.mxu1 %v3668_v14 }
  0x73   : > { %2949 = vmatprep.subr.bf16.mxu1 %v3070_v41 }
  0x76   : > { %1807 = vmatmul.mubr.bf16.vlgmr.msra.gmra.mrb[32].mxu0 %v3480_v54  ;;  %2957 = vmatpush3.bf16.msra.mxu1 %v3070_v41  ;;  %v3074_v54 = vld [vmem:[%s3992_s3 + $0x228] sm:$0xff]  }
  0x77   : > { %2917 = vmatpush3.bf16.msra.mxu0 %v3668_v14  ;;  %1814 = vmatprep.mubr.bf16.mxu0 %v3554_v57 }
  0x78   : > { %2918 = vmatprep.subr.bf16.mxu0 %v3070_v41  ;;  %2950 = vmatprep.subr.bf16.mxu1 %v3071_v44 }
  0x79   : > { %1912 = vmatmul.mubr.bf16.gmra.mrb[36].mxu1 %v3508_v12  ;;  %v3075_v12 = vld [vmem:[%s3992_s3 + $0x230] sm:$0xff]  }
  0x7a   : > { %1919 = vmatprep.mubr.bf16.mxu1 %v3658_v6  ;;  %2958 = vmatpush3.bf16.msra.mxu1 %v3071_v44 }
  0x7b   : > { %2919 = vmatpush3.bf16.msra.mxu0 %v3070_v41  ;;  %2951 = vmatprep.subr.bf16.mxu1 %v3072_v26 }
  0x7c   : > { %2920 = vmatprep.subr.bf16.mxu0 %v3071_v44 }
  0x7e   : > { %1815 = vmatmul.mubr.bf16.gmra.mrb[36].mxu0 %v3531_v28  ;;  %2959 = vmatpush3.bf16.msra.mxu1 %v3072_v26  ;;  %v3076_v28 = vld [vmem:[%s3992_s3 + $0x238] sm:$0xff]  }
  0x7f   : > { %1822 = vmatprep.mubr.bf16.mxu0 %v3612_v29  ;;  %2921 = vmatpush3.bf16.msra.mxu0 %v3071_v44 }
  0x80   : > { %2922 = vmatprep.subr.bf16.mxu0 %v3072_v26  ;;  %2952 = vmatprep.subr.bf16.mxu1 %v3073_v39 }
  0x81   : > { %1920 = vmatmul.mubr.bf16.gmra.mrb[40].mxu1 %v3596_v18 }
  0x82   : > { %1927 = vmatprep.mubr.bf16.mxu1 %v3714_v43  ;;  %2960 = vmatpush3.bf16.msra.mxu1 %v3073_v39 }
  0x83   : > { %2923 = vmatpush3.bf16.msra.mxu0 %v3072_v26  ;;  %2953 = vmatprep.subr.bf16.mxu1 %v3074_v54 }
  0x84   : > { %2924 = vmatprep.subr.bf16.mxu0 %v3073_v39 }
  0x86   : > { %1823 = vmatmul.mubr.bf16.gmra.mrb[40].mxu0 %v3588_v15  ;;  %2961 = vmatpush3.bf16.msra.mxu1 %v3074_v54 }
  0x87   : > { %1830 = vmatprep.mubr.bf16.mxu0 %v3680_v60  ;;  %2925 = vmatpush3.bf16.msra.mxu0 %v3073_v39 }
  0x88   : > { %2926 = vmatprep.subr.bf16.mxu0 %v3074_v54  ;;  %2954 = vmatprep.subr.bf16.mxu1 %v3075_v12 }
  0x89   : > { %1928 = vmatmul.mubr.bf16.gmra.mrb[44].mxu1 %v3637_v51 }
  0x8a   : > { %1935 = vmatprep.mubr.bf16.mxu1 %v3737_v5  ;;  %2962 = vmatpush3.bf16.msra.mxu1 %v3075_v12 }
  0x8b   : > { %2927 = vmatpush3.bf16.msra.mxu0 %v3074_v54  ;;  %2955 = vmatprep.subr.bf16.mxu1 %v3076_v28 }
  0x8c   : > { %2928 = vmatprep.subr.bf16.mxu0 %v3075_v12 }
  0x8e   : > { %1831 = vmatmul.mubr.bf16.gmra.mrb[44].mxu0 %v3658_v6  ;;  %2963 = vmatpush3.bf16.msra.mxu1 %v3076_v28 }
  0x8f   : > { %1838 = vmatprep.mubr.bf16.mxu0 %v3719_v35  ;;  %2929 = vmatpush3.bf16.msra.mxu0 %v3075_v12 }
  0x90   : > { %2930 = vmatprep.subr.bf16.mxu0 %v3076_v28 }
  0x91   : > { %1936 = vmatmul.mubr.bf16.gmra.mrb[48].mxu1 %v3689_v8 }
  0x92   : > { %1943 = vmatprep.mubr.bf16.mxu1 %v3763_v63 }
  0x93   : > { %2931 = vmatpush3.bf16.msra.mxu0 %v3076_v28 }
  0x96   : > { %1839 = vmatmul.mubr.bf16.gmra.mrb[48].mxu0 %v3714_v43 }
  0x97   : > { %1846 = vmatprep.mubr.bf16.mxu0 %v3744_v25 }
  0x99   : > { %1944 = vmatmul.mubr.bf16.gmra.mrb[52].mxu1 %v3724_v46 }
  0x9a   : > { %1951 = vmatprep.mubr.bf16.mxu1 %v3773_v1 }
  0x9e   : > { %1847 = vmatmul.mubr.bf16.gmra.mrb[52].mxu0 %v3737_v5 }
  0x9f   : > { %1854 = vmatprep.mubr.bf16.mxu0 %v3767_v24 }
  0xa1   : > { %1952 = vmatmul.mubr.bf16.gmra.mrb[56].mxu1 %v3751_v36 }
  0xa2   : > { %1959 = vmatprep.mubr.bf16.mxu1 %v996_v30 }
  0xa6   : > { %1855 = vmatmul.mubr.bf16.gmra.mrb[56].mxu0 %v3763_v63 }
  0xa7   : > { %1862 = vmatprep.mubr.bf16.mxu0 %v3760_v62 }
  0xa9   : > { %1960 = vmatmul.mubr.bf16.gmra.mrb[60].mxu1 %v3777_v7 }
  0xaa   : > { %2940 = vmatprep.mubr.bf16.mxu1 %v3744_v25 }
  0xae   : > { %1863 = vmatmul.mubr.bf16.gmra.mrb[60].mxu0 %v3773_v1 }
  0xaf   : > { %2932 = vmatprep.mubr.bf16.mxu0 %v3554_v57 }
  0xb1   : > { %2941 = vmatmul.mubr.bf16.vlgmr.msra.gmra.mrb[64].mxu1 %v3767_v24 }
  0xb2   : > { %2944 = vmatprep.mubr.bf16.mxu1 %v3760_v62 }
  0xb6   : > { %2933 = vmatmul.mubr.bf16.vlgmr.msra.gmra.mrb[64].mxu0 %v3612_v29 }
  0xb7   : > { %2936 = vmatprep.mubr.bf16.mxu0 %v3680_v60 }
  0xb9   : > { %2945 = vmatmul.mubr.bf16.gmra.mrb[68].mxu1 %v3785_v13 }
  0xbe   : > { %2937 = vmatmul.mubr.bf16.gmra.mrb[68].mxu0 %v3719_v35 }
 0x104   : > { %v2724_v15 = vpop.f32.mrb[0].mxu1 }
 0x105   : > { %v2725_v18 = vpop.f32.mrb[1].mxu1 }
 0x106   : > { %v2726_v51 = vadd.f32 %v2725_v18, %v2724_v15  ;;  %v2727_v6 = vpop.f32.mrb[2].mxu1 }
 0x107   : > { %v2728_v14 = vpop.f32.mrb[3].mxu1 }
 0x108   : > { %v2729_v8 = vadd.f32 %v2728_v14, %v2727_v6 }
 0x109   : > { %v2660_v43 = vpop.f32.mrb[0].mxu0 }
 0x10a   : > { %v2661_v57 = vpop.f32.mrb[1].mxu0 }
 0x10b   : > { %v2662_v46 = vadd.f32 %v2661_v57, %v2660_v43  ;;  %v2663_v5 = vpop.f32.mrb[2].mxu0 }
 0x10c   : > { %v2664_v16 = vpop.f32.mrb[3].mxu0  ;;  %v2730_v45 = vpop.f32.mrb[4].mxu1 }
 0x10d   : > { %v3850_v21 = vadd.f32 %v2726_v51, %v2662_v46  ;;  %v2665_v29 = vadd.f32 %v2664_v16, %v2663_v5  ;;  %v2731_v60 = vpop.f32.mrb[5].mxu1 }
 0x10e   : > { %v2732_v22 = vadd.f32 %v2731_v60, %v2730_v45  ;;  %v2733_v23 = vpop.f32.mrb[6].mxu1 }
 0x10f   : > { %v3852_v25 = vadd.f32 %v2729_v8, %v2665_v29  ;;  %v2734_v35 = vpop.f32.mrb[7].mxu1 }
 0x110   : > { %v2735_v27 = vadd.f32 %v2734_v35, %v2733_v23 }
 0x111   : > { %v2666_v31 = vpop.f32.mrb[4].mxu0 }
 0x112   : > { %v2667_v32 = vpop.f32.mrb[5].mxu0 }
 0x113   : > { %v2668_v48 = vadd.f32 %v2667_v32, %v2666_v31  ;;  %v2669_v33 = vpop.f32.mrb[6].mxu0 }
 0x114   : > { %v2670_v34 = vpop.f32.mrb[7].mxu0  ;;  %v2736_v36 = vpop.f32.mrb[8].mxu1 }
 0x115   : > { %v3854_v4 = vadd.f32 %v2732_v22, %v2668_v48  ;;  %v2671_v37 = vadd.f32 %v2670_v34, %v2669_v33  ;;  %v2737_v61 = vpop.f32.mrb[9].mxu1 }
 0x116   : > { %v2738_v17 = vadd.f32 %v2737_v61, %v2736_v36  ;;  %v2739_v19 = vpop.f32.mrb[10].mxu1 }
 0x117   : > { %v3856_v38 = vadd.f32 %v2735_v27, %v2671_v37  ;;  %v2740_v42 = vpop.f32.mrb[11].mxu1 }
 0x118   : > { %v2741_v47 = vadd.f32 %v2740_v42, %v2739_v19 }
 0x119   : > { %v2672_v49 = vpop.f32.mrb[8].mxu0 }
 0x11a   : > { %v2673_v50 = vpop.f32.mrb[9].mxu0 }
 0x11b   : > { %v2674_v55 = vadd.f32 %v2673_v50, %v2672_v49  ;;  %v2675_v58 = vpop.f32.mrb[10].mxu0 }
 0x11c   : > { %v2676_v62 = vpop.f32.mrb[11].mxu0  ;;  %v2742_v63 = vpop.f32.mrb[12].mxu1 }
 0x11d   : > { %v3858_v0 = vadd.f32 %v2738_v17, %v2674_v55  ;;  %v2677_v53 = vadd.f32 %v2676_v62, %v2675_v58  ;;  %v2743_v24 = vpop.f32.mrb[13].mxu1 }
 0x11e   : > { %v2744_v40 = vadd.f32 %v2743_v24, %v2742_v63  ;;  %v2745_v56 = vpop.f32.mrb[14].mxu1 }
 0x11f   : > { %v3860_v1 = vadd.f32 %v2741_v47, %v2677_v53  ;;  %v2746_v2 = vpop.f32.mrb[15].mxu1 }
 0x120   : > { %v2747_v3 = vadd.f32 %v2746_v2, %v2745_v56 }
 0x121   : > { %v2678_v7 = vpop.f32.mrb[12].mxu0 }
 0x122   : > { %v2679_v59 = vpop.f32.mrb[13].mxu0 }
 0x123   : > { %v2680_v52 = vadd.f32 %v2679_v59, %v2678_v7  ;;  %v2681_v9 = vpop.f32.mrb[14].mxu0 }
 0x124   : > { %v2682_v10 = vpop.f32.mrb[15].mxu0  ;;  %v2748_v11 = vpop.f32.mrb[16].mxu1 }
 0x125   : > { %v3862_v13 = vadd.f32 %v2744_v40, %v2680_v52  ;;  %v2683_v20 = vadd.f32 %v2682_v10, %v2681_v9  ;;  %v2749_v41 = vpop.f32.mrb[17].mxu1 }
 0x126   : > { %v2750_v30 = vadd.f32 %v2749_v41, %v2748_v11  ;;  %v2751_v44 = vpop.f32.mrb[18].mxu1 }
 0x127   : > { %v3864_v26 = vadd.f32 %v2747_v3, %v2683_v20  ;;  %v2752_v39 = vpop.f32.mrb[19].mxu1 }
 0x128   : > { %v2753_v54 = vadd.f32 %v2752_v39, %v2751_v44 }
 0x129   : > { %v2684_v12 = vpop.f32.mrb[16].mxu0 }
 0x12a   : > { %v2685_v28 = vpop.f32.mrb[17].mxu0 }
 0x12b   : > { %v2686_v15 = vadd.f32 %v2685_v28, %v2684_v12  ;;  %v2687_v18 = vpop.f32.mrb[18].mxu0 }
 0x12c   : > { %v2688_v51 = vpop.f32.mrb[19].mxu0  ;;  %v2754_v6 = vpop.f32.mrb[20].mxu1 }
 0x12d   : > { %v3866_v14 = vadd.f32 %v2750_v30, %v2686_v15  ;;  %v2689_v8 = vadd.f32 %v2688_v51, %v2687_v18  ;;  %v2755_v43 = vpop.f32.mrb[21].mxu1 }
 0x12e   : > { %v2756_v57 = vadd.f32 %v2755_v43, %v2754_v6  ;;  %v2757_v46 = vpop.f32.mrb[22].mxu1 }
 0x12f   : > { %v3868_v5 = vadd.f32 %v2753_v54, %v2689_v8  ;;  %v2758_v16 = vpop.f32.mrb[23].mxu1 }
 0x130   : > { %v2759_v45 = vadd.f32 %v2758_v16, %v2757_v46 }
 0x131   : > { %v2690_v29 = vpop.f32.mrb[20].mxu0 }
 0x132   : > { %v2691_v60 = vpop.f32.mrb[21].mxu0 }
 0x133   : > { %v2692_v22 = vadd.f32 %v2691_v60, %v2690_v29  ;;  %v2693_v23 = vpop.f32.mrb[22].mxu0 }
 0x134   : > { %v2694_v35 = vpop.f32.mrb[23].mxu0  ;;  %v2760_v27 = vpop.f32.mrb[24].mxu1 }
 0x135   : > { %v3870_v31 = vadd.f32 %v2756_v57, %v2692_v22  ;;  %v2695_v32 = vadd.f32 %v2694_v35, %v2693_v23  ;;  %v2761_v48 = vpop.f32.mrb[25].mxu1 }
 0x136   : > { %v2762_v33 = vadd.f32 %v2761_v48, %v2760_v27  ;;  %v2763_v34 = vpop.f32.mrb[26].mxu1 }
 0x137   : > { %v3872_v36 = vadd.f32 %v2759_v45, %v2695_v32  ;;  %v2764_v37 = vpop.f32.mrb[27].mxu1 }
 0x138   : > { %v2765_v61 = vadd.f32 %v2764_v37, %v2763_v34 }
 0x139   : > { %v2696_v17 = vpop.f32.mrb[24].mxu0 }
 0x13a   : > { %v2697_v19 = vpop.f32.mrb[25].mxu0 }
 0x13b   : > { %v2698_v42 = vadd.f32 %v2697_v19, %v2696_v17  ;;  %v2699_v47 = vpop.f32.mrb[26].mxu0 }
 0x13c   : > { %v2700_v49 = vpop.f32.mrb[27].mxu0  ;;  %v2766_v50 = vpop.f32.mrb[28].mxu1 }
 0x13d   : > { %v3874_v55 = vadd.f32 %v2762_v33, %v2698_v42  ;;  %v2701_v58 = vadd.f32 %v2700_v49, %v2699_v47  ;;  %v2767_v62 = vpop.f32.mrb[29].mxu1 }
 0x13e   : > { %v2768_v63 = vadd.f32 %v2767_v62, %v2766_v50  ;;  %v2769_v53 = vpop.f32.mrb[30].mxu1 }
 0x13f   : > { %v3876_v24 = vadd.f32 %v2765_v61, %v2701_v58  ;;  %v2770_v40 = vpop.f32.mrb[31].mxu1 }
 0x140   : > { %v2771_v56 = vadd.f32 %v2770_v40, %v2769_v53 }
 0x141   : > { %v2702_v2 = vpop.f32.mrb[28].mxu0 }
 0x142   : > { %v2703_v3 = vpop.f32.mrb[29].mxu0 }
 0x143   : > { %v2704_v7 = vadd.f32 %v2703_v3, %v2702_v2  ;;  %v2705_v59 = vpop.f32.mrb[30].mxu0 }
 0x144   : > { %v2706_v52 = vpop.f32.mrb[31].mxu0  ;;  %v2852_v9 = vpop.f32.mrb[32].mxu1 }
 0x145   : > { %v3878_v10 = vadd.f32 %v2768_v63, %v2704_v7  ;;  %v2707_v11 = vadd.f32 %v2706_v52, %v2705_v59  ;;  %v2853_v20 = vpop.f32.mrb[33].mxu1 }
 0x146   : > { %v2854_v41 = vadd.f32 %v2853_v20, %v2852_v9  ;;  %v2855_v30 = vpop.f32.mrb[34].mxu1 }
 0x147   : > { %v3880_v44 = vadd.f32 %v2771_v56, %v2707_v11  ;;  %v2856_v39 = vpop.f32.mrb[35].mxu1 }
 0x148   : > { %v2857_v54 = vadd.f32 %v2856_v39, %v2855_v30 }
 0x149   : > { %v2788_v12 = vpop.f32.mrb[32].mxu0 }
 0x14a   : > { %v2789_v28 = vpop.f32.mrb[33].mxu0 }
 0x14b   : > { %v2790_v15 = vadd.f32 %v2789_v28, %v2788_v12  ;;  %v2791_v18 = vpop.f32.mrb[34].mxu0 }
 0x14c   : > { %v2792_v51 = vpop.f32.mrb[35].mxu0  ;;  %v2858_v6 = vpop.f32.mrb[36].mxu1 }
 0x14d   : > { %v1809_v8 = vadd.f32 %v2790_v15, %v3850_v21  ;;  %v2793_v43 = vadd.f32 %v2792_v51, %v2791_v18  ;;  %v2859_v57 = vpop.f32.mrb[37].mxu1 }
 0x14e   : > { %v2860_v46 = vadd.f32 %v2859_v57, %v2858_v6  ;;  %v2861_v16 = vpop.f32.mrb[38].mxu1 }
 0x14f   : > { %v1812_v45 = vadd.f32 %v2793_v43, %v3852_v25  ;;  %v2862_v29 = vpop.f32.mrb[39].mxu1  ;;  %v3884_v60 = vadd.f32 %v2854_v41, %v1809_v8 }
 0x150   : > { %v2863_v22 = vadd.f32 %v2862_v29, %v2861_v16 }
 0x151   : > { %v2794_v23 = vpop.f32.mrb[36].mxu0  ;;  %v3886_v35 = vadd.f32 %v2857_v54, %v1812_v45 }
 0x152   : > { %v2795_v27 = vpop.f32.mrb[37].mxu0 }
 0x153   : > { %v2796_v32 = vadd.f32 %v2795_v27, %v2794_v23  ;;  %v2797_v48 = vpop.f32.mrb[38].mxu0 }
 0x154   : > { %v2798_v33 = vpop.f32.mrb[39].mxu0  ;;  %v2864_v34 = vpop.f32.mrb[40].mxu1 }
 0x155   : > { %v1817_v21 = vadd.f32 %v2796_v32, %v3854_v4  ;;  %v2799_v37 = vadd.f32 %v2798_v33, %v2797_v48  ;;  %v2865_v61 = vpop.f32.mrb[41].mxu1 }
 0x156   : > { %v2866_v17 = vadd.f32 %v2865_v61, %v2864_v34  ;;  %v2867_v19 = vpop.f32.mrb[42].mxu1 }
 0x157   : > { %v1820_v25 = vadd.f32 %v2799_v37, %v3856_v38  ;;  %v2868_v42 = vpop.f32.mrb[43].mxu1  ;;  %v3890_v47 = vadd.f32 %v2860_v46, %v1817_v21 }
 0x158   : > { %v2869_v49 = vadd.f32 %v2868_v42, %v2867_v19 }
 0x159   : > { %v2800_v50 = vpop.f32.mrb[40].mxu0  ;;  %v3892_v58 = vadd.f32 %v2863_v22, %v1820_v25 }
 0x15a   : > { %v2801_v62 = vpop.f32.mrb[41].mxu0 }
 0x15b   : > { %v2802_v63 = vadd.f32 %v2801_v62, %v2800_v50  ;;  %v2803_v53 = vpop.f32.mrb[42].mxu0 }
 0x15c   : > { %v2804_v40 = vpop.f32.mrb[43].mxu0  ;;  %v2870_v56 = vpop.f32.mrb[44].mxu1 }
 0x15d   : > { %v1825_v4 = vadd.f32 %v2802_v63, %v3858_v0  ;;  %v2805_v2 = vadd.f32 %v2804_v40, %v2803_v53  ;;  %v2871_v3 = vpop.f32.mrb[45].mxu1 }
 0x15e   : > { %v2872_v7 = vadd.f32 %v2871_v3, %v2870_v56  ;;  %v2873_v59 = vpop.f32.mrb[46].mxu1 }
 0x15f   : > { %v1828_v38 = vadd.f32 %v2805_v2, %v3860_v1  ;;  %v2874_v52 = vpop.f32.mrb[47].mxu1  ;;  %v3896_v9 = vadd.f32 %v2866_v17, %v1825_v4 }
 0x160   : > { %v2875_v11 = vadd.f32 %v2874_v52, %v2873_v59 }
 0x161   : > { %v2806_v20 = vpop.f32.mrb[44].mxu0  ;;  %v3898_v41 = vadd.f32 %v2869_v49, %v1828_v38 }
 0x162   : > { %v2807_v30 = vpop.f32.mrb[45].mxu0 }
 0x163   : > { %v2808_v39 = vadd.f32 %v2807_v30, %v2806_v20  ;;  %v2809_v54 = vpop.f32.mrb[46].mxu0 }
 0x164   : > { %v2810_v12 = vpop.f32.mrb[47].mxu0  ;;  %v2876_v28 = vpop.f32.mrb[48].mxu1 }
 0x165   : > { %v1833_v0 = vadd.f32 %v2808_v39, %v3862_v13  ;;  %v2811_v15 = vadd.f32 %v2810_v12, %v2809_v54  ;;  %v2877_v18 = vpop.f32.mrb[49].mxu1 }
 0x166   : > { %v2878_v51 = vadd.f32 %v2877_v18, %v2876_v28  ;;  %v2879_v6 = vpop.f32.mrb[50].mxu1 }
 0x167   : > { %v1836_v1 = vadd.f32 %v2811_v15, %v3864_v26  ;;  %v2880_v8 = vpop.f32.mrb[51].mxu1  ;;  %v3902_v43 = vadd.f32 %v2872_v7, %v1833_v0 }
 0x168   : > { %v2881_v57 = vadd.f32 %v2880_v8, %v2879_v6 }
 0x169   : > { %v2812_v46 = vpop.f32.mrb[48].mxu0  ;;  %v3904_v16 = vadd.f32 %v2875_v11, %v1836_v1 }
 0x16a   : > { %v2813_v45 = vpop.f32.mrb[49].mxu0 }
 0x16b   : > { %v2814_v29 = vadd.f32 %v2813_v45, %v2812_v46  ;;  %v2815_v22 = vpop.f32.mrb[50].mxu0 }
 0x16c   : > { %v2816_v23 = vpop.f32.mrb[51].mxu0  ;;  %v2882_v27 = vpop.f32.mrb[52].mxu1 }
 0x16d   : > { %v1841_v13 = vadd.f32 %v2814_v29, %v3866_v14  ;;  %v2817_v32 = vadd.f32 %v2816_v23, %v2815_v22  ;;  %v2883_v48 = vpop.f32.mrb[53].mxu1 }
 0x16e   : > { %v2884_v33 = vadd.f32 %v2883_v48, %v2882_v27  ;;  %v2885_v34 = vpop.f32.mrb[54].mxu1 }
 0x16f   : > { %v1844_v26 = vadd.f32 %v2817_v32, %v3868_v5  ;;  %v2886_v21 = vpop.f32.mrb[55].mxu1  ;;  %v1938_v37 = vadd.f32 %v2878_v51, %v1841_v13 }
 0x170   : > { %v2887_v61 = vadd.f32 %v2886_v21, %v2885_v34 }
 0x171   : > { %v2818_v17 = vpop.f32.mrb[52].mxu0  ;;  %v1941_v19 = vadd.f32 %v2881_v57, %v1844_v26 }
 0x172   : > { %v2819_v25 = vpop.f32.mrb[53].mxu0 }
 0x173   : > { %v2820_v42 = vadd.f32 %v2819_v25, %v2818_v17  ;;  %v2821_v49 = vpop.f32.mrb[54].mxu0 }
 0x174   : > { %v2822_v50 = vpop.f32.mrb[55].mxu0  ;;  %v2888_v62 = vpop.f32.mrb[56].mxu1 }
 0x175   : > { %v1849_v63 = vadd.f32 %v2820_v42, %v3870_v31  ;;  %v2823_v53 = vadd.f32 %v2822_v50, %v2821_v49  ;;  %v2889_v14 = vpop.f32.mrb[57].mxu1 }
 0x176   : > { %v2890_v40 = vadd.f32 %v2889_v14, %v2888_v62  ;;  %v2891_v56 = vpop.f32.mrb[58].mxu1 }
 0x177   : > { %v1852_v4 = vadd.f32 %v2823_v53, %v3872_v36  ;;  %v2892_v2 = vpop.f32.mrb[59].mxu1  ;;  %v1946_v5 = vadd.f32 %v2884_v33, %v1849_v63 }
 0x178   : > { %v2893_v3 = vadd.f32 %v2892_v2, %v2891_v56 }
 0x179   : > { %v2824_v7 = vpop.f32.mrb[56].mxu0  ;;  %v1949_v59 = vadd.f32 %v2887_v61, %v1852_v4 }
 0x17a   : > { %v2825_v38 = vpop.f32.mrb[57].mxu0 }
 0x17b   : > { %v2826_v52 = vadd.f32 %v2825_v38, %v2824_v7  ;;  %v2827_v11 = vpop.f32.mrb[58].mxu0 }
 0x17c   : > { %v2828_v20 = vpop.f32.mrb[59].mxu0  ;;  %v2894_v30 = vpop.f32.mrb[60].mxu1 }
 0x17d   : > { %v1857_v39 = vadd.f32 %v2826_v52, %v3874_v55  ;;  %v2829_v54 = vadd.f32 %v2828_v20, %v2827_v11  ;;  %v2895_v31 = vpop.f32.mrb[61].mxu1 }
 0x17e   : > { %v2896_v12 = vadd.f32 %v2895_v31, %v2894_v30  ;;  %v2897_v28 = vpop.f32.mrb[62].mxu1 }
 0x17f   : > { %v1860_v0 = vadd.f32 %v2829_v54, %v3876_v24  ;;  %v2898_v15 = vpop.f32.mrb[63].mxu1  ;;  %v1954_v36 = vadd.f32 %v2890_v40, %v1857_v39 }
 0x180   : > { %v2899_v18 = vadd.f32 %v2898_v15, %v2897_v28 }
 0x181   : > { %v2830_v51 = vpop.f32.mrb[60].mxu0  ;;  %v1957_v6 = vadd.f32 %v2893_v3, %v1860_v0 }
 0x182   : > { %v2831_v1 = vpop.f32.mrb[61].mxu0 }
 0x183   : > { %v2832_v8 = vadd.f32 %v2831_v1, %v2830_v51  ;;  %v2833_v57 = vpop.f32.mrb[62].mxu0 }
 0x184   : > { %v2834_v46 = vpop.f32.mrb[63].mxu0  ;;  %v2942_v45 = vpop.f32.mrb[64].mxu1 }
 0x185   : > { %v1865_v29 = vadd.f32 %v2832_v8, %v3878_v10  ;;  %v2835_v55 = vadd.f32 %v2834_v46, %v2833_v57  ;;  %v3913_v22 = vadd.f32 %v2942_v45, %v1946_v5  ;;  %v2034_v23 = vpop.f32.mrb[65].mxu1 }
 0x186   : > { %v3915_v27 = vadd.f32 %v2034_v23, %v1938_v37  ;;  %v2943_v24 = vpop.f32.mrb[66].mxu1 }
 0x187   : > { %v1868_v13 = vadd.f32 %v2835_v55, %v3880_v44  ;;  %v3918_v32 = vadd.f32 %v2943_v24, %v1949_v59  ;;  %v2037_v48 = vpop.f32.mrb[67].mxu1  ;;  %v1962_v33 = vadd.f32 %v2896_v12, %v1865_v29 }
 0x188   : > { %v3927_v10 = vadd.f32 %v2037_v48, %v1941_v19 }
 0x189   : > { %v2618_v34 = vpack.c.bf16 %v3918_v32, %v3913_v22  ;;  %v2934_v26 = vpop.f32.mrb[64].mxu0  ;;  %v1965_v21 = vadd.f32 %v2899_v18, %v1868_v13 }
 0x18a   : > { %v2613_v44 = vpack.c.bf16 %v3927_v10, %v3915_v27  ;;  %v2011_v37 = vadd.f32 %v2934_v26, %v3890_v47  ;;  %v2002_v61 = vpop.f32.mrb[65].mxu0 }
 0x18b   : > { %2641 = vst [vmem:[%s3925_s15 + $0x28] sm:$0xff] %v2618_v34   ;;  %v2003_v17 = vadd.f32 %v2002_v61, %v3884_v60  ;;  %v2935_v25 = vpop.f32.mrb[66].mxu0  ;;  %v2096_v34 = vmul.f32 %v3913_v22, %v3913_v22 }
 0x18c   : > { %2640 = vst [vmem:[%s3925_s15 + $0x20] sm:$0xff] %v2613_v44   ;;  %v2014_v19 = vadd.f32 %v2935_v25, %v3892_v58  ;;  %v2005_v42 = vpop.f32.mrb[67].mxu0  ;;  %v2946_v49 = vpop.f32.mrb[68].mxu1  ;;  %v2088_v3 = vmul.f32 %v2011_v37, %v2011_v37  ;;  %v2097_v44 = vmul.f32 %v3918_v32, %v3918_v32 }
 0x18d   : > { %v2006_v50 = vadd.f32 %v2005_v42, %v3886_v35  ;;  %v3939_v62 = vadd.f32 %v2946_v49, %v1962_v33  ;;  %v2050_v63 = vpop.f32.mrb[69].mxu1  ;;  %v2086_v40 = vmul.f32 %v2003_v17, %v2003_v17 }
 0x18e   : > { %v2598_v53 = vpack.c.bf16 %v2014_v19, %v2011_v37  ;;  %v2051_v14 = vadd.f32 %v2050_v63, %v1954_v36  ;;  %v2947_v47 = vpop.f32.mrb[70].mxu1  ;;  %v2089_v38 = vmul.f32 %v2014_v19, %v2014_v19 }
 0x18f   : > { %v2065_v56 = vadd.f32 %v2006_v50, %v2003_v17  ;;  %v2087_v4 = vmul.f32 %v2006_v50, %v2006_v50  ;;  %v2593_v60 = vpack.c.bf16 %v2006_v50, %v2003_v17  ;;  %v2053_v2 = vpop.f32.mrb[71].mxu1  ;;  %v2062_v5 = vadd.f32 %v2947_v47, %v1965_v21 }
 0x190   : > { %2637 = vst [vmem:[%s3925_s15 + $0x8] sm:$0xff] %v2598_v53   ;;  %v2054_v58 = vadd.f32 %v2053_v2, %v1957_v6  ;;  %v2098_v61 = vmul.f32 %v2051_v14, %v2051_v14  ;;  %v2100_v49 = vmul.f32 %v3939_v62, %v3939_v62 }
 0x191   : > { %v2066_v7 = vadd.f32 %v2065_v56, %v2011_v37  ;;  %v2102_v35 = vadd.f32 %v2087_v4, %v2086_v40  ;;  %2594 = vst [vmem:[%s3925_s15] sm:$0xff] %v2593_v60   ;;  %v2938_v59 = vpop.f32.mrb[68].mxu0  ;;  %v2628_v52 = vpack.c.bf16 %v2062_v5, %v3939_v62  ;;  %v2101_v63 = vmul.f32 %v2062_v5, %v2062_v5 }
 0x192   : > { %v2623_v11 = vpack.c.bf16 %v2054_v58, %v2051_v14  ;;  %v2018_v20 = vpop.f32.mrb[69].mxu0  ;;  %v2027_v39 = vadd.f32 %v2938_v59, %v3902_v43 }
 0x193   : > { %v2103_v30 = vadd.f32 %v2102_v35, %v2088_v3  ;;  %v2019_v54 = vadd.f32 %v2018_v20, %v3896_v9  ;;  %v2067_v31 = vadd.f32 %v2066_v7, %v2014_v19  ;;  %v2939_v12 = vpop.f32.mrb[70].mxu0  ;;  %2643 = vst [vmem:[%s3925_s15 + $0x38] sm:$0xff] %v2628_v52  }
 0x194   : > { %2642 = vst [vmem:[%s3925_s15 + $0x30] sm:$0xff] %v2623_v11   ;;  %v2030_v28 = vadd.f32 %v2939_v12, %v3904_v16  ;;  %v2021_v0 = vpop.f32.mrb[71].mxu0  ;;  %v2092_v9 = vmul.f32 %v2027_v39, %v2027_v39  ;;  %v2094_v16 = vmul.f32 %v3915_v27, %v3915_v27 }
 0x195   : > { %v2068_v15 = vadd.f32 %v2067_v31, %v2019_v54  ;;  %v2090_v36 = vmul.f32 %v2019_v54, %v2019_v54  ;;  %v2104_v18 = vadd.f32 %v2103_v30, %v2089_v38  ;;  %v2022_v6 = vadd.f32 %v2021_v0, %v3898_v41 }
 0x196   : > { %v2608_v51 = vpack.c.bf16 %v2030_v28, %v2027_v39  ;;  %v2093_v29 = vmul.f32 %v2030_v28, %v2030_v28  ;;  %v2095_v41 = vmul.f32 %v3927_v10, %v3927_v10 }
 0x197   : > { %v2105_v1 = vadd.f32 %v2104_v18, %v2090_v36  ;;  %v2069_v8 = vadd.f32 %v2068_v15, %v2022_v6  ;;  %v2091_v43 = vmul.f32 %v2022_v6, %v2022_v6  ;;  %v2603_v57 = vpack.c.bf16 %v2022_v6, %v2019_v54 }
 0x198   : > { %2639 = vst [vmem:[%s3925_s15 + $0x18] sm:$0xff] %v2608_v51  }
 0x199   : > { %v2070_v46 = vadd.f32 %v2069_v8, %v2027_v39  ;;  %v2106_v45 = vadd.f32 %v2105_v1, %v2091_v43  ;;  %2638 = vst [vmem:[%s3925_s15 + $0x10] sm:$0xff] %v2603_v57  }
 0x19b   : > { %v2071_v55 = vadd.f32 %v2070_v46, %v2030_v28  ;;  %v2107_v23 = vadd.f32 %v2106_v45, %v2092_v9 }
 0x19d   : > { %v2072_v24 = vadd.f32 %v2071_v55, %v3915_v27  ;;  %v2108_v13 = vadd.f32 %v2107_v23, %v2093_v29 }
 0x19f   : > { %v2073_v48 = vadd.f32 %v2072_v24, %v3927_v10  ;;  %v2109_v33 = vadd.f32 %v2108_v13, %v2094_v16  ;;  %v2099_v10 = vmul.f32 %v2054_v58, %v2054_v58 }
 0x1a1   : > { %v2074_v26 = vadd.f32 %v2073_v48, %v3913_v22  ;;  %v2110_v21 = vadd.f32 %v2109_v33, %v2095_v41 }
 0x1a3   : > { %v2075_v37 = vadd.f32 %v2074_v26, %v3918_v32  ;;  %v2111_v27 = vadd.f32 %v2110_v21, %v2096_v34 }
 0x1a5   : > { %v2076_v17 = vadd.f32 %v2075_v37, %v2051_v14  ;;  %v2112_v25 = vadd.f32 %v2111_v27, %v2097_v44 }
 0x1a7   : > { %v2077_v19 = vadd.f32 %v2076_v17, %v2054_v58  ;;  %v2113_v42 = vadd.f32 %v2112_v25, %v2098_v61 }
 0x1a9   : > { %v2078_v22 = vadd.f32 %v2077_v19, %v3939_v62  ;;  %v2114_v50 = vadd.f32 %v2113_v42, %v2099_v10 }
 0x1ab   : > { %v2079_v53 = vadd.f32 %v2078_v22, %v2062_v5  ;;  %v2115_v47 = vadd.f32 %v2114_v50, %v2100_v49 }
 0x1ad   : > { %v2080_v32 = vrot.slane %v2079_v53, 4  ;;  %v2116_v40 = vadd.f32 %v2115_v47, %v2101_v63 }
 0x1af   : > { %v2081_v56 = vadd.f32 %v2080_v32, %v2079_v53  ;;  %v2117_v14 = vrot.slane %v2116_v40, 4 }
 0x1b1   : > { %v2082_v4 = vrot.slane %v2081_v56, 2  ;;  %v2118_v60 = vadd.f32 %v2117_v14, %v2116_v40 }
 0x1b3   : > { %v2083_v2 = vadd.f32 %v2082_v4, %v2081_v56  ;;  %v2119_v58 = vrot.slane %v2118_v60, 2 }
 0x1b5   : > { %v2084_v3 = vrot.slane %v2083_v2, 1  ;;  %v2120_v7 = vadd.f32 %v2119_v58, %v2118_v60 }
 0x1b7   : > { %v2121_v62 = vrot.slane %v2120_v7, 1  ;;  %v2085_v5 = vadd.f32 %v2084_v3, %v2083_v2 }
 0x1b9   : > { %v2122_v35 = vadd.f32 %v2121_v62, %v2120_v7 }
 0x1bb   : > { %v2124_v59 = vsel %vm789_vm4, %v2085_v5, %v2122_v35 }
 0x1bc   : > { %2125 = vst [vmem:[%s467_s23] sm:$0x3] %v2124_v59 }
 0x1bd PF: > { %s18_s28 = sadd.s32 1, %s3115_s28   ;;  %s4000_s24 = smov %s3107_s26 }
 0x1be   : > { %p15_p11 = scmp.ge.s32.totalorder %s18_s28, 6   ;;  %s4001_s25 = smov %s3111_s27 }
 0x1bf   : > { %s4002_s26 = smov %s4005_s29  ;;  %s4003_s27 = smov %s4009_s30 }
 0x1c0   :  { %17 = sbr.rel (!%p15_p11) target bundleno = 3 (0x3), region = 92 }

</bundles_post_ra>
